<compile_context>
chip_gen: v7x
topology: tpu7x:2x2x1
jax: 0.10.0
libtpu: 0.0.40
codegen_flags: <defaults>
</compile_context>

<pallas_src>
import functools
import math

import jax
import jax.numpy as jnp
from jax import lax
from jax.experimental import pallas as pl
from jax.experimental.pallas import tpu as pltpu


# -----------------------------------------------------------------------------
# Kernel: one time-block of one LSTM layer.
#   phase 1: gx[j] = x[j] @ W_ih   for all block_t timesteps (off the serial
#            per-step chain, MXU work amortized per block, no HBM gx).
#   phase 2: serial recurrence over the block with loop-carried (h, c),
#            optionally interleaving two independent batch sub-tiles.
# -----------------------------------------------------------------------------
def _lstm_fused_kernel(x_ref, wih_ref, whh_ref, y_ref, cN_ref,
                       gx_scr, h_scr, c_scr, *,
                       hidden_p, seq_len, block_t, n_sub, matmul_dtype,
                       needs_mask):
    tb = pl.program_id(1)                      # time-block index (sequential)
    Hp = hidden_p

    @pl.when(tb == 0)
    def _():
        h_scr[...] = jnp.zeros_like(h_scr)
        c_scr[...] = jnp.zeros_like(c_scr)

    wih = wih_ref[...]                         # (d_in, 4Hp), matmul dtype
    whh = whh_ref[...]                         # (Hp,  4Hp), matmul dtype

    unroll = min(block_t, 8)

    # ---- phase 1: fused input GEMM for this time block ----------------------
    def gx_step(j, carry):
        gx_scr[j] = jnp.dot(x_ref[j].astype(matmul_dtype), wih,
                            preferred_element_type=jnp.float32)
        return carry

    lax.fori_loop(0, block_t, gx_step, 0, unroll=unroll)

    bb = h_scr.shape[0]
    sub = bb // n_sub

    # ---- phase 2: serial recurrence with loop-carried state ------------------
    def step(i, carry):
        hs, cs = carry
        gxi = gx_scr[i]                        # (bb, 4Hp) f32
        t = tb * block_t + i
        new_h, new_c = [], []
        for s in range(n_sub):                 # independent sub-tiles -> ILP
            lo = s * sub
            h = hs[s]                          # matmul_dtype
            c = cs[s]                          # f32
            gates = gxi[lo:lo + sub, :] + jnp.dot(
                h, whh, preferred_element_type=jnp.float32)
            # fused-LSTM gate order: i, f, g, o; gate math in f32 (v5e-safe).
            i_g = jax.nn.sigmoid(gates[:, 0 * Hp:1 * Hp])
            f_g = jax.nn.sigmoid(gates[:, 1 * Hp:2 * Hp])
            g_g = jnp.tanh(gates[:, 2 * Hp:3 * Hp])
            o_g = jax.nn.sigmoid(gates[:, 3 * Hp:4 * Hp])
            c_new = f_g * c + i_g * g_g
            h_new = o_g * jnp.tanh(c_new)
            if needs_mask:                     # only emitted when seq is padded
                valid = t < seq_len
                c_new = jnp.where(valid, c_new, c)
                h_new = jnp.where(valid, h_new, h.astype(jnp.float32))
            y_ref[i, lo:lo + sub, :] = h_new.astype(y_ref.dtype)
            new_h.append(h_new.astype(matmul_dtype))
            new_c.append(c_new)
        return tuple(new_h), tuple(new_c)

    init = (tuple(h_scr[s * sub:(s + 1) * sub, :] for s in range(n_sub)),
            tuple(c_scr[s * sub:(s + 1) * sub, :] for s in range(n_sub)))
    hs, cs = lax.fori_loop(0, block_t, step, init, unroll=unroll)

    # single write-back of the carried state per time block
    for s in range(n_sub):
        h_scr[s * sub:(s + 1) * sub, :] = hs[s]
        c_scr[s * sub:(s + 1) * sub, :] = cs[s]

    @pl.when(tb == pl.num_programs(1) - 1)
    def _():
        cN_ref[...] = c_scr[...].astype(cN_ref.dtype)


# -----------------------------------------------------------------------------
# Host-side helpers
# -----------------------------------------------------------------------------
def _round_up(x, m):
    return ((x + m - 1) // m) * m


def _tpu_hw():
    """(vmem_capacity_bytes, num_tensorcores) with conservative fallbacks."""
    vmem = 64 * 1024 * 1024       # v7x-safe default if the query fails
    cores = 1
    try:
        info = pltpu.get_tpu_info()
        vmem = int(getattr(info, "vmem_capacity_bytes", vmem) or vmem)
        for attr in ("num_cores", "core_count", "num_tensor_cores",
                     "tensorcore_count"):
            v = getattr(info, attr, None)
            if v:
                cores = int(v)
                break
    except Exception:
        pass
    return vmem, cores


def lstm_layer_pallas(x, wih_t, whh_t, *, block_t=None, batch_block=None,
                      matmul_dtype=jnp.float32):
    """One LSTM layer over the full sequence.

    x:     (seq, bsz, d_in) float32
    wih_t: (d_in, 4H)  pre-transposed input-to-hidden weights
    whh_t: (H, 4H)     pre-transposed hidden-to-hidden weights
    returns: y (seq, bsz, H), h_n (bsz, H), c_n (bsz, H)
    """
    seq, bsz, d_in = x.shape
    H = whh_t.shape[0]
    assert wih_t.shape == (d_in, 4 * H) and whh_t.shape == (H, 4 * H)

    # ---- lane-pad the hidden dim to a multiple of 128 (per-gate), outside the
    #      hot path.  Padded units provably stay zero through the recurrence.
    Hp = _round_up(H, 128)
    if Hp != H:
        wih_t = jnp.pad(wih_t.reshape(d_in, 4, H),
                        ((0, 0), (0, 0), (0, Hp - H))).reshape(d_in, 4 * Hp)
        whh_t = jnp.pad(whh_t.reshape(H, 4, H),
                        ((0, Hp - H), (0, 0), (0, Hp - H))).reshape(Hp, 4 * Hp)
    Gp = 4 * Hp

    vmem_cap, n_cores = _tpu_hw()

    # ---- batch tiling: split across TensorCores when there is more than one
    #      (v7x); keep the whole batch in one tile on single-core chips.
    bsz_p = _round_up(bsz, 8)
    if batch_block is None:
        batch_block = bsz_p
        if n_cores > 1 and bsz_p % (8 * n_cores) == 0:
            batch_block = bsz_p // n_cores
    assert bsz_p % batch_block == 0 and batch_block % 8 == 0
    num_bb = bsz_p // batch_block

    # interleave two independent batch sub-tiles when the tile is wide enough
    n_sub = 2 if (batch_block >= 16 and batch_block % 16 == 0) else 1

    # ---- weights: stored in matmul dtype; single-buffer only when large
    w_item = jnp.dtype(matmul_dtype).itemsize
    w_bytes = (d_in * Gp + Hp * Gp) * w_item
    single_buffer_w = w_bytes > (8 << 20)

    # ---- time blocking: generation-aware budget, prefer a divisor of seq so
    #      no padding / masking is needed.
    io_item = x.dtype.itemsize
    blk_budget = (12 << 20) if vmem_cap >= (100 << 20) else (4 << 20)
    per_t = batch_block * (Gp * 4 + 2 * d_in * io_item + 2 * Hp * io_item)
    if block_t is None:
        cap = max(1, min(seq, 64, blk_budget // max(1, per_t)))
        block_t = 1
        for d in range(cap, 0, -1):
            if seq % d == 0:
                block_t = d
                break
        if block_t < max(1, cap // 2):
            block_t = cap                      # pad + mask inside the kernel
    seq_p = pl.cdiv(seq, block_t) * block_t
    needs_mask = seq_p != seq
    num_tb = seq_p // block_t

    if bsz_p != bsz or seq_p != seq:
        x = jnp.pad(x, ((0, seq_p - seq), (0, bsz_p - bsz), (0, 0)))

    wih_in = wih_t.astype(matmul_dtype)
    whh_in = whh_t.astype(matmul_dtype)

    # ---- explicit VMEM limit with ~20% headroom (v7x has 64 MiB physical).
    wbuf = 1 if single_buffer_w else 2
    est = (2 * block_t * batch_block * d_in * io_item        # x blocks (dbl)
           + 2 * block_t * batch_block * Hp * io_item        # y blocks (dbl)
           + block_t * batch_block * Gp * 4                  # gx scratch
           + wbuf * w_bytes                                  # resident weights
           + batch_block * Hp * (w_item + 4)                 # h/c scratch
           + 2 * batch_block * Hp * io_item)                 # c_n block
    vmem_limit = int(min(max(2 * est, 16 << 20), int(vmem_cap * 0.8)))

    def _weight_spec(shape):
        if single_buffer_w:
            try:      # constant index map needs no double buffer (v7x VMEM)
                return pl.BlockSpec(shape, lambda b, t: (0, 0),
                                    pipeline_mode=pl.Buffered(1))
            except Exception:
                pass
        return pl.BlockSpec(shape, lambda b, t: (0, 0))

    kernel = functools.partial(
        _lstm_fused_kernel, hidden_p=Hp, seq_len=seq, block_t=block_t,
        n_sub=n_sub, matmul_dtype=matmul_dtype, needs_mask=needs_mask)

    # TODO(synk): on v7x with num_bb > 1 a batch-major (bsz, seq, ...) layout
    # for x / y would make each block DMA fully contiguous.
    y, c_n = pl.pallas_call(
        kernel,
        out_shape=(
            jax.ShapeDtypeStruct((seq_p, bsz_p, Hp), x.dtype),
            jax.ShapeDtypeStruct((bsz_p, Hp), x.dtype),
        ),
        grid_spec=pltpu.PrefetchScalarGridSpec(
            num_scalar_prefetch=0,
            grid=(num_bb, num_tb),     # (parallel batch, sequential time LAST)
            in_specs=[
                pl.BlockSpec((block_t, batch_block, d_in),
                             lambda b, t: (t, b, 0)),
                _weight_spec((d_in, Gp)),          # resident W_ih
                _weight_spec((Hp, Gp)),            # resident W_hh
            ],
            out_specs=[
                pl.BlockSpec((block_t, batch_block, Hp),
                             lambda b, t: (t, b, 0)),
                pl.BlockSpec((batch_block, Hp), lambda b, t: (b, 0)),
            ],
            scratch_shapes=[
                pltpu.VMEM((block_t, batch_block, Gp), jnp.float32),  # gx
                pltpu.VMEM((batch_block, Hp), matmul_dtype),          # h state
                pltpu.VMEM((batch_block, Hp), jnp.float32),           # c state
            ],
        ),
        compiler_params=pltpu.CompilerParams(
            dimension_semantics=("parallel", "arbitrary"),
            vmem_limit_bytes=vmem_limit),
    )(x, wih_in, whh_in)

    y = y[:seq, :bsz, :H]
    h_n = y[seq - 1]                   # h_n equals the last timestep of y
    c_n = c_n[:bsz, :H]
    return y, h_n, c_n


def prepare_params(torch_layout_params):
    """One-time conversion from torch RNNCell layout (4H,d_in)/(4H,H) to the
    kernel's pre-transposed (d_in,4H)/(H,4H) layout (outside the hot path)."""
    return [(jnp.transpose(w_ih), jnp.transpose(w_hh))
            for (w_ih, w_hh) in torch_layout_params]


def stacked_rnn_forward(x, params_t, *, block_t=None, batch_block=None,
                        matmul_dtype=jnp.float32):
    """stackedRNN.forward(x, collectHidden=False, reverse=False), dropout=0.

    params_t: list of (wih_t (d_in,4H), whh_t (H,4H)) per layer.
    """
    # TODO(synk): dropout>0, reverse=True, reset_mask, collectHidden=True and
    # the output_size != hidden_size projection (w_ho) are not implemented.
    cur = x
    h_last, c_last = [], []
    for (wih_t, whh_t) in params_t:
        cur, h_n, c_n = lstm_layer_pallas(cur, wih_t, whh_t, block_t=block_t,
                                          batch_block=batch_block,
                                          matmul_dtype=matmul_dtype)
        h_last.append(h_n)
        c_last.append(c_n)
    output = cur                                   # (seq, bsz, H)
    hiddens = (jnp.stack(h_last, axis=0),          # h_n (num_layers, bsz, H)
               jnp.stack(c_last, axis=0))          # c_n (num_layers, bsz, H)
    return output, hiddens


# ---------------- pure-JAX reference (for correctness check) ----------------
def _lstm_layer_ref(x, wih_t, whh_t):
    seq, bsz, _ = x.shape
    H = whh_t.shape[0]

    def step(carry, x_t):
        h, c = carry
        gates = x_t @ wih_t + h @ whh_t
        i, f, g, o = jnp.split(gates, 4, axis=-1)
        c_new = jax.nn.sigmoid(f) * c + jax.nn.sigmoid(i) * jnp.tanh(g)
        h_new = jax.nn.sigmoid(o) * jnp.tanh(c_new)
        return (h_new, c_new), h_new

    h0 = jnp.zeros((bsz, H), jnp.float32)
    c0 = jnp.zeros((bsz, H), jnp.float32)
    (h_n, c_n), y = lax.scan(step, (h0, c0), x)
    return y, h_n, c_n


def stacked_rnn_ref(x, params_t):
    cur = x
    h_last, c_last = [], []
    for (wih_t, whh_t) in params_t:
        cur, h_n, c_n = _lstm_layer_ref(cur, wih_t, whh_t)
        h_last.append(h_n)
        c_last.append(c_n)
    return cur, (jnp.stack(h_last, 0), jnp.stack(c_last, 0))


if __name__ == "__main__":
    seq_len, bsz = 8, 2
    input_size, hidden_size = 16, 32
    num_layers = 2
    gate_multiplier = 4  # LSTM-like

    key = jax.random.PRNGKey(0)
    stdev = 1.0 / math.sqrt(hidden_size)

    # Build params in torch RNNCell layout, then pre-transpose ONCE.
    torch_params = []
    d_in = input_size
    for _ in range(num_layers):
        key, k1, k2 = jax.random.split(key, 3)
        w_ih = jax.random.uniform(
            k1, (gate_multiplier * hidden_size, d_in),
            minval=-stdev, maxval=stdev, dtype=jnp.float32)
        w_hh = jax.random.uniform(
            k2, (gate_multiplier * hidden_size, hidden_size),
            minval=-stdev, maxval=stdev, dtype=jnp.float32)
        torch_params.append((w_ih, w_hh))
        d_in = hidden_size

    params_t = prepare_params(torch_params)

    key, kx = jax.random.split(key)
    x = jax.random.normal(kx, (seq_len, bsz, input_size), dtype=jnp.float32)

    out_ref, (h_ref, c_ref) = stacked_rnn_ref(x, params_t)

    # ---- fp32 matmul path (exact-ish) ----
    fwd32 = jax.jit(functools.partial(stacked_rnn_forward,
                                      matmul_dtype=jnp.float32))
    output, (h_n, c_n) = fwd32(x, params_t)
    jax.block_until_ready((output, h_n, c_n))
    assert output.shape == (seq_len, bsz, hidden_size)
    assert h_n.shape == (num_layers, bsz, hidden_size)
    assert c_n.shape == (num_layers, bsz, hidden_size)
    assert jnp.allclose(output, out_ref, atol=1e-4, rtol=1e-4)
    assert jnp.allclose(h_n, h_ref, atol=1e-4, rtol=1e-4)
    assert jnp.allclose(c_n, c_ref, atol=1e-4, rtol=1e-4)

    # ---- bf16 matmul path (MXU-friendly), looser tolerance ----
    fwd16 = jax.jit(functools.partial(stacked_rnn_forward,
                                      matmul_dtype=jnp.bfloat16))
    out16, (h16, c16) = fwd16(x, params_t)
    jax.block_until_ready((out16, h16, c16))
    assert jnp.allclose(out16, out_ref, atol=5e-2, rtol=5e-2)
    assert jnp.allclose(h16, h_ref, atol=5e-2, rtol=5e-2)
    assert jnp.allclose(c16, c_ref, atol=5e-2, rtol=5e-2)

    # ---- exercise the padded/masked time path and the sub-tiled batch path ----
    bsz2 = 16
    key, kx2 = jax.random.split(key)
    x2 = jax.random.normal(kx2, (seq_len, bsz2, input_size), dtype=jnp.float32)
    out2_ref, (h2_ref, c2_ref) = stacked_rnn_ref(x2, params_t)
    fwd_mask = jax.jit(functools.partial(stacked_rnn_forward,
                                         matmul_dtype=jnp.float32, block_t=3))
    out2, (h2, c2) = fwd_mask(x2, params_t)
    jax.block_until_ready((out2, h2, c2))
    assert jnp.allclose(out2, out2_ref, atol=1e-4, rtol=1e-4)
    assert jnp.allclose(h2, h2_ref, atol=1e-4, rtol=1e-4)
    assert jnp.allclose(c2, c2_ref, atol=1e-4, rtol=1e-4)

    print("KERNEL_OK")
</pallas_src>

<mosaic_0001>
module attributes {stable_mosaic.version = 11 : i64} {
  func.func @_lstm_fused_kernel(%arg0: i32, %arg1: i32, %arg2: memref<8x8x16xf32, #tpu.memory_space<vmem>>, %arg3: memref<16x512xf32, #tpu.memory_space<vmem>>, %arg4: memref<128x512xf32, #tpu.memory_space<vmem>>, %arg5: memref<8x8x128xf32, #tpu.memory_space<vmem>>, %arg6: memref<8x128xf32, #tpu.memory_space<vmem>>, %arg7: memref<8x8x512xf32, #tpu.memory_space<vmem>>, %arg8: memref<8x128xf32, #tpu.memory_space<vmem>>, %arg9: memref<8x128xf32, #tpu.memory_space<vmem>>) attributes {dimension_semantics = [#tpu.dimension_semantics<parallel>, #tpu.dimension_semantics<arbitrary>], iteration_bounds = array<i64: 1, 1>, scalar_prefetch = 0 : i64, scratch_operands = 3 : i64, tpu.core_type = #tpu.core_type<tc>, window_params = [{transform_indices = @transform_0, window_bounds = array<i64: 8, 8, 16>}, {pipeline_mode = #tpu.pipeline_mode<synchronous>, transform_indices = @transform_1, window_bounds = array<i64: 16, 512>}, {pipeline_mode = #tpu.pipeline_mode<synchronous>, transform_indices = @transform_2, window_bounds = array<i64: 128, 512>}, {transform_indices = @transform_3, window_bounds = array<i64: 8, 8, 128>}, {transform_indices = @transform_4, window_bounds = array<i64: 8, 128>}]} {
    %c0_i32 = arith.constant 0 : i32
    %0 = arith.cmpi eq, %arg1, %c0_i32 : i32
    %1 = arith.extui %0 : i1 to i32
    %c0_i32_0 = arith.constant 0 : i32
    %2 = arith.cmpi ne, %1, %c0_i32_0 : i32
    scf.if %2 {
      %cst_127 = arith.constant 0.000000e+00 : f32
      %348 = vector.broadcast %cst_127 : f32 to vector<8x128xf32>
      %c0_128 = arith.constant 0 : index
      %c0_129 = arith.constant 0 : index
      %349 = vector.load %arg8[%c0_128, %c0_129] : memref<8x128xf32, #tpu.memory_space<vmem>>, vector<8x128xf32>
      tpu.vector_store %arg8[%c0_128, %c0_129], %348 {strides = array<i32>} : memref<8x128xf32, #tpu.memory_space<vmem>>, vector<8x128xf32>,
      %cst_130 = arith.constant 0.000000e+00 : f32
      %350 = vector.broadcast %cst_130 : f32 to vector<8x128xf32>
      %c0_131 = arith.constant 0 : index
      %c0_132 = arith.constant 0 : index
      %351 = vector.load %arg9[%c0_131, %c0_132] : memref<8x128xf32, #tpu.memory_space<vmem>>, vector<8x128xf32>
      tpu.vector_store %arg9[%c0_131, %c0_132], %350 {strides = array<i32>} : memref<8x128xf32, #tpu.memory_space<vmem>>, vector<8x128xf32>,
    } else {
    }
    %c0 = arith.constant 0 : index
    %c0_1 = arith.constant 0 : index
    %3 = vector.load %arg3[%c0, %c0_1] : memref<16x512xf32, #tpu.memory_space<vmem>>, vector<16x512xf32>
    %c0_2 = arith.constant 0 : index
    %c0_3 = arith.constant 0 : index
    %4 = vector.load %arg4[%c0_2, %c0_3] : memref<128x512xf32, #tpu.memory_space<vmem>>, vector<128x512xf32>
    %c0_i32_4 = arith.constant 0 : i32
    %5 = arith.index_cast %c0_i32_4 : i32 to index
    %c0_5 = arith.constant 0 : index
    %c0_6 = arith.constant 0 : index
    %6 = vector.load %arg2[%5, %c0_5, %c0_6] : memref<8x8x16xf32, #tpu.memory_space<vmem>>, vector<1x8x16xf32>
    %7 = vector.shape_cast %6 : vector<1x8x16xf32> to vector<8x16xf32>
    %cst = arith.constant dense<0.000000e+00> : vector<8x512xf32>
    %8 = tpu.matmul %7, %3, %cst {dimension_numbers = #tpu.dot_dimension_numbers<[1], [0], [0], [1], [0, 0, 1, 1], [], []>} : vector<8x16xf32>, vector<16x512xf32>, vector<8x512xf32> -> vector<8x512xf32>
    %9 = arith.index_cast %c0_i32_4 : i32 to index
    %c0_7 = arith.constant 0 : index
    %c0_8 = arith.constant 0 : index
    %10 = vector.load %arg7[%9, %c0_7, %c0_8] : memref<8x8x512xf32, #tpu.memory_space<vmem>>, vector<1x8x512xf32>
    %11 = vector.shape_cast %10 : vector<1x8x512xf32> to vector<8x512xf32>
    %12 = vector.shape_cast %8 : vector<8x512xf32> to vector<1x8x512xf32>
    tpu.vector_store %arg7[%9, %c0_7, %c0_8], %12 {strides = array<i32>} : memref<8x8x512xf32, #tpu.memory_space<vmem>>, vector<1x8x512xf32>,
    %c1_i32 = arith.constant 1 : i32
    %13 = arith.index_cast %c1_i32 : i32 to index
    %c0_9 = arith.constant 0 : index
    %c0_10 = arith.constant 0 : index
    %14 = vector.load %arg2[%13, %c0_9, %c0_10] : memref<8x8x16xf32, #tpu.memory_space<vmem>>, vector<1x8x16xf32>
    %15 = vector.shape_cast %14 : vector<1x8x16xf32> to vector<8x16xf32>
    %cst_11 = arith.constant dense<0.000000e+00> : vector<8x512xf32>
    %16 = tpu.matmul %15, %3, %cst_11 {dimension_numbers = #tpu.dot_dimension_numbers<[1], [0], [0], [1], [0, 0, 1, 1], [], []>} : vector<8x16xf32>, vector<16x512xf32>, vector<8x512xf32> -> vector<8x512xf32>
    %17 = arith.index_cast %c1_i32 : i32 to index
    %c0_12 = arith.constant 0 : index
    %c0_13 = arith.constant 0 : index
    %18 = vector.load %arg7[%17, %c0_12, %c0_13] : memref<8x8x512xf32, #tpu.memory_space<vmem>>, vector<1x8x512xf32>
    %19 = vector.shape_cast %18 : vector<1x8x512xf32> to vector<8x512xf32>
    %20 = vector.shape_cast %16 : vector<8x512xf32> to vector<1x8x512xf32>
    tpu.vector_store %arg7[%17, %c0_12, %c0_13], %20 {strides = array<i32>} : memref<8x8x512xf32, #tpu.memory_space<vmem>>, vector<1x8x512xf32>,
    %c2_i32 = arith.constant 2 : i32
    %21 = arith.index_cast %c2_i32 : i32 to index
    %c0_14 = arith.constant 0 : index
    %c0_15 = arith.constant 0 : index
    %22 = vector.load %arg2[%21, %c0_14, %c0_15] : memref<8x8x16xf32, #tpu.memory_space<vmem>>, vector<1x8x16xf32>
    %23 = vector.shape_cast %22 : vector<1x8x16xf32> to vector<8x16xf32>
    %cst_16 = arith.constant dense<0.000000e+00> : vector<8x512xf32>
    %24 = tpu.matmul %23, %3, %cst_16 {dimension_numbers = #tpu.dot_dimension_numbers<[1], [0], [0], [1], [0, 0, 1, 1], [], []>} : vector<8x16xf32>, vector<16x512xf32>, vector<8x512xf32> -> vector<8x512xf32>
    %25 = arith.index_cast %c2_i32 : i32 to index
    %c0_17 = arith.constant 0 : index
    %c0_18 = arith.constant 0 : index
    %26 = vector.load %arg7[%25, %c0_17, %c0_18] : memref<8x8x512xf32, #tpu.memory_space<vmem>>, vector<1x8x512xf32>
    %27 = vector.shape_cast %26 : vector<1x8x512xf32> to vector<8x512xf32>
    %28 = vector.shape_cast %24 : vector<8x512xf32> to vector<1x8x512xf32>
    tpu.vector_store %arg7[%25, %c0_17, %c0_18], %28 {strides = array<i32>} : memref<8x8x512xf32, #tpu.memory_space<vmem>>, vector<1x8x512xf32>,
    %c3_i32 = arith.constant 3 : i32
    %29 = arith.index_cast %c3_i32 : i32 to index
    %c0_19 = arith.constant 0 : index
    %c0_20 = arith.constant 0 : index
    %30 = vector.load %arg2[%29, %c0_19, %c0_20] : memref<8x8x16xf32, #tpu.memory_space<vmem>>, vector<1x8x16xf32>
    %31 = vector.shape_cast %30 : vector<1x8x16xf32> to vector<8x16xf32>
    %cst_21 = arith.constant dense<0.000000e+00> : vector<8x512xf32>
    %32 = tpu.matmul %31, %3, %cst_21 {dimension_numbers = #tpu.dot_dimension_numbers<[1], [0], [0], [1], [0, 0, 1, 1], [], []>} : vector<8x16xf32>, vector<16x512xf32>, vector<8x512xf32> -> vector<8x512xf32>
    %33 = arith.index_cast %c3_i32 : i32 to index
    %c0_22 = arith.constant 0 : index
    %c0_23 = arith.constant 0 : index
    %34 = vector.load %arg7[%33, %c0_22, %c0_23] : memref<8x8x512xf32, #tpu.memory_space<vmem>>, vector<1x8x512xf32>
    %35 = vector.shape_cast %34 : vector<1x8x512xf32> to vector<8x512xf32>
    %36 = vector.shape_cast %32 : vector<8x512xf32> to vector<1x8x512xf32>
    tpu.vector_store %arg7[%33, %c0_22, %c0_23], %36 {strides = array<i32>} : memref<8x8x512xf32, #tpu.memory_space<vmem>>, vector<1x8x512xf32>,
    %c4_i32 = arith.constant 4 : i32
    %37 = arith.index_cast %c4_i32 : i32 to index
    %c0_24 = arith.constant 0 : index
    %c0_25 = arith.constant 0 : index
    %38 = vector.load %arg2[%37, %c0_24, %c0_25] : memref<8x8x16xf32, #tpu.memory_space<vmem>>, vector<1x8x16xf32>
    %39 = vector.shape_cast %38 : vector<1x8x16xf32> to vector<8x16xf32>
    %cst_26 = arith.constant dense<0.000000e+00> : vector<8x512xf32>
    %40 = tpu.matmul %39, %3, %cst_26 {dimension_numbers = #tpu.dot_dimension_numbers<[1], [0], [0], [1], [0, 0, 1, 1], [], []>} : vector<8x16xf32>, vector<16x512xf32>, vector<8x512xf32> -> vector<8x512xf32>
    %41 = arith.index_cast %c4_i32 : i32 to index
    %c0_27 = arith.constant 0 : index
    %c0_28 = arith.constant 0 : index
    %42 = vector.load %arg7[%41, %c0_27, %c0_28] : memref<8x8x512xf32, #tpu.memory_space<vmem>>, vector<1x8x512xf32>
    %43 = vector.shape_cast %42 : vector<1x8x512xf32> to vector<8x512xf32>
    %44 = vector.shape_cast %40 : vector<8x512xf32> to vector<1x8x512xf32>
    tpu.vector_store %arg7[%41, %c0_27, %c0_28], %44 {strides = array<i32>} : memref<8x8x512xf32, #tpu.memory_space<vmem>>, vector<1x8x512xf32>,
    %c5_i32 = arith.constant 5 : i32
    %45 = arith.index_cast %c5_i32 : i32 to index
    %c0_29 = arith.constant 0 : index
    %c0_30 = arith.constant 0 : index
    %46 = vector.load %arg2[%45, %c0_29, %c0_30] : memref<8x8x16xf32, #tpu.memory_space<vmem>>, vector<1x8x16xf32>
    %47 = vector.shape_cast %46 : vector<1x8x16xf32> to vector<8x16xf32>
    %cst_31 = arith.constant dense<0.000000e+00> : vector<8x512xf32>
    %48 = tpu.matmul %47, %3, %cst_31 {dimension_numbers = #tpu.dot_dimension_numbers<[1], [0], [0], [1], [0, 0, 1, 1], [], []>} : vector<8x16xf32>, vector<16x512xf32>, vector<8x512xf32> -> vector<8x512xf32>
    %49 = arith.index_cast %c5_i32 : i32 to index
    %c0_32 = arith.constant 0 : index
    %c0_33 = arith.constant 0 : index
    %50 = vector.load %arg7[%49, %c0_32, %c0_33] : memref<8x8x512xf32, #tpu.memory_space<vmem>>, vector<1x8x512xf32>
    %51 = vector.shape_cast %50 : vector<1x8x512xf32> to vector<8x512xf32>
    %52 = vector.shape_cast %48 : vector<8x512xf32> to vector<1x8x512xf32>
    tpu.vector_store %arg7[%49, %c0_32, %c0_33], %52 {strides = array<i32>} : memref<8x8x512xf32, #tpu.memory_space<vmem>>, vector<1x8x512xf32>,
    %c6_i32 = arith.constant 6 : i32
    %53 = arith.index_cast %c6_i32 : i32 to index
    %c0_34 = arith.constant 0 : index
    %c0_35 = arith.constant 0 : index
    %54 = vector.load %arg2[%53, %c0_34, %c0_35] : memref<8x8x16xf32, #tpu.memory_space<vmem>>, vector<1x8x16xf32>
    %55 = vector.shape_cast %54 : vector<1x8x16xf32> to vector<8x16xf32>
    %cst_36 = arith.constant dense<0.000000e+00> : vector<8x512xf32>
    %56 = tpu.matmul %55, %3, %cst_36 {dimension_numbers = #tpu.dot_dimension_numbers<[1], [0], [0], [1], [0, 0, 1, 1], [], []>} : vector<8x16xf32>, vector<16x512xf32>, vector<8x512xf32> -> vector<8x512xf32>
    %57 = arith.index_cast %c6_i32 : i32 to index
    %c0_37 = arith.constant 0 : index
    %c0_38 = arith.constant 0 : index
    %58 = vector.load %arg7[%57, %c0_37, %c0_38] : memref<8x8x512xf32, #tpu.memory_space<vmem>>, vector<1x8x512xf32>
    %59 = vector.shape_cast %58 : vector<1x8x512xf32> to vector<8x512xf32>
    %60 = vector.shape_cast %56 : vector<8x512xf32> to vector<1x8x512xf32>
    tpu.vector_store %arg7[%57, %c0_37, %c0_38], %60 {strides = array<i32>} : memref<8x8x512xf32, #tpu.memory_space<vmem>>, vector<1x8x512xf32>,
    %c7_i32 = arith.constant 7 : i32
    %61 = arith.index_cast %c7_i32 : i32 to index
    %c0_39 = arith.constant 0 : index
    %c0_40 = arith.constant 0 : index
    %62 = vector.load %arg2[%61, %c0_39, %c0_40] : memref<8x8x16xf32, #tpu.memory_space<vmem>>, vector<1x8x16xf32>
    %63 = vector.shape_cast %62 : vector<1x8x16xf32> to vector<8x16xf32>
    %cst_41 = arith.constant dense<0.000000e+00> : vector<8x512xf32>
    %64 = tpu.matmul %63, %3, %cst_41 {dimension_numbers = #tpu.dot_dimension_numbers<[1], [0], [0], [1], [0, 0, 1, 1], [], []>} : vector<8x16xf32>, vector<16x512xf32>, vector<8x512xf32> -> vector<8x512xf32>
    %65 = arith.index_cast %c7_i32 : i32 to index
    %c0_42 = arith.constant 0 : index
    %c0_43 = arith.constant 0 : index
    %66 = vector.load %arg7[%65, %c0_42, %c0_43] : memref<8x8x512xf32, #tpu.memory_space<vmem>>, vector<1x8x512xf32>
    %67 = vector.shape_cast %66 : vector<1x8x512xf32> to vector<8x512xf32>
    %68 = vector.shape_cast %64 : vector<8x512xf32> to vector<1x8x512xf32>
    tpu.vector_store %arg7[%65, %c0_42, %c0_43], %68 {strides = array<i32>} : memref<8x8x512xf32, #tpu.memory_space<vmem>>, vector<1x8x512xf32>,
    %c8_i32 = arith.constant 8 : i32
    %c0_44 = arith.constant 0 : index
    %c0_45 = arith.constant 0 : index
    %69 = vector.load %arg8[%c0_44, %c0_45] : memref<8x128xf32, #tpu.memory_space<vmem>>, vector<8x128xf32>
    %c0_46 = arith.constant 0 : index
    %c0_47 = arith.constant 0 : index
    %70 = vector.load %arg9[%c0_46, %c0_47] : memref<8x128xf32, #tpu.memory_space<vmem>>, vector<8x128xf32>
    %c0_i32_48 = arith.constant 0 : i32
    %71 = arith.index_cast %c0_i32_48 : i32 to index
    %c0_49 = arith.constant 0 : index
    %c0_50 = arith.constant 0 : index
    %72 = vector.load %arg7[%71, %c0_49, %c0_50] : memref<8x8x512xf32, #tpu.memory_space<vmem>>, vector<1x8x512xf32>
    %73 = vector.shape_cast %72 : vector<1x8x512xf32> to vector<8x512xf32>
    %cst_51 = arith.constant dense<0.000000e+00> : vector<8x512xf32>
    %74 = tpu.matmul %69, %4, %cst_51 {dimension_numbers = #tpu.dot_dimension_numbers<[1], [0], [0], [1], [0, 0, 1, 1], [], []>} : vector<8x128xf32>, vector<128x512xf32>, vector<8x512xf32> -> vector<8x512xf32>
    %75 = arith.addf %73, %74 : vector<8x512xf32>
    %76 = vector.extract_strided_slice %75 {offsets = [0, 0], sizes = [8, 128], strides = [1, 1]} : vector<8x512xf32> to vector<8x128xf32>
    %77 = arith.negf %76 : vector<8x128xf32>
    %78 = math.exp %77 : vector<8x128xf32>
    %cst_52 = arith.constant 1.000000e+00 : f32
    %79 = vector.broadcast %cst_52 : f32 to vector<8x128xf32>
    %80 = arith.addf %79, %78 : vector<8x128xf32>
    %81 = arith.divf %79, %80 : vector<8x128xf32>
    %82 = vector.extract_strided_slice %75 {offsets = [0, 128], sizes = [8, 128], strides = [1, 1]} : vector<8x512xf32> to vector<8x128xf32>
    %83 = arith.negf %82 : vector<8x128xf32>
    %84 = math.exp %83 : vector<8x128xf32>
    %cst_53 = arith.constant 1.000000e+00 : f32
    %85 = vector.broadcast %cst_53 : f32 to vector<8x128xf32>
    %86 = arith.addf %85, %84 : vector<8x128xf32>
    %87 = arith.divf %85, %86 : vector<8x128xf32>
    %88 = vector.extract_strided_slice %75 {offsets = [0, 256], sizes = [8, 128], strides = [1, 1]} : vector<8x512xf32> to vector<8x128xf32>
    %89 = math.tanh %88 : vector<8x128xf32>
    %90 = vector.extract_strided_slice %75 {offsets = [0, 384], sizes = [8, 128], strides = [1, 1]} : vector<8x512xf32> to vector<8x128xf32>
    %91 = arith.negf %90 : vector<8x128xf32>
    %92 = math.exp %91 : vector<8x128xf32>
    %cst_54 = arith.constant 1.000000e+00 : f32
    %93 = vector.broadcast %cst_54 : f32 to vector<8x128xf32>
    %94 = arith.addf %93, %92 : vector<8x128xf32>
    %95 = arith.divf %93, %94 : vector<8x128xf32>
    %96 = arith.mulf %87, %70 : vector<8x128xf32>
    %97 = arith.mulf %81, %89 : vector<8x128xf32>
    %98 = arith.addf %96, %97 : vector<8x128xf32>
    %99 = math.tanh %98 : vector<8x128xf32>
    %100 = arith.mulf %95, %99 : vector<8x128xf32>
    %101 = arith.index_cast %c0_i32_48 : i32 to index
    %c0_55 = arith.constant 0 : index
    %c0_56 = arith.constant 0 : index
    %102 = vector.load %arg5[%101, %c0_55, %c0_56] : memref<8x8x128xf32, #tpu.memory_space<vmem>>, vector<1x8x128xf32>
    %103 = vector.shape_cast %102 : vector<1x8x128xf32> to vector<8x128xf32>
    %104 = vector.shape_cast %100 : vector<8x128xf32> to vector<1x8x128xf32>
    tpu.vector_store %arg5[%101, %c0_55, %c0_56], %104 {strides = array<i32>} : memref<8x8x128xf32, #tpu.memory_space<vmem>>, vector<1x8x128xf32>,
    %c1_i32_57 = arith.constant 1 : i32
    %105 = arith.index_cast %c1_i32_57 : i32 to index
    %c0_58 = arith.constant 0 : index
    %c0_59 = arith.constant 0 : index
    %106 = vector.load %arg7[%105, %c0_58, %c0_59] : memref<8x8x512xf32, #tpu.memory_space<vmem>>, vector<1x8x512xf32>
    %107 = vector.shape_cast %106 : vector<1x8x512xf32> to vector<8x512xf32>
    %cst_60 = arith.constant dense<0.000000e+00> : vector<8x512xf32>
    %108 = tpu.matmul %100, %4, %cst_60 {dimension_numbers = #tpu.dot_dimension_numbers<[1], [0], [0], [1], [0, 0, 1, 1], [], []>} : vector<8x128xf32>, vector<128x512xf32>, vector<8x512xf32> -> vector<8x512xf32>
    %109 = arith.addf %107, %108 : vector<8x512xf32>
    %110 = vector.extract_strided_slice %109 {offsets = [0, 0], sizes = [8, 128], strides = [1, 1]} : vector<8x512xf32> to vector<8x128xf32>
    %111 = arith.negf %110 : vector<8x128xf32>
    %112 = math.exp %111 : vector<8x128xf32>
    %cst_61 = arith.constant 1.000000e+00 : f32
    %113 = vector.broadcast %cst_61 : f32 to vector<8x128xf32>
    %114 = arith.addf %113, %112 : vector<8x128xf32>
    %115 = arith.divf %113, %114 : vector<8x128xf32>
    %116 = vector.extract_strided_slice %109 {offsets = [0, 128], sizes = [8, 128], strides = [1, 1]} : vector<8x512xf32> to vector<8x128xf32>
    %117 = arith.negf %116 : vector<8x128xf32>
    %118 = math.exp %117 : vector<8x128xf32>
    %cst_62 = arith.constant 1.000000e+00 : f32
    %119 = vector.broadcast %cst_62 : f32 to vector<8x128xf32>
    %120 = arith.addf %119, %118 : vector<8x128xf32>
    %121 = arith.divf %119, %120 : vector<8x128xf32>
    %122 = vector.extract_strided_slice %109 {offsets = [0, 256], sizes = [8, 128], strides = [1, 1]} : vector<8x512xf32> to vector<8x128xf32>
    %123 = math.tanh %122 : vector<8x128xf32>
    %124 = vector.extract_strided_slice %109 {offsets = [0, 384], sizes = [8, 128], strides = [1, 1]} : vector<8x512xf32> to vector<8x128xf32>
    %125 = arith.negf %124 : vector<8x128xf32>
    %126 = math.exp %125 : vector<8x128xf32>
    %cst_63 = arith.constant 1.000000e+00 : f32
    %127 = vector.broadcast %cst_63 : f32 to vector<8x128xf32>
    %128 = arith.addf %127, %126 : vector<8x128xf32>
    %129 = arith.divf %127, %128 : vector<8x128xf32>
    %130 = arith.mulf %121, %98 : vector<8x128xf32>
    %131 = arith.mulf %115, %123 : vector<8x128xf32>
    %132 = arith.addf %130, %131 : vector<8x128xf32>
    %133 = math.tanh %132 : vector<8x128xf32>
    %134 = arith.mulf %129, %133 : vector<8x128xf32>
    %135 = arith.index_cast %c1_i32_57 : i32 to index
    %c0_64 = arith.constant 0 : index
    %c0_65 = arith.constant 0 : index
    %136 = vector.load %arg5[%135, %c0_64, %c0_65] : memref<8x8x128xf32, #tpu.memory_space<vmem>>, vector<1x8x128xf32>
    %137 = vector.shape_cast %136 : vector<1x8x128xf32> to vector<8x128xf32>
    %138 = vector.shape_cast %134 : vector<8x128xf32> to vector<1x8x128xf32>
    tpu.vector_store %arg5[%135, %c0_64, %c0_65], %138 {strides = array<i32>} : memref<8x8x128xf32, #tpu.memory_space<vmem>>, vector<1x8x128xf32>,
    %c2_i32_66 = arith.constant 2 : i32
    %139 = arith.index_cast %c2_i32_66 : i32 to index
    %c0_67 = arith.constant 0 : index
    %c0_68 = arith.constant 0 : index
    %140 = vector.load %arg7[%139, %c0_67, %c0_68] : memref<8x8x512xf32, #tpu.memory_space<vmem>>, vector<1x8x512xf32>
    %141 = vector.shape_cast %140 : vector<1x8x512xf32> to vector<8x512xf32>
    %cst_69 = arith.constant dense<0.000000e+00> : vector<8x512xf32>
    %142 = tpu.matmul %134, %4, %cst_69 {dimension_numbers = #tpu.dot_dimension_numbers<[1], [0], [0], [1], [0, 0, 1, 1], [], []>} : vector<8x128xf32>, vector<128x512xf32>, vector<8x512xf32> -> vector<8x512xf32>
    %143 = arith.addf %141, %142 : vector<8x512xf32>
    %144 = vector.extract_strided_slice %143 {offsets = [0, 0], sizes = [8, 128], strides = [1, 1]} : vector<8x512xf32> to vector<8x128xf32>
    %145 = arith.negf %144 : vector<8x128xf32>
    %146 = math.exp %145 : vector<8x128xf32>
    %cst_70 = arith.constant 1.000000e+00 : f32
    %147 = vector.broadcast %cst_70 : f32 to vector<8x128xf32>
    %148 = arith.addf %147, %146 : vector<8x128xf32>
    %149 = arith.divf %147, %148 : vector<8x128xf32>
    %150 = vector.extract_strided_slice %143 {offsets = [0, 128], sizes = [8, 128], strides = [1, 1]} : vector<8x512xf32> to vector<8x128xf32>
    %151 = arith.negf %150 : vector<8x128xf32>
    %152 = math.exp %151 : vector<8x128xf32>
    %cst_71 = arith.constant 1.000000e+00 : f32
    %153 = vector.broadcast %cst_71 : f32 to vector<8x128xf32>
    %154 = arith.addf %153, %152 : vector<8x128xf32>
    %155 = arith.divf %153, %154 : vector<8x128xf32>
    %156 = vector.extract_strided_slice %143 {offsets = [0, 256], sizes = [8, 128], strides = [1, 1]} : vector<8x512xf32> to vector<8x128xf32>
    %157 = math.tanh %156 : vector<8x128xf32>
    %158 = vector.extract_strided_slice %143 {offsets = [0, 384], sizes = [8, 128], strides = [1, 1]} : vector<8x512xf32> to vector<8x128xf32>
    %159 = arith.negf %158 : vector<8x128xf32>
    %160 = math.exp %159 : vector<8x128xf32>
    %cst_72 = arith.constant 1.000000e+00 : f32
    %161 = vector.broadcast %cst_72 : f32 to vector<8x128xf32>
    %162 = arith.addf %161, %160 : vector<8x128xf32>
    %163 = arith.divf %161, %162 : vector<8x128xf32>
    %164 = arith.mulf %155, %132 : vector<8x128xf32>
    %165 = arith.mulf %149, %157 : vector<8x128xf32>
    %166 = arith.addf %164, %165 : vector<8x128xf32>
    %167 = math.tanh %166 : vector<8x128xf32>
    %168 = arith.mulf %163, %167 : vector<8x128xf32>
    %169 = arith.index_cast %c2_i32_66 : i32 to index
    %c0_73 = arith.constant 0 : index
    %c0_74 = arith.constant 0 : index
    %170 = vector.load %arg5[%169, %c0_73, %c0_74] : memref<8x8x128xf32, #tpu.memory_space<vmem>>, vector<1x8x128xf32>
    %171 = vector.shape_cast %170 : vector<1x8x128xf32> to vector<8x128xf32>
    %172 = vector.shape_cast %168 : vector<8x128xf32> to vector<1x8x128xf32>
    tpu.vector_store %arg5[%169, %c0_73, %c0_74], %172 {strides = array<i32>} : memref<8x8x128xf32, #tpu.memory_space<vmem>>, vector<1x8x128xf32>,
    %c3_i32_75 = arith.constant 3 : i32
    %173 = arith.index_cast %c3_i32_75 : i32 to index
    %c0_76 = arith.constant 0 : index
    %c0_77 = arith.constant 0 : index
    %174 = vector.load %arg7[%173, %c0_76, %c0_77] : memref<8x8x512xf32, #tpu.memory_space<vmem>>, vector<1x8x512xf32>
    %175 = vector.shape_cast %174 : vector<1x8x512xf32> to vector<8x512xf32>
    %cst_78 = arith.constant dense<0.000000e+00> : vector<8x512xf32>
    %176 = tpu.matmul %168, %4, %cst_78 {dimension_numbers = #tpu.dot_dimension_numbers<[1], [0], [0], [1], [0, 0, 1, 1], [], []>} : vector<8x128xf32>, vector<128x512xf32>, vector<8x512xf32> -> vector<8x512xf32>
    %177 = arith.addf %175, %176 : vector<8x512xf32>
    %178 = vector.extract_strided_slice %177 {offsets = [0, 0], sizes = [8, 128], strides = [1, 1]} : vector<8x512xf32> to vector<8x128xf32>
    %179 = arith.negf %178 : vector<8x128xf32>
    %180 = math.exp %179 : vector<8x128xf32>
    %cst_79 = arith.constant 1.000000e+00 : f32
    %181 = vector.broadcast %cst_79 : f32 to vector<8x128xf32>
    %182 = arith.addf %181, %180 : vector<8x128xf32>
    %183 = arith.divf %181, %182 : vector<8x128xf32>
    %184 = vector.extract_strided_slice %177 {offsets = [0, 128], sizes = [8, 128], strides = [1, 1]} : vector<8x512xf32> to vector<8x128xf32>
    %185 = arith.negf %184 : vector<8x128xf32>
    %186 = math.exp %185 : vector<8x128xf32>
    %cst_80 = arith.constant 1.000000e+00 : f32
    %187 = vector.broadcast %cst_80 : f32 to vector<8x128xf32>
    %188 = arith.addf %187, %186 : vector<8x128xf32>
    %189 = arith.divf %187, %188 : vector<8x128xf32>
    %190 = vector.extract_strided_slice %177 {offsets = [0, 256], sizes = [8, 128], strides = [1, 1]} : vector<8x512xf32> to vector<8x128xf32>
    %191 = math.tanh %190 : vector<8x128xf32>
    %192 = vector.extract_strided_slice %177 {offsets = [0, 384], sizes = [8, 128], strides = [1, 1]} : vector<8x512xf32> to vector<8x128xf32>
    %193 = arith.negf %192 : vector<8x128xf32>
    %194 = math.exp %193 : vector<8x128xf32>
    %cst_81 = arith.constant 1.000000e+00 : f32
    %195 = vector.broadcast %cst_81 : f32 to vector<8x128xf32>
    %196 = arith.addf %195, %194 : vector<8x128xf32>
    %197 = arith.divf %195, %196 : vector<8x128xf32>
    %198 = arith.mulf %189, %166 : vector<8x128xf32>
    %199 = arith.mulf %183, %191 : vector<8x128xf32>
    %200 = arith.addf %198, %199 : vector<8x128xf32>
    %201 = math.tanh %200 : vector<8x128xf32>
    %202 = arith.mulf %197, %201 : vector<8x128xf32>
    %203 = arith.index_cast %c3_i32_75 : i32 to index
    %c0_82 = arith.constant 0 : index
    %c0_83 = arith.constant 0 : index
    %204 = vector.load %arg5[%203, %c0_82, %c0_83] : memref<8x8x128xf32, #tpu.memory_space<vmem>>, vector<1x8x128xf32>
    %205 = vector.shape_cast %204 : vector<1x8x128xf32> to vector<8x128xf32>
    %206 = vector.shape_cast %202 : vector<8x128xf32> to vector<1x8x128xf32>
    tpu.vector_store %arg5[%203, %c0_82, %c0_83], %206 {strides = array<i32>} : memref<8x8x128xf32, #tpu.memory_space<vmem>>, vector<1x8x128xf32>,
    %c4_i32_84 = arith.constant 4 : i32
    %207 = arith.index_cast %c4_i32_84 : i32 to index
    %c0_85 = arith.constant 0 : index
    %c0_86 = arith.constant 0 : index
    %208 = vector.load %arg7[%207, %c0_85, %c0_86] : memref<8x8x512xf32, #tpu.memory_space<vmem>>, vector<1x8x512xf32>
    %209 = vector.shape_cast %208 : vector<1x8x512xf32> to vector<8x512xf32>
    %cst_87 = arith.constant dense<0.000000e+00> : vector<8x512xf32>
    %210 = tpu.matmul %202, %4, %cst_87 {dimension_numbers = #tpu.dot_dimension_numbers<[1], [0], [0], [1], [0, 0, 1, 1], [], []>} : vector<8x128xf32>, vector<128x512xf32>, vector<8x512xf32> -> vector<8x512xf32>
    %211 = arith.addf %209, %210 : vector<8x512xf32>
    %212 = vector.extract_strided_slice %211 {offsets = [0, 0], sizes = [8, 128], strides = [1, 1]} : vector<8x512xf32> to vector<8x128xf32>
    %213 = arith.negf %212 : vector<8x128xf32>
    %214 = math.exp %213 : vector<8x128xf32>
    %cst_88 = arith.constant 1.000000e+00 : f32
    %215 = vector.broadcast %cst_88 : f32 to vector<8x128xf32>
    %216 = arith.addf %215, %214 : vector<8x128xf32>
    %217 = arith.divf %215, %216 : vector<8x128xf32>
    %218 = vector.extract_strided_slice %211 {offsets = [0, 128], sizes = [8, 128], strides = [1, 1]} : vector<8x512xf32> to vector<8x128xf32>
    %219 = arith.negf %218 : vector<8x128xf32>
    %220 = math.exp %219 : vector<8x128xf32>
    %cst_89 = arith.constant 1.000000e+00 : f32
    %221 = vector.broadcast %cst_89 : f32 to vector<8x128xf32>
    %222 = arith.addf %221, %220 : vector<8x128xf32>
    %223 = arith.divf %221, %222 : vector<8x128xf32>
    %224 = vector.extract_strided_slice %211 {offsets = [0, 256], sizes = [8, 128], strides = [1, 1]} : vector<8x512xf32> to vector<8x128xf32>
    %225 = math.tanh %224 : vector<8x128xf32>
    %226 = vector.extract_strided_slice %211 {offsets = [0, 384], sizes = [8, 128], strides = [1, 1]} : vector<8x512xf32> to vector<8x128xf32>
    %227 = arith.negf %226 : vector<8x128xf32>
    %228 = math.exp %227 : vector<8x128xf32>
    %cst_90 = arith.constant 1.000000e+00 : f32
    %229 = vector.broadcast %cst_90 : f32 to vector<8x128xf32>
    %230 = arith.addf %229, %228 : vector<8x128xf32>
    %231 = arith.divf %229, %230 : vector<8x128xf32>
    %232 = arith.mulf %223, %200 : vector<8x128xf32>
    %233 = arith.mulf %217, %225 : vector<8x128xf32>
    %234 = arith.addf %232, %233 : vector<8x128xf32>
    %235 = math.tanh %234 : vector<8x128xf32>
    %236 = arith.mulf %231, %235 : vector<8x128xf32>
    %237 = arith.index_cast %c4_i32_84 : i32 to index
    %c0_91 = arith.constant 0 : index
    %c0_92 = arith.constant 0 : index
    %238 = vector.load %arg5[%237, %c0_91, %c0_92] : memref<8x8x128xf32, #tpu.memory_space<vmem>>, vector<1x8x128xf32>
    %239 = vector.shape_cast %238 : vector<1x8x128xf32> to vector<8x128xf32>
    %240 = vector.shape_cast %236 : vector<8x128xf32> to vector<1x8x128xf32>
    tpu.vector_store %arg5[%237, %c0_91, %c0_92], %240 {strides = array<i32>} : memref<8x8x128xf32, #tpu.memory_space<vmem>>, vector<1x8x128xf32>,
    %c5_i32_93 = arith.constant 5 : i32
    %241 = arith.index_cast %c5_i32_93 : i32 to index
    %c0_94 = arith.constant 0 : index
    %c0_95 = arith.constant 0 : index
    %242 = vector.load %arg7[%241, %c0_94, %c0_95] : memref<8x8x512xf32, #tpu.memory_space<vmem>>, vector<1x8x512xf32>
    %243 = vector.shape_cast %242 : vector<1x8x512xf32> to vector<8x512xf32>
    %cst_96 = arith.constant dense<0.000000e+00> : vector<8x512xf32>
    %244 = tpu.matmul %236, %4, %cst_96 {dimension_numbers = #tpu.dot_dimension_numbers<[1], [0], [0], [1], [0, 0, 1, 1], [], []>} : vector<8x128xf32>, vector<128x512xf32>, vector<8x512xf32> -> vector<8x512xf32>
    %245 = arith.addf %243, %244 : vector<8x512xf32>
    %246 = vector.extract_strided_slice %245 {offsets = [0, 0], sizes = [8, 128], strides = [1, 1]} : vector<8x512xf32> to vector<8x128xf32>
    %247 = arith.negf %246 : vector<8x128xf32>
    %248 = math.exp %247 : vector<8x128xf32>
    %cst_97 = arith.constant 1.000000e+00 : f32
    %249 = vector.broadcast %cst_97 : f32 to vector<8x128xf32>
    %250 = arith.addf %249, %248 : vector<8x128xf32>
    %251 = arith.divf %249, %250 : vector<8x128xf32>
    %252 = vector.extract_strided_slice %245 {offsets = [0, 128], sizes = [8, 128], strides = [1, 1]} : vector<8x512xf32> to vector<8x128xf32>
    %253 = arith.negf %252 : vector<8x128xf32>
    %254 = math.exp %253 : vector<8x128xf32>
    %cst_98 = arith.constant 1.000000e+00 : f32
    %255 = vector.broadcast %cst_98 : f32 to vector<8x128xf32>
    %256 = arith.addf %255, %254 : vector<8x128xf32>
    %257 = arith.divf %255, %256 : vector<8x128xf32>
    %258 = vector.extract_strided_slice %245 {offsets = [0, 256], sizes = [8, 128], strides = [1, 1]} : vector<8x512xf32> to vector<8x128xf32>
    %259 = math.tanh %258 : vector<8x128xf32>
    %260 = vector.extract_strided_slice %245 {offsets = [0, 384], sizes = [8, 128], strides = [1, 1]} : vector<8x512xf32> to vector<8x128xf32>
    %261 = arith.negf %260 : vector<8x128xf32>
    %262 = math.exp %261 : vector<8x128xf32>
    %cst_99 = arith.constant 1.000000e+00 : f32
    %263 = vector.broadcast %cst_99 : f32 to vector<8x128xf32>
    %264 = arith.addf %263, %262 : vector<8x128xf32>
    %265 = arith.divf %263, %264 : vector<8x128xf32>
    %266 = arith.mulf %257, %234 : vector<8x128xf32>
    %267 = arith.mulf %251, %259 : vector<8x128xf32>
    %268 = arith.addf %266, %267 : vector<8x128xf32>
    %269 = math.tanh %268 : vector<8x128xf32>
    %270 = arith.mulf %265, %269 : vector<8x128xf32>
    %271 = arith.index_cast %c5_i32_93 : i32 to index
    %c0_100 = arith.constant 0 : index
    %c0_101 = arith.constant 0 : index
    %272 = vector.load %arg5[%271, %c0_100, %c0_101] : memref<8x8x128xf32, #tpu.memory_space<vmem>>, vector<1x8x128xf32>
    %273 = vector.shape_cast %272 : vector<1x8x128xf32> to vector<8x128xf32>
    %274 = vector.shape_cast %270 : vector<8x128xf32> to vector<1x8x128xf32>
    tpu.vector_store %arg5[%271, %c0_100, %c0_101], %274 {strides = array<i32>} : memref<8x8x128xf32, #tpu.memory_space<vmem>>, vector<1x8x128xf32>,
    %c6_i32_102 = arith.constant 6 : i32
    %275 = arith.index_cast %c6_i32_102 : i32 to index
    %c0_103 = arith.constant 0 : index
    %c0_104 = arith.constant 0 : index
    %276 = vector.load %arg7[%275, %c0_103, %c0_104] : memref<8x8x512xf32, #tpu.memory_space<vmem>>, vector<1x8x512xf32>
    %277 = vector.shape_cast %276 : vector<1x8x512xf32> to vector<8x512xf32>
    %cst_105 = arith.constant dense<0.000000e+00> : vector<8x512xf32>
    %278 = tpu.matmul %270, %4, %cst_105 {dimension_numbers = #tpu.dot_dimension_numbers<[1], [0], [0], [1], [0, 0, 1, 1], [], []>} : vector<8x128xf32>, vector<128x512xf32>, vector<8x512xf32> -> vector<8x512xf32>
    %279 = arith.addf %277, %278 : vector<8x512xf32>
    %280 = vector.extract_strided_slice %279 {offsets = [0, 0], sizes = [8, 128], strides = [1, 1]} : vector<8x512xf32> to vector<8x128xf32>
    %281 = arith.negf %280 : vector<8x128xf32>
    %282 = math.exp %281 : vector<8x128xf32>
    %cst_106 = arith.constant 1.000000e+00 : f32
    %283 = vector.broadcast %cst_106 : f32 to vector<8x128xf32>
    %284 = arith.addf %283, %282 : vector<8x128xf32>
    %285 = arith.divf %283, %284 : vector<8x128xf32>
    %286 = vector.extract_strided_slice %279 {offsets = [0, 128], sizes = [8, 128], strides = [1, 1]} : vector<8x512xf32> to vector<8x128xf32>
    %287 = arith.negf %286 : vector<8x128xf32>
    %288 = math.exp %287 : vector<8x128xf32>
    %cst_107 = arith.constant 1.000000e+00 : f32
    %289 = vector.broadcast %cst_107 : f32 to vector<8x128xf32>
    %290 = arith.addf %289, %288 : vector<8x128xf32>
    %291 = arith.divf %289, %290 : vector<8x128xf32>
    %292 = vector.extract_strided_slice %279 {offsets = [0, 256], sizes = [8, 128], strides = [1, 1]} : vector<8x512xf32> to vector<8x128xf32>
    %293 = math.tanh %292 : vector<8x128xf32>
    %294 = vector.extract_strided_slice %279 {offsets = [0, 384], sizes = [8, 128], strides = [1, 1]} : vector<8x512xf32> to vector<8x128xf32>
    %295 = arith.negf %294 : vector<8x128xf32>
    %296 = math.exp %295 : vector<8x128xf32>
    %cst_108 = arith.constant 1.000000e+00 : f32
    %297 = vector.broadcast %cst_108 : f32 to vector<8x128xf32>
    %298 = arith.addf %297, %296 : vector<8x128xf32>
    %299 = arith.divf %297, %298 : vector<8x128xf32>
    %300 = arith.mulf %291, %268 : vector<8x128xf32>
    %301 = arith.mulf %285, %293 : vector<8x128xf32>
    %302 = arith.addf %300, %301 : vector<8x128xf32>
    %303 = math.tanh %302 : vector<8x128xf32>
    %304 = arith.mulf %299, %303 : vector<8x128xf32>
    %305 = arith.index_cast %c6_i32_102 : i32 to index
    %c0_109 = arith.constant 0 : index
    %c0_110 = arith.constant 0 : index
    %306 = vector.load %arg5[%305, %c0_109, %c0_110] : memref<8x8x128xf32, #tpu.memory_space<vmem>>, vector<1x8x128xf32>
    %307 = vector.shape_cast %306 : vector<1x8x128xf32> to vector<8x128xf32>
    %308 = vector.shape_cast %304 : vector<8x128xf32> to vector<1x8x128xf32>
    tpu.vector_store %arg5[%305, %c0_109, %c0_110], %308 {strides = array<i32>} : memref<8x8x128xf32, #tpu.memory_space<vmem>>, vector<1x8x128xf32>,
    %c7_i32_111 = arith.constant 7 : i32
    %309 = arith.index_cast %c7_i32_111 : i32 to index
    %c0_112 = arith.constant 0 : index
    %c0_113 = arith.constant 0 : index
    %310 = vector.load %arg7[%309, %c0_112, %c0_113] : memref<8x8x512xf32, #tpu.memory_space<vmem>>, vector<1x8x512xf32>
    %311 = vector.shape_cast %310 : vector<1x8x512xf32> to vector<8x512xf32>
    %cst_114 = arith.constant dense<0.000000e+00> : vector<8x512xf32>
    %312 = tpu.matmul %304, %4, %cst_114 {dimension_numbers = #tpu.dot_dimension_numbers<[1], [0], [0], [1], [0, 0, 1, 1], [], []>} : vector<8x128xf32>, vector<128x512xf32>, vector<8x512xf32> -> vector<8x512xf32>
    %313 = arith.addf %311, %312 : vector<8x512xf32>
    %314 = vector.extract_strided_slice %313 {offsets = [0, 0], sizes = [8, 128], strides = [1, 1]} : vector<8x512xf32> to vector<8x128xf32>
    %315 = arith.negf %314 : vector<8x128xf32>
    %316 = math.exp %315 : vector<8x128xf32>
    %cst_115 = arith.constant 1.000000e+00 : f32
    %317 = vector.broadcast %cst_115 : f32 to vector<8x128xf32>
    %318 = arith.addf %317, %316 : vector<8x128xf32>
    %319 = arith.divf %317, %318 : vector<8x128xf32>
    %320 = vector.extract_strided_slice %313 {offsets = [0, 128], sizes = [8, 128], strides = [1, 1]} : vector<8x512xf32> to vector<8x128xf32>
    %321 = arith.negf %320 : vector<8x128xf32>
    %322 = math.exp %321 : vector<8x128xf32>
    %cst_116 = arith.constant 1.000000e+00 : f32
    %323 = vector.broadcast %cst_116 : f32 to vector<8x128xf32>
    %324 = arith.addf %323, %322 : vector<8x128xf32>
    %325 = arith.divf %323, %324 : vector<8x128xf32>
    %326 = vector.extract_strided_slice %313 {offsets = [0, 256], sizes = [8, 128], strides = [1, 1]} : vector<8x512xf32> to vector<8x128xf32>
    %327 = math.tanh %326 : vector<8x128xf32>
    %328 = vector.extract_strided_slice %313 {offsets = [0, 384], sizes = [8, 128], strides = [1, 1]} : vector<8x512xf32> to vector<8x128xf32>
    %329 = arith.negf %328 : vector<8x128xf32>
    %330 = math.exp %329 : vector<8x128xf32>
    %cst_117 = arith.constant 1.000000e+00 : f32
    %331 = vector.broadcast %cst_117 : f32 to vector<8x128xf32>
    %332 = arith.addf %331, %330 : vector<8x128xf32>
    %333 = arith.divf %331, %332 : vector<8x128xf32>
    %334 = arith.mulf %325, %302 : vector<8x128xf32>
    %335 = arith.mulf %319, %327 : vector<8x128xf32>
    %336 = arith.addf %334, %335 : vector<8x128xf32>
    %337 = math.tanh %336 : vector<8x128xf32>
    %338 = arith.mulf %333, %337 : vector<8x128xf32>
    %339 = arith.index_cast %c7_i32_111 : i32 to index
    %c0_118 = arith.constant 0 : index
    %c0_119 = arith.constant 0 : index
    %340 = vector.load %arg5[%339, %c0_118, %c0_119] : memref<8x8x128xf32, #tpu.memory_space<vmem>>, vector<1x8x128xf32>
    %341 = vector.shape_cast %340 : vector<1x8x128xf32> to vector<8x128xf32>
    %342 = vector.shape_cast %338 : vector<8x128xf32> to vector<1x8x128xf32>
    tpu.vector_store %arg5[%339, %c0_118, %c0_119], %342 {strides = array<i32>} : memref<8x8x128xf32, #tpu.memory_space<vmem>>, vector<1x8x128xf32>,
    %c8_i32_120 = arith.constant 8 : i32
    %c0_121 = arith.constant 0 : index
    %c0_122 = arith.constant 0 : index
    %343 = vector.load %arg8[%c0_121, %c0_122] : memref<8x128xf32, #tpu.memory_space<vmem>>, vector<8x128xf32>
    tpu.vector_store %arg8[%c0_121, %c0_122], %338 {strides = array<i32>} : memref<8x128xf32, #tpu.memory_space<vmem>>, vector<8x128xf32>,
    %c0_123 = arith.constant 0 : index
    %c0_124 = arith.constant 0 : index
    %344 = vector.load %arg9[%c0_123, %c0_124] : memref<8x128xf32, #tpu.memory_space<vmem>>, vector<8x128xf32>
    tpu.vector_store %arg9[%c0_123, %c0_124], %336 {strides = array<i32>} : memref<8x128xf32, #tpu.memory_space<vmem>>, vector<8x128xf32>,
    %c0_i32_125 = arith.constant 0 : i32
    %345 = arith.cmpi eq, %arg1, %c0_i32_125 : i32
    %346 = arith.extui %345 : i1 to i32
    %c0_i32_126 = arith.constant 0 : i32
    %347 = arith.cmpi ne, %346, %c0_i32_126 : i32
    scf.if %347 {
      %c0_127 = arith.constant 0 : index
      %c0_128 = arith.constant 0 : index
      %348 = vector.load %arg9[%c0_127, %c0_128] : memref<8x128xf32, #tpu.memory_space<vmem>>, vector<8x128xf32>
      %c0_129 = arith.constant 0 : index
      %c0_130 = arith.constant 0 : index
      %349 = vector.load %arg6[%c0_129, %c0_130] : memref<8x128xf32, #tpu.memory_space<vmem>>, vector<8x128xf32>
      tpu.vector_store %arg6[%c0_129, %c0_130], %348 {strides = array<i32>} : memref<8x128xf32, #tpu.memory_space<vmem>>, vector<8x128xf32>,
    } else {
    }
    return
  }
  func.func @transform_0(%arg0: i32, %arg1: i32) -> (i32, i32, i32) {
    %c0_i32 = arith.constant 0 : i32
    %c0_i32_0 = arith.constant 0 : i32
    return %arg1, %arg0, %c0_i32 : i32, i32, i32
  }
  func.func @transform_1(%arg0: i32, %arg1: i32) -> (i32, i32) {
    %c0_i32 = arith.constant 0 : i32
    %c0_i32_0 = arith.constant 0 : i32
    %c0_i32_1 = arith.constant 0 : i32
    return %c0_i32, %c0_i32_0 : i32, i32
  }
  func.func @transform_2(%arg0: i32, %arg1: i32) -> (i32, i32) {
    %c0_i32 = arith.constant 0 : i32
    %c0_i32_0 = arith.constant 0 : i32
    %c0_i32_1 = arith.constant 0 : i32
    return %c0_i32, %c0_i32_0 : i32, i32
  }
  func.func @transform_3(%arg0: i32, %arg1: i32) -> (i32, i32, i32) {
    %c0_i32 = arith.constant 0 : i32
    %c0_i32_0 = arith.constant 0 : i32
    return %arg1, %arg0, %c0_i32 : i32, i32, i32
  }
  func.func @transform_4(%arg0: i32, %arg1: i32) -> (i32, i32) {
    %c0_i32 = arith.constant 0 : i32
    %c0_i32_0 = arith.constant 0 : i32
    return %arg0, %c0_i32 : i32, i32
  }
}

module attributes {stable_mosaic.version = 11 : i64} {
  func.func @_lstm_fused_kernel(%arg0: i32, %arg1: i32, %arg2: memref<8x8x32xf32, #tpu.memory_space<vmem>>, %arg3: memref<32x512xf32, #tpu.memory_space<vmem>>, %arg4: memref<128x512xf32, #tpu.memory_space<vmem>>, %arg5: memref<8x8x128xf32, #tpu.memory_space<vmem>>, %arg6: memref<8x128xf32, #tpu.memory_space<vmem>>, %arg7: memref<8x8x512xf32, #tpu.memory_space<vmem>>, %arg8: memref<8x128xf32, #tpu.memory_space<vmem>>, %arg9: memref<8x128xf32, #tpu.memory_space<vmem>>) attributes {dimension_semantics = [#tpu.dimension_semantics<parallel>, #tpu.dimension_semantics<arbitrary>], iteration_bounds = array<i64: 1, 1>, scalar_prefetch = 0 : i64, scratch_operands = 3 : i64, tpu.core_type = #tpu.core_type<tc>, window_params = [{transform_indices = @transform_0, window_bounds = array<i64: 8, 8, 32>}, {pipeline_mode = #tpu.pipeline_mode<synchronous>, transform_indices = @transform_1, window_bounds = array<i64: 32, 512>}, {pipeline_mode = #tpu.pipeline_mode<synchronous>, transform_indices = @transform_2, window_bounds = array<i64: 128, 512>}, {transform_indices = @transform_3, window_bounds = array<i64: 8, 8, 128>}, {transform_indices = @transform_4, window_bounds = array<i64: 8, 128>}]} {
    %c0_i32 = arith.constant 0 : i32
    %0 = arith.cmpi eq, %arg1, %c0_i32 : i32
    %1 = arith.extui %0 : i1 to i32
    %c0_i32_0 = arith.constant 0 : i32
    %2 = arith.cmpi ne, %1, %c0_i32_0 : i32
    scf.if %2 {
      %cst_127 = arith.constant 0.000000e+00 : f32
      %348 = vector.broadcast %cst_127 : f32 to vector<8x128xf32>
      %c0_128 = arith.constant 0 : index
      %c0_129 = arith.constant 0 : index
      %349 = vector.load %arg8[%c0_128, %c0_129] : memref<8x128xf32, #tpu.memory_space<vmem>>, vector<8x128xf32>
      tpu.vector_store %arg8[%c0_128, %c0_129], %348 {strides = array<i32>} : memref<8x128xf32, #tpu.memory_space<vmem>>, vector<8x128xf32>,
      %cst_130 = arith.constant 0.000000e+00 : f32
      %350 = vector.broadcast %cst_130 : f32 to vector<8x128xf32>
      %c0_131 = arith.constant 0 : index
      %c0_132 = arith.constant 0 : index
      %351 = vector.load %arg9[%c0_131, %c0_132] : memref<8x128xf32, #tpu.memory_space<vmem>>, vector<8x128xf32>
      tpu.vector_store %arg9[%c0_131, %c0_132], %350 {strides = array<i32>} : memref<8x128xf32, #tpu.memory_space<vmem>>, vector<8x128xf32>,
    } else {
    }
    %c0 = arith.constant 0 : index
    %c0_1 = arith.constant 0 : index
    %3 = vector.load %arg3[%c0, %c0_1] : memref<32x512xf32, #tpu.memory_space<vmem>>, vector<32x512xf32>
    %c0_2 = arith.constant 0 : index
    %c0_3 = arith.constant 0 : index
    %4 = vector.load %arg4[%c0_2, %c0_3] : memref<128x512xf32, #tpu.memory_space<vmem>>, vector<128x512xf32>
    %c0_i32_4 = arith.constant 0 : i32
    %5 = arith.index_cast %c0_i32_4 : i32 to index
    %c0_5 = arith.constant 0 : index
    %c0_6 = arith.constant 0 : index
    %6 = vector.load %arg2[%5, %c0_5, %c0_6] : memref<8x8x32xf32, #tpu.memory_space<vmem>>, vector<1x8x32xf32>
    %7 = vector.shape_cast %6 : vector<1x8x32xf32> to vector<8x32xf32>
    %cst = arith.constant dense<0.000000e+00> : vector<8x512xf32>
    %8 = tpu.matmul %7, %3, %cst {dimension_numbers = #tpu.dot_dimension_numbers<[1], [0], [0], [1], [0, 0, 1, 1], [], []>} : vector<8x32xf32>, vector<32x512xf32>, vector<8x512xf32> -> vector<8x512xf32>
    %9 = arith.index_cast %c0_i32_4 : i32 to index
    %c0_7 = arith.constant 0 : index
    %c0_8 = arith.constant 0 : index
    %10 = vector.load %arg7[%9, %c0_7, %c0_8] : memref<8x8x512xf32, #tpu.memory_space<vmem>>, vector<1x8x512xf32>
    %11 = vector.shape_cast %10 : vector<1x8x512xf32> to vector<8x512xf32>
    %12 = vector.shape_cast %8 : vector<8x512xf32> to vector<1x8x512xf32>
    tpu.vector_store %arg7[%9, %c0_7, %c0_8], %12 {strides = array<i32>} : memref<8x8x512xf32, #tpu.memory_space<vmem>>, vector<1x8x512xf32>,
    %c1_i32 = arith.constant 1 : i32
    %13 = arith.index_cast %c1_i32 : i32 to index
    %c0_9 = arith.constant 0 : index
    %c0_10 = arith.constant 0 : index
    %14 = vector.load %arg2[%13, %c0_9, %c0_10] : memref<8x8x32xf32, #tpu.memory_space<vmem>>, vector<1x8x32xf32>
    %15 = vector.shape_cast %14 : vector<1x8x32xf32> to vector<8x32xf32>
    %cst_11 = arith.constant dense<0.000000e+00> : vector<8x512xf32>
    %16 = tpu.matmul %15, %3, %cst_11 {dimension_numbers = #tpu.dot_dimension_numbers<[1], [0], [0], [1], [0, 0, 1, 1], [], []>} : vector<8x32xf32>, vector<32x512xf32>, vector<8x512xf32> -> vector<8x512xf32>
    %17 = arith.index_cast %c1_i32 : i32 to index
    %c0_12 = arith.constant 0 : index
    %c0_13 = arith.constant 0 : index
    %18 = vector.load %arg7[%17, %c0_12, %c0_13] : memref<8x8x512xf32, #tpu.memory_space<vmem>>, vector<1x8x512xf32>
    %19 = vector.shape_cast %18 : vector<1x8x512xf32> to vector<8x512xf32>
    %20 = vector.shape_cast %16 : vector<8x512xf32> to vector<1x8x512xf32>
    tpu.vector_store %arg7[%17, %c0_12, %c0_13], %20 {strides = array<i32>} : memref<8x8x512xf32, #tpu.memory_space<vmem>>, vector<1x8x512xf32>,
    %c2_i32 = arith.constant 2 : i32
    %21 = arith.index_cast %c2_i32 : i32 to index
    %c0_14 = arith.constant 0 : index
    %c0_15 = arith.constant 0 : index
    %22 = vector.load %arg2[%21, %c0_14, %c0_15] : memref<8x8x32xf32, #tpu.memory_space<vmem>>, vector<1x8x32xf32>
    %23 = vector.shape_cast %22 : vector<1x8x32xf32> to vector<8x32xf32>
    %cst_16 = arith.constant dense<0.000000e+00> : vector<8x512xf32>
    %24 = tpu.matmul %23, %3, %cst_16 {dimension_numbers = #tpu.dot_dimension_numbers<[1], [0], [0], [1], [0, 0, 1, 1], [], []>} : vector<8x32xf32>, vector<32x512xf32>, vector<8x512xf32> -> vector<8x512xf32>
    %25 = arith.index_cast %c2_i32 : i32 to index
    %c0_17 = arith.constant 0 : index
    %c0_18 = arith.constant 0 : index
    %26 = vector.load %arg7[%25, %c0_17, %c0_18] : memref<8x8x512xf32, #tpu.memory_space<vmem>>, vector<1x8x512xf32>
    %27 = vector.shape_cast %26 : vector<1x8x512xf32> to vector<8x512xf32>
    %28 = vector.shape_cast %24 : vector<8x512xf32> to vector<1x8x512xf32>
    tpu.vector_store %arg7[%25, %c0_17, %c0_18], %28 {strides = array<i32>} : memref<8x8x512xf32, #tpu.memory_space<vmem>>, vector<1x8x512xf32>,
    %c3_i32 = arith.constant 3 : i32
    %29 = arith.index_cast %c3_i32 : i32 to index
    %c0_19 = arith.constant 0 : index
    %c0_20 = arith.constant 0 : index
    %30 = vector.load %arg2[%29, %c0_19, %c0_20] : memref<8x8x32xf32, #tpu.memory_space<vmem>>, vector<1x8x32xf32>
    %31 = vector.shape_cast %30 : vector<1x8x32xf32> to vector<8x32xf32>
    %cst_21 = arith.constant dense<0.000000e+00> : vector<8x512xf32>
    %32 = tpu.matmul %31, %3, %cst_21 {dimension_numbers = #tpu.dot_dimension_numbers<[1], [0], [0], [1], [0, 0, 1, 1], [], []>} : vector<8x32xf32>, vector<32x512xf32>, vector<8x512xf32> -> vector<8x512xf32>
    %33 = arith.index_cast %c3_i32 : i32 to index
    %c0_22 = arith.constant 0 : index
    %c0_23 = arith.constant 0 : index
    %34 = vector.load %arg7[%33, %c0_22, %c0_23] : memref<8x8x512xf32, #tpu.memory_space<vmem>>, vector<1x8x512xf32>
    %35 = vector.shape_cast %34 : vector<1x8x512xf32> to vector<8x512xf32>
    %36 = vector.shape_cast %32 : vector<8x512xf32> to vector<1x8x512xf32>
    tpu.vector_store %arg7[%33, %c0_22, %c0_23], %36 {strides = array<i32>} : memref<8x8x512xf32, #tpu.memory_space<vmem>>, vector<1x8x512xf32>,
    %c4_i32 = arith.constant 4 : i32
    %37 = arith.index_cast %c4_i32 : i32 to index
    %c0_24 = arith.constant 0 : index
    %c0_25 = arith.constant 0 : index
    %38 = vector.load %arg2[%37, %c0_24, %c0_25] : memref<8x8x32xf32, #tpu.memory_space<vmem>>, vector<1x8x32xf32>
    %39 = vector.shape_cast %38 : vector<1x8x32xf32> to vector<8x32xf32>
    %cst_26 = arith.constant dense<0.000000e+00> : vector<8x512xf32>
    %40 = tpu.matmul %39, %3, %cst_26 {dimension_numbers = #tpu.dot_dimension_numbers<[1], [0], [0], [1], [0, 0, 1, 1], [], []>} : vector<8x32xf32>, vector<32x512xf32>, vector<8x512xf32> -> vector<8x512xf32>
    %41 = arith.index_cast %c4_i32 : i32 to index
    %c0_27 = arith.constant 0 : index
    %c0_28 = arith.constant 0 : index
    %42 = vector.load %arg7[%41, %c0_27, %c0_28] : memref<8x8x512xf32, #tpu.memory_space<vmem>>, vector<1x8x512xf32>
    %43 = vector.shape_cast %42 : vector<1x8x512xf32> to vector<8x512xf32>
    %44 = vector.shape_cast %40 : vector<8x512xf32> to vector<1x8x512xf32>
    tpu.vector_store %arg7[%41, %c0_27, %c0_28], %44 {strides = array<i32>} : memref<8x8x512xf32, #tpu.memory_space<vmem>>, vector<1x8x512xf32>,
    %c5_i32 = arith.constant 5 : i32
    %45 = arith.index_cast %c5_i32 : i32 to index
    %c0_29 = arith.constant 0 : index
    %c0_30 = arith.constant 0 : index
    %46 = vector.load %arg2[%45, %c0_29, %c0_30] : memref<8x8x32xf32, #tpu.memory_space<vmem>>, vector<1x8x32xf32>
    %47 = vector.shape_cast %46 : vector<1x8x32xf32> to vector<8x32xf32>
    %cst_31 = arith.constant dense<0.000000e+00> : vector<8x512xf32>
    %48 = tpu.matmul %47, %3, %cst_31 {dimension_numbers = #tpu.dot_dimension_numbers<[1], [0], [0], [1], [0, 0, 1, 1], [], []>} : vector<8x32xf32>, vector<32x512xf32>, vector<8x512xf32> -> vector<8x512xf32>
    %49 = arith.index_cast %c5_i32 : i32 to index
    %c0_32 = arith.constant 0 : index
    %c0_33 = arith.constant 0 : index
    %50 = vector.load %arg7[%49, %c0_32, %c0_33] : memref<8x8x512xf32, #tpu.memory_space<vmem>>, vector<1x8x512xf32>
    %51 = vector.shape_cast %50 : vector<1x8x512xf32> to vector<8x512xf32>
    %52 = vector.shape_cast %48 : vector<8x512xf32> to vector<1x8x512xf32>
    tpu.vector_store %arg7[%49, %c0_32, %c0_33], %52 {strides = array<i32>} : memref<8x8x512xf32, #tpu.memory_space<vmem>>, vector<1x8x512xf32>,
    %c6_i32 = arith.constant 6 : i32
    %53 = arith.index_cast %c6_i32 : i32 to index
    %c0_34 = arith.constant 0 : index
    %c0_35 = arith.constant 0 : index
    %54 = vector.load %arg2[%53, %c0_34, %c0_35] : memref<8x8x32xf32, #tpu.memory_space<vmem>>, vector<1x8x32xf32>
    %55 = vector.shape_cast %54 : vector<1x8x32xf32> to vector<8x32xf32>
    %cst_36 = arith.constant dense<0.000000e+00> : vector<8x512xf32>
    %56 = tpu.matmul %55, %3, %cst_36 {dimension_numbers = #tpu.dot_dimension_numbers<[1], [0], [0], [1], [0, 0, 1, 1], [], []>} : vector<8x32xf32>, vector<32x512xf32>, vector<8x512xf32> -> vector<8x512xf32>
    %57 = arith.index_cast %c6_i32 : i32 to index
    %c0_37 = arith.constant 0 : index
    %c0_38 = arith.constant 0 : index
    %58 = vector.load %arg7[%57, %c0_37, %c0_38] : memref<8x8x512xf32, #tpu.memory_space<vmem>>, vector<1x8x512xf32>
    %59 = vector.shape_cast %58 : vector<1x8x512xf32> to vector<8x512xf32>
    %60 = vector.shape_cast %56 : vector<8x512xf32> to vector<1x8x512xf32>
    tpu.vector_store %arg7[%57, %c0_37, %c0_38], %60 {strides = array<i32>} : memref<8x8x512xf32, #tpu.memory_space<vmem>>, vector<1x8x512xf32>,
    %c7_i32 = arith.constant 7 : i32
    %61 = arith.index_cast %c7_i32 : i32 to index
    %c0_39 = arith.constant 0 : index
    %c0_40 = arith.constant 0 : index
    %62 = vector.load %arg2[%61, %c0_39, %c0_40] : memref<8x8x32xf32, #tpu.memory_space<vmem>>, vector<1x8x32xf32>
    %63 = vector.shape_cast %62 : vector<1x8x32xf32> to vector<8x32xf32>
    %cst_41 = arith.constant dense<0.000000e+00> : vector<8x512xf32>
    %64 = tpu.matmul %63, %3, %cst_41 {dimension_numbers = #tpu.dot_dimension_numbers<[1], [0], [0], [1], [0, 0, 1, 1], [], []>} : vector<8x32xf32>, vector<32x512xf32>, vector<8x512xf32> -> vector<8x512xf32>
    %65 = arith.index_cast %c7_i32 : i32 to index
    %c0_42 = arith.constant 0 : index
    %c0_43 = arith.constant 0 : index
    %66 = vector.load %arg7[%65, %c0_42, %c0_43] : memref<8x8x512xf32, #tpu.memory_space<vmem>>, vector<1x8x512xf32>
    %67 = vector.shape_cast %66 : vector<1x8x512xf32> to vector<8x512xf32>
    %68 = vector.shape_cast %64 : vector<8x512xf32> to vector<1x8x512xf32>
    tpu.vector_store %arg7[%65, %c0_42, %c0_43], %68 {strides = array<i32>} : memref<8x8x512xf32, #tpu.memory_space<vmem>>, vector<1x8x512xf32>,
    %c8_i32 = arith.constant 8 : i32
    %c0_44 = arith.constant 0 : index
    %c0_45 = arith.constant 0 : index
    %69 = vector.load %arg8[%c0_44, %c0_45] : memref<8x128xf32, #tpu.memory_space<vmem>>, vector<8x128xf32>
    %c0_46 = arith.constant 0 : index
    %c0_47 = arith.constant 0 : index
    %70 = vector.load %arg9[%c0_46, %c0_47] : memref<8x128xf32, #tpu.memory_space<vmem>>, vector<8x128xf32>
    %c0_i32_48 = arith.constant 0 : i32
    %71 = arith.index_cast %c0_i32_48 : i32 to index
    %c0_49 = arith.constant 0 : index
    %c0_50 = arith.constant 0 : index
    %72 = vector.load %arg7[%71, %c0_49, %c0_50] : memref<8x8x512xf32, #tpu.memory_space<vmem>>, vector<1x8x512xf32>
    %73 = vector.shape_cast %72 : vector<1x8x512xf32> to vector<8x512xf32>
    %cst_51 = arith.constant dense<0.000000e+00> : vector<8x512xf32>
    %74 = tpu.matmul %69, %4, %cst_51 {dimension_numbers = #tpu.dot_dimension_numbers<[1], [0], [0], [1], [0, 0, 1, 1], [], []>} : vector<8x128xf32>, vector<128x512xf32>, vector<8x512xf32> -> vector<8x512xf32>
    %75 = arith.addf %73, %74 : vector<8x512xf32>
    %76 = vector.extract_strided_slice %75 {offsets = [0, 0], sizes = [8, 128], strides = [1, 1]} : vector<8x512xf32> to vector<8x128xf32>
    %77 = arith.negf %76 : vector<8x128xf32>
    %78 = math.exp %77 : vector<8x128xf32>
    %cst_52 = arith.constant 1.000000e+00 : f32
    %79 = vector.broadcast %cst_52 : f32 to vector<8x128xf32>
    %80 = arith.addf %79, %78 : vector<8x128xf32>
    %81 = arith.divf %79, %80 : vector<8x128xf32>
    %82 = vector.extract_strided_slice %75 {offsets = [0, 128], sizes = [8, 128], strides = [1, 1]} : vector<8x512xf32> to vector<8x128xf32>
    %83 = arith.negf %82 : vector<8x128xf32>
    %84 = math.exp %83 : vector<8x128xf32>
    %cst_53 = arith.constant 1.000000e+00 : f32
    %85 = vector.broadcast %cst_53 : f32 to vector<8x128xf32>
    %86 = arith.addf %85, %84 : vector<8x128xf32>
    %87 = arith.divf %85, %86 : vector<8x128xf32>
    %88 = vector.extract_strided_slice %75 {offsets = [0, 256], sizes = [8, 128], strides = [1, 1]} : vector<8x512xf32> to vector<8x128xf32>
    %89 = math.tanh %88 : vector<8x128xf32>
    %90 = vector.extract_strided_slice %75 {offsets = [0, 384], sizes = [8, 128], strides = [1, 1]} : vector<8x512xf32> to vector<8x128xf32>
    %91 = arith.negf %90 : vector<8x128xf32>
    %92 = math.exp %91 : vector<8x128xf32>
    %cst_54 = arith.constant 1.000000e+00 : f32
    %93 = vector.broadcast %cst_54 : f32 to vector<8x128xf32>
    %94 = arith.addf %93, %92 : vector<8x128xf32>
    %95 = arith.divf %93, %94 : vector<8x128xf32>
    %96 = arith.mulf %87, %70 : vector<8x128xf32>
    %97 = arith.mulf %81, %89 : vector<8x128xf32>
    %98 = arith.addf %96, %97 : vector<8x128xf32>
    %99 = math.tanh %98 : vector<8x128xf32>
    %100 = arith.mulf %95, %99 : vector<8x128xf32>
    %101 = arith.index_cast %c0_i32_48 : i32 to index
    %c0_55 = arith.constant 0 : index
    %c0_56 = arith.constant 0 : index
    %102 = vector.load %arg5[%101, %c0_55, %c0_56] : memref<8x8x128xf32, #tpu.memory_space<vmem>>, vector<1x8x128xf32>
    %103 = vector.shape_cast %102 : vector<1x8x128xf32> to vector<8x128xf32>
    %104 = vector.shape_cast %100 : vector<8x128xf32> to vector<1x8x128xf32>
    tpu.vector_store %arg5[%101, %c0_55, %c0_56], %104 {strides = array<i32>} : memref<8x8x128xf32, #tpu.memory_space<vmem>>, vector<1x8x128xf32>,
    %c1_i32_57 = arith.constant 1 : i32
    %105 = arith.index_cast %c1_i32_57 : i32 to index
    %c0_58 = arith.constant 0 : index
    %c0_59 = arith.constant 0 : index
    %106 = vector.load %arg7[%105, %c0_58, %c0_59] : memref<8x8x512xf32, #tpu.memory_space<vmem>>, vector<1x8x512xf32>
    %107 = vector.shape_cast %106 : vector<1x8x512xf32> to vector<8x512xf32>
    %cst_60 = arith.constant dense<0.000000e+00> : vector<8x512xf32>
    %108 = tpu.matmul %100, %4, %cst_60 {dimension_numbers = #tpu.dot_dimension_numbers<[1], [0], [0], [1], [0, 0, 1, 1], [], []>} : vector<8x128xf32>, vector<128x512xf32>, vector<8x512xf32> -> vector<8x512xf32>
    %109 = arith.addf %107, %108 : vector<8x512xf32>
    %110 = vector.extract_strided_slice %109 {offsets = [0, 0], sizes = [8, 128], strides = [1, 1]} : vector<8x512xf32> to vector<8x128xf32>
    %111 = arith.negf %110 : vector<8x128xf32>
    %112 = math.exp %111 : vector<8x128xf32>
    %cst_61 = arith.constant 1.000000e+00 : f32
    %113 = vector.broadcast %cst_61 : f32 to vector<8x128xf32>
    %114 = arith.addf %113, %112 : vector<8x128xf32>
    %115 = arith.divf %113, %114 : vector<8x128xf32>
    %116 = vector.extract_strided_slice %109 {offsets = [0, 128], sizes = [8, 128], strides = [1, 1]} : vector<8x512xf32> to vector<8x128xf32>
    %117 = arith.negf %116 : vector<8x128xf32>
    %118 = math.exp %117 : vector<8x128xf32>
    %cst_62 = arith.constant 1.000000e+00 : f32
    %119 = vector.broadcast %cst_62 : f32 to vector<8x128xf32>
    %120 = arith.addf %119, %118 : vector<8x128xf32>
    %121 = arith.divf %119, %120 : vector<8x128xf32>
    %122 = vector.extract_strided_slice %109 {offsets = [0, 256], sizes = [8, 128], strides = [1, 1]} : vector<8x512xf32> to vector<8x128xf32>
    %123 = math.tanh %122 : vector<8x128xf32>
    %124 = vector.extract_strided_slice %109 {offsets = [0, 384], sizes = [8, 128], strides = [1, 1]} : vector<8x512xf32> to vector<8x128xf32>
    %125 = arith.negf %124 : vector<8x128xf32>
    %126 = math.exp %125 : vector<8x128xf32>
    %cst_63 = arith.constant 1.000000e+00 : f32
    %127 = vector.broadcast %cst_63 : f32 to vector<8x128xf32>
    %128 = arith.addf %127, %126 : vector<8x128xf32>
    %129 = arith.divf %127, %128 : vector<8x128xf32>
    %130 = arith.mulf %121, %98 : vector<8x128xf32>
    %131 = arith.mulf %115, %123 : vector<8x128xf32>
    %132 = arith.addf %130, %131 : vector<8x128xf32>
    %133 = math.tanh %132 : vector<8x128xf32>
    %134 = arith.mulf %129, %133 : vector<8x128xf32>
    %135 = arith.index_cast %c1_i32_57 : i32 to index
    %c0_64 = arith.constant 0 : index
    %c0_65 = arith.constant 0 : index
    %136 = vector.load %arg5[%135, %c0_64, %c0_65] : memref<8x8x128xf32, #tpu.memory_space<vmem>>, vector<1x8x128xf32>
    %137 = vector.shape_cast %136 : vector<1x8x128xf32> to vector<8x128xf32>
    %138 = vector.shape_cast %134 : vector<8x128xf32> to vector<1x8x128xf32>
    tpu.vector_store %arg5[%135, %c0_64, %c0_65], %138 {strides = array<i32>} : memref<8x8x128xf32, #tpu.memory_space<vmem>>, vector<1x8x128xf32>,
    %c2_i32_66 = arith.constant 2 : i32
    %139 = arith.index_cast %c2_i32_66 : i32 to index
    %c0_67 = arith.constant 0 : index
    %c0_68 = arith.constant 0 : index
    %140 = vector.load %arg7[%139, %c0_67, %c0_68] : memref<8x8x512xf32, #tpu.memory_space<vmem>>, vector<1x8x512xf32>
    %141 = vector.shape_cast %140 : vector<1x8x512xf32> to vector<8x512xf32>
    %cst_69 = arith.constant dense<0.000000e+00> : vector<8x512xf32>
    %142 = tpu.matmul %134, %4, %cst_69 {dimension_numbers = #tpu.dot_dimension_numbers<[1], [0], [0], [1], [0, 0, 1, 1], [], []>} : vector<8x128xf32>, vector<128x512xf32>, vector<8x512xf32> -> vector<8x512xf32>
    %143 = arith.addf %141, %142 : vector<8x512xf32>
    %144 = vector.extract_strided_slice %143 {offsets = [0, 0], sizes = [8, 128], strides = [1, 1]} : vector<8x512xf32> to vector<8x128xf32>
    %145 = arith.negf %144 : vector<8x128xf32>
    %146 = math.exp %145 : vector<8x128xf32>
    %cst_70 = arith.constant 1.000000e+00 : f32
    %147 = vector.broadcast %cst_70 : f32 to vector<8x128xf32>
    %148 = arith.addf %147, %146 : vector<8x128xf32>
    %149 = arith.divf %147, %148 : vector<8x128xf32>
    %150 = vector.extract_strided_slice %143 {offsets = [0, 128], sizes = [8, 128], strides = [1, 1]} : vector<8x512xf32> to vector<8x128xf32>
    %151 = arith.negf %150 : vector<8x128xf32>
    %152 = math.exp %151 : vector<8x128xf32>
    %cst_71 = arith.constant 1.000000e+00 : f32
    %153 = vector.broadcast %cst_71 : f32 to vector<8x128xf32>
    %154 = arith.addf %153, %152 : vector<8x128xf32>
    %155 = arith.divf %153, %154 : vector<8x128xf32>
    %156 = vector.extract_strided_slice %143 {offsets = [0, 256], sizes = [8, 128], strides = [1, 1]} : vector<8x512xf32> to vector<8x128xf32>
    %157 = math.tanh %156 : vector<8x128xf32>
    %158 = vector.extract_strided_slice %143 {offsets = [0, 384], sizes = [8, 128], strides = [1, 1]} : vector<8x512xf32> to vector<8x128xf32>
    %159 = arith.negf %158 : vector<8x128xf32>
    %160 = math.exp %159 : vector<8x128xf32>
    %cst_72 = arith.constant 1.000000e+00 : f32
    %161 = vector.broadcast %cst_72 : f32 to vector<8x128xf32>
    %162 = arith.addf %161, %160 : vector<8x128xf32>
    %163 = arith.divf %161, %162 : vector<8x128xf32>
    %164 = arith.mulf %155, %132 : vector<8x128xf32>
    %165 = arith.mulf %149, %157 : vector<8x128xf32>
    %166 = arith.addf %164, %165 : vector<8x128xf32>
    %167 = math.tanh %166 : vector<8x128xf32>
    %168 = arith.mulf %163, %167 : vector<8x128xf32>
    %169 = arith.index_cast %c2_i32_66 : i32 to index
    %c0_73 = arith.constant 0 : index
    %c0_74 = arith.constant 0 : index
    %170 = vector.load %arg5[%169, %c0_73, %c0_74] : memref<8x8x128xf32, #tpu.memory_space<vmem>>, vector<1x8x128xf32>
    %171 = vector.shape_cast %170 : vector<1x8x128xf32> to vector<8x128xf32>
    %172 = vector.shape_cast %168 : vector<8x128xf32> to vector<1x8x128xf32>
    tpu.vector_store %arg5[%169, %c0_73, %c0_74], %172 {strides = array<i32>} : memref<8x8x128xf32, #tpu.memory_space<vmem>>, vector<1x8x128xf32>,
    %c3_i32_75 = arith.constant 3 : i32
    %173 = arith.index_cast %c3_i32_75 : i32 to index
    %c0_76 = arith.constant 0 : index
    %c0_77 = arith.constant 0 : index
    %174 = vector.load %arg7[%173, %c0_76, %c0_77] : memref<8x8x512xf32, #tpu.memory_space<vmem>>, vector<1x8x512xf32>
    %175 = vector.shape_cast %174 : vector<1x8x512xf32> to vector<8x512xf32>
    %cst_78 = arith.constant dense<0.000000e+00> : vector<8x512xf32>
    %176 = tpu.matmul %168, %4, %cst_78 {dimension_numbers = #tpu.dot_dimension_numbers<[1], [0], [0], [1], [0, 0, 1, 1], [], []>} : vector<8x128xf32>, vector<128x512xf32>, vector<8x512xf32> -> vector<8x512xf32>
    %177 = arith.addf %175, %176 : vector<8x512xf32>
    %178 = vector.extract_strided_slice %177 {offsets = [0, 0], sizes = [8, 128], strides = [1, 1]} : vector<8x512xf32> to vector<8x128xf32>
    %179 = arith.negf %178 : vector<8x128xf32>
    %180 = math.exp %179 : vector<8x128xf32>
    %cst_79 = arith.constant 1.000000e+00 : f32
    %181 = vector.broadcast %cst_79 : f32 to vector<8x128xf32>
    %182 = arith.addf %181, %180 : vector<8x128xf32>
    %183 = arith.divf %181, %182 : vector<8x128xf32>
    %184 = vector.extract_strided_slice %177 {offsets = [0, 128], sizes = [8, 128], strides = [1, 1]} : vector<8x512xf32> to vector<8x128xf32>
    %185 = arith.negf %184 : vector<8x128xf32>
    %186 = math.exp %185 : vector<8x128xf32>
    %cst_80 = arith.constant 1.000000e+00 : f32
    %187 = vector.broadcast %cst_80 : f32 to vector<8x128xf32>
    %188 = arith.addf %187, %186 : vector<8x128xf32>
    %189 = arith.divf %187, %188 : vector<8x128xf32>
    %190 = vector.extract_strided_slice %177 {offsets = [0, 256], sizes = [8, 128], strides = [1, 1]} : vector<8x512xf32> to vector<8x128xf32>
    %191 = math.tanh %190 : vector<8x128xf32>
    %192 = vector.extract_strided_slice %177 {offsets = [0, 384], sizes = [8, 128], strides = [1, 1]} : vector<8x512xf32> to vector<8x128xf32>
    %193 = arith.negf %192 : vector<8x128xf32>
    %194 = math.exp %193 : vector<8x128xf32>
    %cst_81 = arith.constant 1.000000e+00 : f32
    %195 = vector.broadcast %cst_81 : f32 to vector<8x128xf32>
    %196 = arith.addf %195, %194 : vector<8x128xf32>
    %197 = arith.divf %195, %196 : vector<8x128xf32>
    %198 = arith.mulf %189, %166 : vector<8x128xf32>
    %199 = arith.mulf %183, %191 : vector<8x128xf32>
    %200 = arith.addf %198, %199 : vector<8x128xf32>
    %201 = math.tanh %200 : vector<8x128xf32>
    %202 = arith.mulf %197, %201 : vector<8x128xf32>
    %203 = arith.index_cast %c3_i32_75 : i32 to index
    %c0_82 = arith.constant 0 : index
    %c0_83 = arith.constant 0 : index
    %204 = vector.load %arg5[%203, %c0_82, %c0_83] : memref<8x8x128xf32, #tpu.memory_space<vmem>>, vector<1x8x128xf32>
    %205 = vector.shape_cast %204 : vector<1x8x128xf32> to vector<8x128xf32>
    %206 = vector.shape_cast %202 : vector<8x128xf32> to vector<1x8x128xf32>
    tpu.vector_store %arg5[%203, %c0_82, %c0_83], %206 {strides = array<i32>} : memref<8x8x128xf32, #tpu.memory_space<vmem>>, vector<1x8x128xf32>,
    %c4_i32_84 = arith.constant 4 : i32
    %207 = arith.index_cast %c4_i32_84 : i32 to index
    %c0_85 = arith.constant 0 : index
    %c0_86 = arith.constant 0 : index
    %208 = vector.load %arg7[%207, %c0_85, %c0_86] : memref<8x8x512xf32, #tpu.memory_space<vmem>>, vector<1x8x512xf32>
    %209 = vector.shape_cast %208 : vector<1x8x512xf32> to vector<8x512xf32>
    %cst_87 = arith.constant dense<0.000000e+00> : vector<8x512xf32>
    %210 = tpu.matmul %202, %4, %cst_87 {dimension_numbers = #tpu.dot_dimension_numbers<[1], [0], [0], [1], [0, 0, 1, 1], [], []>} : vector<8x128xf32>, vector<128x512xf32>, vector<8x512xf32> -> vector<8x512xf32>
    %211 = arith.addf %209, %210 : vector<8x512xf32>
    %212 = vector.extract_strided_slice %211 {offsets = [0, 0], sizes = [8, 128], strides = [1, 1]} : vector<8x512xf32> to vector<8x128xf32>
    %213 = arith.negf %212 : vector<8x128xf32>
    %214 = math.exp %213 : vector<8x128xf32>
    %cst_88 = arith.constant 1.000000e+00 : f32
    %215 = vector.broadcast %cst_88 : f32 to vector<8x128xf32>
    %216 = arith.addf %215, %214 : vector<8x128xf32>
    %217 = arith.divf %215, %216 : vector<8x128xf32>
    %218 = vector.extract_strided_slice %211 {offsets = [0, 128], sizes = [8, 128], strides = [1, 1]} : vector<8x512xf32> to vector<8x128xf32>
    %219 = arith.negf %218 : vector<8x128xf32>
    %220 = math.exp %219 : vector<8x128xf32>
    %cst_89 = arith.constant 1.000000e+00 : f32
    %221 = vector.broadcast %cst_89 : f32 to vector<8x128xf32>
    %222 = arith.addf %221, %220 : vector<8x128xf32>
    %223 = arith.divf %221, %222 : vector<8x128xf32>
    %224 = vector.extract_strided_slice %211 {offsets = [0, 256], sizes = [8, 128], strides = [1, 1]} : vector<8x512xf32> to vector<8x128xf32>
    %225 = math.tanh %224 : vector<8x128xf32>
    %226 = vector.extract_strided_slice %211 {offsets = [0, 384], sizes = [8, 128], strides = [1, 1]} : vector<8x512xf32> to vector<8x128xf32>
    %227 = arith.negf %226 : vector<8x128xf32>
    %228 = math.exp %227 : vector<8x128xf32>
    %cst_90 = arith.constant 1.000000e+00 : f32
    %229 = vector.broadcast %cst_90 : f32 to vector<8x128xf32>
    %230 = arith.addf %229, %228 : vector<8x128xf32>
    %231 = arith.divf %229, %230 : vector<8x128xf32>
    %232 = arith.mulf %223, %200 : vector<8x128xf32>
    %233 = arith.mulf %217, %225 : vector<8x128xf32>
    %234 = arith.addf %232, %233 : vector<8x128xf32>
    %235 = math.tanh %234 : vector<8x128xf32>
    %236 = arith.mulf %231, %235 : vector<8x128xf32>
    %237 = arith.index_cast %c4_i32_84 : i32 to index
    %c0_91 = arith.constant 0 : index
    %c0_92 = arith.constant 0 : index
    %238 = vector.load %arg5[%237, %c0_91, %c0_92] : memref<8x8x128xf32, #tpu.memory_space<vmem>>, vector<1x8x128xf32>
    %239 = vector.shape_cast %238 : vector<1x8x128xf32> to vector<8x128xf32>
    %240 = vector.shape_cast %236 : vector<8x128xf32> to vector<1x8x128xf32>
    tpu.vector_store %arg5[%237, %c0_91, %c0_92], %240 {strides = array<i32>} : memref<8x8x128xf32, #tpu.memory_space<vmem>>, vector<1x8x128xf32>,
    %c5_i32_93 = arith.constant 5 : i32
    %241 = arith.index_cast %c5_i32_93 : i32 to index
    %c0_94 = arith.constant 0 : index
    %c0_95 = arith.constant 0 : index
    %242 = vector.load %arg7[%241, %c0_94, %c0_95] : memref<8x8x512xf32, #tpu.memory_space<vmem>>, vector<1x8x512xf32>
    %243 = vector.shape_cast %242 : vector<1x8x512xf32> to vector<8x512xf32>
    %cst_96 = arith.constant dense<0.000000e+00> : vector<8x512xf32>
    %244 = tpu.matmul %236, %4, %cst_96 {dimension_numbers = #tpu.dot_dimension_numbers<[1], [0], [0], [1], [0, 0, 1, 1], [], []>} : vector<8x128xf32>, vector<128x512xf32>, vector<8x512xf32> -> vector<8x512xf32>
    %245 = arith.addf %243, %244 : vector<8x512xf32>
    %246 = vector.extract_strided_slice %245 {offsets = [0, 0], sizes = [8, 128], strides = [1, 1]} : vector<8x512xf32> to vector<8x128xf32>
    %247 = arith.negf %246 : vector<8x128xf32>
    %248 = math.exp %247 : vector<8x128xf32>
    %cst_97 = arith.constant 1.000000e+00 : f32
    %249 = vector.broadcast %cst_97 : f32 to vector<8x128xf32>
    %250 = arith.addf %249, %248 : vector<8x128xf32>
    %251 = arith.divf %249, %250 : vector<8x128xf32>
    %252 = vector.extract_strided_slice %245 {offsets = [0, 128], sizes = [8, 128], strides = [1, 1]} : vector<8x512xf32> to vector<8x128xf32>
    %253 = arith.negf %252 : vector<8x128xf32>
    %254 = math.exp %253 : vector<8x128xf32>
    %cst_98 = arith.constant 1.000000e+00 : f32
    %255 = vector.broadcast %cst_98 : f32 to vector<8x128xf32>
    %256 = arith.addf %255, %254 : vector<8x128xf32>
    %257 = arith.divf %255, %256 : vector<8x128xf32>
    %258 = vector.extract_strided_slice %245 {offsets = [0, 256], sizes = [8, 128], strides = [1, 1]} : vector<8x512xf32> to vector<8x128xf32>
    %259 = math.tanh %258 : vector<8x128xf32>
    %260 = vector.extract_strided_slice %245 {offsets = [0, 384], sizes = [8, 128], strides = [1, 1]} : vector<8x512xf32> to vector<8x128xf32>
    %261 = arith.negf %260 : vector<8x128xf32>
    %262 = math.exp %261 : vector<8x128xf32>
    %cst_99 = arith.constant 1.000000e+00 : f32
    %263 = vector.broadcast %cst_99 : f32 to vector<8x128xf32>
    %264 = arith.addf %263, %262 : vector<8x128xf32>
    %265 = arith.divf %263, %264 : vector<8x128xf32>
    %266 = arith.mulf %257, %234 : vector<8x128xf32>
    %267 = arith.mulf %251, %259 : vector<8x128xf32>
    %268 = arith.addf %266, %267 : vector<8x128xf32>
    %269 = math.tanh %268 : vector<8x128xf32>
    %270 = arith.mulf %265, %269 : vector<8x128xf32>
    %271 = arith.index_cast %c5_i32_93 : i32 to index
    %c0_100 = arith.constant 0 : index
    %c0_101 = arith.constant 0 : index
    %272 = vector.load %arg5[%271, %c0_100, %c0_101] : memref<8x8x128xf32, #tpu.memory_space<vmem>>, vector<1x8x128xf32>
    %273 = vector.shape_cast %272 : vector<1x8x128xf32> to vector<8x128xf32>
    %274 = vector.shape_cast %270 : vector<8x128xf32> to vector<1x8x128xf32>
    tpu.vector_store %arg5[%271, %c0_100, %c0_101], %274 {strides = array<i32>} : memref<8x8x128xf32, #tpu.memory_space<vmem>>, vector<1x8x128xf32>,
    %c6_i32_102 = arith.constant 6 : i32
    %275 = arith.index_cast %c6_i32_102 : i32 to index
    %c0_103 = arith.constant 0 : index
    %c0_104 = arith.constant 0 : index
    %276 = vector.load %arg7[%275, %c0_103, %c0_104] : memref<8x8x512xf32, #tpu.memory_space<vmem>>, vector<1x8x512xf32>
    %277 = vector.shape_cast %276 : vector<1x8x512xf32> to vector<8x512xf32>
    %cst_105 = arith.constant dense<0.000000e+00> : vector<8x512xf32>
    %278 = tpu.matmul %270, %4, %cst_105 {dimension_numbers = #tpu.dot_dimension_numbers<[1], [0], [0], [1], [0, 0, 1, 1], [], []>} : vector<8x128xf32>, vector<128x512xf32>, vector<8x512xf32> -> vector<8x512xf32>
    %279 = arith.addf %277, %278 : vector<8x512xf32>
    %280 = vector.extract_strided_slice %279 {offsets = [0, 0], sizes = [8, 128], strides = [1, 1]} : vector<8x512xf32> to vector<8x128xf32>
    %281 = arith.negf %280 : vector<8x128xf32>
    %282 = math.exp %281 : vector<8x128xf32>
    %cst_106 = arith.constant 1.000000e+00 : f32
    %283 = vector.broadcast %cst_106 : f32 to vector<8x128xf32>
    %284 = arith.addf %283, %282 : vector<8x128xf32>
    %285 = arith.divf %283, %284 : vector<8x128xf32>
    %286 = vector.extract_strided_slice %279 {offsets = [0, 128], sizes = [8, 128], strides = [1, 1]} : vector<8x512xf32> to vector<8x128xf32>
    %287 = arith.negf %286 : vector<8x128xf32>
    %288 = math.exp %287 : vector<8x128xf32>
    %cst_107 = arith.constant 1.000000e+00 : f32
    %289 = vector.broadcast %cst_107 : f32 to vector<8x128xf32>
    %290 = arith.addf %289, %288 : vector<8x128xf32>
    %291 = arith.divf %289, %290 : vector<8x128xf32>
    %292 = vector.extract_strided_slice %279 {offsets = [0, 256], sizes = [8, 128], strides = [1, 1]} : vector<8x512xf32> to vector<8x128xf32>
    %293 = math.tanh %292 : vector<8x128xf32>
    %294 = vector.extract_strided_slice %279 {offsets = [0, 384], sizes = [8, 128], strides = [1, 1]} : vector<8x512xf32> to vector<8x128xf32>
    %295 = arith.negf %294 : vector<8x128xf32>
    %296 = math.exp %295 : vector<8x128xf32>
    %cst_108 = arith.constant 1.000000e+00 : f32
    %297 = vector.broadcast %cst_108 : f32 to vector<8x128xf32>
    %298 = arith.addf %297, %296 : vector<8x128xf32>
    %299 = arith.divf %297, %298 : vector<8x128xf32>
    %300 = arith.mulf %291, %268 : vector<8x128xf32>
    %301 = arith.mulf %285, %293 : vector<8x128xf32>
    %302 = arith.addf %300, %301 : vector<8x128xf32>
    %303 = math.tanh %302 : vector<8x128xf32>
    %304 = arith.mulf %299, %303 : vector<8x128xf32>
    %305 = arith.index_cast %c6_i32_102 : i32 to index
    %c0_109 = arith.constant 0 : index
    %c0_110 = arith.constant 0 : index
    %306 = vector.load %arg5[%305, %c0_109, %c0_110] : memref<8x8x128xf32, #tpu.memory_space<vmem>>, vector<1x8x128xf32>
    %307 = vector.shape_cast %306 : vector<1x8x128xf32> to vector<8x128xf32>
    %308 = vector.shape_cast %304 : vector<8x128xf32> to vector<1x8x128xf32>
    tpu.vector_store %arg5[%305, %c0_109, %c0_110], %308 {strides = array<i32>} : memref<8x8x128xf32, #tpu.memory_space<vmem>>, vector<1x8x128xf32>,
    %c7_i32_111 = arith.constant 7 : i32
    %309 = arith.index_cast %c7_i32_111 : i32 to index
    %c0_112 = arith.constant 0 : index
    %c0_113 = arith.constant 0 : index
    %310 = vector.load %arg7[%309, %c0_112, %c0_113] : memref<8x8x512xf32, #tpu.memory_space<vmem>>, vector<1x8x512xf32>
    %311 = vector.shape_cast %310 : vector<1x8x512xf32> to vector<8x512xf32>
    %cst_114 = arith.constant dense<0.000000e+00> : vector<8x512xf32>
    %312 = tpu.matmul %304, %4, %cst_114 {dimension_numbers = #tpu.dot_dimension_numbers<[1], [0], [0], [1], [0, 0, 1, 1], [], []>} : vector<8x128xf32>, vector<128x512xf32>, vector<8x512xf32> -> vector<8x512xf32>
    %313 = arith.addf %311, %312 : vector<8x512xf32>
    %314 = vector.extract_strided_slice %313 {offsets = [0, 0], sizes = [8, 128], strides = [1, 1]} : vector<8x512xf32> to vector<8x128xf32>
    %315 = arith.negf %314 : vector<8x128xf32>
    %316 = math.exp %315 : vector<8x128xf32>
    %cst_115 = arith.constant 1.000000e+00 : f32
    %317 = vector.broadcast %cst_115 : f32 to vector<8x128xf32>
    %318 = arith.addf %317, %316 : vector<8x128xf32>
    %319 = arith.divf %317, %318 : vector<8x128xf32>
    %320 = vector.extract_strided_slice %313 {offsets = [0, 128], sizes = [8, 128], strides = [1, 1]} : vector<8x512xf32> to vector<8x128xf32>
    %321 = arith.negf %320 : vector<8x128xf32>
    %322 = math.exp %321 : vector<8x128xf32>
    %cst_116 = arith.constant 1.000000e+00 : f32
    %323 = vector.broadcast %cst_116 : f32 to vector<8x128xf32>
    %324 = arith.addf %323, %322 : vector<8x128xf32>
    %325 = arith.divf %323, %324 : vector<8x128xf32>
    %326 = vector.extract_strided_slice %313 {offsets = [0, 256], sizes = [8, 128], strides = [1, 1]} : vector<8x512xf32> to vector<8x128xf32>
    %327 = math.tanh %326 : vector<8x128xf32>
    %328 = vector.extract_strided_slice %313 {offsets = [0, 384], sizes = [8, 128], strides = [1, 1]} : vector<8x512xf32> to vector<8x128xf32>
    %329 = arith.negf %328 : vector<8x128xf32>
    %330 = math.exp %329 : vector<8x128xf32>
    %cst_117 = arith.constant 1.000000e+00 : f32
    %331 = vector.broadcast %cst_117 : f32 to vector<8x128xf32>
    %332 = arith.addf %331, %330 : vector<8x128xf32>
    %333 = arith.divf %331, %332 : vector<8x128xf32>
    %334 = arith.mulf %325, %302 : vector<8x128xf32>
    %335 = arith.mulf %319, %327 : vector<8x128xf32>
    %336 = arith.addf %334, %335 : vector<8x128xf32>
    %337 = math.tanh %336 : vector<8x128xf32>
    %338 = arith.mulf %333, %337 : vector<8x128xf32>
    %339 = arith.index_cast %c7_i32_111 : i32 to index
    %c0_118 = arith.constant 0 : index
    %c0_119 = arith.constant 0 : index
    %340 = vector.load %arg5[%339, %c0_118, %c0_119] : memref<8x8x128xf32, #tpu.memory_space<vmem>>, vector<1x8x128xf32>
    %341 = vector.shape_cast %340 : vector<1x8x128xf32> to vector<8x128xf32>
    %342 = vector.shape_cast %338 : vector<8x128xf32> to vector<1x8x128xf32>
    tpu.vector_store %arg5[%339, %c0_118, %c0_119], %342 {strides = array<i32>} : memref<8x8x128xf32, #tpu.memory_space<vmem>>, vector<1x8x128xf32>,
    %c8_i32_120 = arith.constant 8 : i32
    %c0_121 = arith.constant 0 : index
    %c0_122 = arith.constant 0 : index
    %343 = vector.load %arg8[%c0_121, %c0_122] : memref<8x128xf32, #tpu.memory_space<vmem>>, vector<8x128xf32>
    tpu.vector_store %arg8[%c0_121, %c0_122], %338 {strides = array<i32>} : memref<8x128xf32, #tpu.memory_space<vmem>>, vector<8x128xf32>,
    %c0_123 = arith.constant 0 : index
    %c0_124 = arith.constant 0 : index
    %344 = vector.load %arg9[%c0_123, %c0_124] : memref<8x128xf32, #tpu.memory_space<vmem>>, vector<8x128xf32>
    tpu.vector_store %arg9[%c0_123, %c0_124], %336 {strides = array<i32>} : memref<8x128xf32, #tpu.memory_space<vmem>>, vector<8x128xf32>,
    %c0_i32_125 = arith.constant 0 : i32
    %345 = arith.cmpi eq, %arg1, %c0_i32_125 : i32
    %346 = arith.extui %345 : i1 to i32
    %c0_i32_126 = arith.constant 0 : i32
    %347 = arith.cmpi ne, %346, %c0_i32_126 : i32
    scf.if %347 {
      %c0_127 = arith.constant 0 : index
      %c0_128 = arith.constant 0 : index
      %348 = vector.load %arg9[%c0_127, %c0_128] : memref<8x128xf32, #tpu.memory_space<vmem>>, vector<8x128xf32>
      %c0_129 = arith.constant 0 : index
      %c0_130 = arith.constant 0 : index
      %349 = vector.load %arg6[%c0_129, %c0_130] : memref<8x128xf32, #tpu.memory_space<vmem>>, vector<8x128xf32>
      tpu.vector_store %arg6[%c0_129, %c0_130], %348 {strides = array<i32>} : memref<8x128xf32, #tpu.memory_space<vmem>>, vector<8x128xf32>,
    } else {
    }
    return
  }
  func.func @transform_0(%arg0: i32, %arg1: i32) -> (i32, i32, i32) {
    %c0_i32 = arith.constant 0 : i32
    %c0_i32_0 = arith.constant 0 : i32
    return %arg1, %arg0, %c0_i32 : i32, i32, i32
  }
  func.func @transform_1(%arg0: i32, %arg1: i32) -> (i32, i32) {
    %c0_i32 = arith.constant 0 : i32
    %c0_i32_0 = arith.constant 0 : i32
    %c0_i32_1 = arith.constant 0 : i32
    return %c0_i32, %c0_i32_0 : i32, i32
  }
  func.func @transform_2(%arg0: i32, %arg1: i32) -> (i32, i32) {
    %c0_i32 = arith.constant 0 : i32
    %c0_i32_0 = arith.constant 0 : i32
    %c0_i32_1 = arith.constant 0 : i32
    return %c0_i32, %c0_i32_0 : i32, i32
  }
  func.func @transform_3(%arg0: i32, %arg1: i32) -> (i32, i32, i32) {
    %c0_i32 = arith.constant 0 : i32
    %c0_i32_0 = arith.constant 0 : i32
    return %arg1, %arg0, %c0_i32 : i32, i32, i32
  }
  func.func @transform_4(%arg0: i32, %arg1: i32) -> (i32, i32) {
    %c0_i32 = arith.constant 0 : i32
    %c0_i32_0 = arith.constant 0 : i32
    return %arg0, %c0_i32 : i32, i32
  }
}

</mosaic_0001>

<bundles_post_ra>
// kernel: stacked_rnn_forward.2
= control target key start
LH: loop header
LB: loop body
LE: loop exit
PB: predicated region body
PF: predicated region fallthrough
CT: control target
= control target key end

     0   :  { %v3524_v3 = vmov 0.0   ;;  %vm95_vm0 = vcmask 130048   ;;  %s4251_s1 = inlined_call_operand.vmem [shape: f32[16,512], index: 1, kind: input, shape index: {}]   ;;  %s4252_s0 = inlined_call_operand.vmem [shape: f32[8,8,16], index: 0, kind: input, shape index: {}]   ;;  %s4253_s2 = inlined_call_operand.vmem [shape: f32[128,512], index: 2, kind: input, shape index: {}]   ;;  %s4254_s3 = inlined_call_operand.vmem [shape: f32[8,8,128], index: 3, kind: output, shape index: {0}]   ;;  %s4255_s4 = inlined_call_operand.vmem [shape: f32[8,128], index: 4, kind: output, shape index: {1}]  }
   0x1   :  { %v23_v0 = vld [vmem:[%s4251_s1 + $0x8] sm:$0xff]  ;;  %v25_v2 = vld [vmem:[%s4251_s1 + $0x18] sm:$0xff]  ;;  %163 = vmatprep.mubr.f32.mxu0 %v3524_v3  ;;  %234 = vmatprep.mubr.f32.mxu1 %v3524_v3  ;;  %v22_v6 = vld [vmem:[%s4251_s1] sm:$0xff] }
   0x2   :  { %v27_v1 = vld [vmem:[%s4251_s1 + $0x28] sm:$0xff]  ;;  %v29_v5 = vld [vmem:[%s4251_s1 + $0x38] sm:$0xff]  ;;  %v26_v7 = vld [vmem:[%s4251_s1 + $0x20] sm:$0xff] }
   0x3   :  { %v3561_v4 = vpack.c.bf16 %v27_v1, %v23_v0  ;;  %v3572_v8 = vpack.c.bf16 %v29_v5, %v25_v2  ;;  %v3574_v9 = vpack.c.bf16 %v26_v7, %v22_v6  ;;  %v24_v10 = vld [vmem:[%s4251_s1 + $0x10] sm:$0xff]  ;;  %v94_v13 = vld [vmem:[%s4252_s0] sm:$0xff]  ;;  %v2735_v14 = vld [vmem:[%s4252_s0 + $0x8] sm:$0xff] }
   0x4   :  { %v28_v11 = vld [vmem:[%s4251_s1 + $0x30] sm:$0xff]  ;;  %v2741_v16 = vld [vmem:[%s4252_s0 + $0x18] sm:$0xff]  ;;  %v2744_v17 = vld [vmem:[%s4252_s0 + $0x20] sm:$0xff] }
   0x5   :  { %2788 = vmatprep.subr.bf16.mxu0 %v3561_v4  ;;  %v3583_v12 = vpack.c.bf16 %v28_v11, %v24_v10  ;;  %2792 = vmatprep.subr.bf16.mxu1 %v3572_v8  ;;  %v2738_v15 = vld [vmem:[%s4252_s0 + $0x10] sm:$0xff]  ;;  %v2747_v18 = vld [vmem:[%s4252_s0 + $0x28] sm:$0xff]  ;;  %v33_v22 = vld [vmem:[%s4253_s2 + $0x18] sm:$0xff] }
   0x6   :  { %2790 = vmatpush1.bf16.msra.mxu0 %v3574_v9  ;;  %v31_v19 = vld [vmem:[%s4253_s2 + $0x8] sm:$0xff]  ;;  %v2750_v21 = vld [vmem:[%s4252_s0 + $0x30] sm:$0xff]  ;;  %v37_v23 = vld [vmem:[%s4253_s2 + $0x38] sm:$0xff] }
   0x7   :  { %2794 = vmatpush1.bf16.msra.mxu1 %v3583_v12  ;;  %2796 = vmatprep.subr.bf16.mxu0 %v3561_v4  ;;  %v35_v20 = vld [vmem:[%s4253_s2 + $0x28] sm:$0xff]  ;;  %v30_v24 = vld [vmem:[%s4253_s2] sm:$0xff]  ;;  %v32_v26 = vld [vmem:[%s4253_s2 + $0x10] sm:$0xff]  ;;  %v3692_v31 = vpack.c.bf16 %v37_v23, %v33_v22 }
   0x8   :  { %2800 = vmatprep.subr.bf16.mxu1 %v3572_v8  ;;  %v34_v25 = vld [vmem:[%s4253_s2 + $0x20] sm:$0xff]  ;;  %v3679_v27 = vpack.c.bf16 %v35_v20, %v31_v19  ;;  %v36_v28 = vld [vmem:[%s4253_s2 + $0x30] sm:$0xff]  ;;  %v39_v29 = vld [vmem:[%s4253_s2 + $0x48] sm:$0xff] }
   0x9   :  { %2733 = vmatmul.mubr.msk.f32.vlgmr.msra.gmra.mrb[0].mxu0 %vm95_vm0, %v94_v13  ;;  %v43_v30 = vld [vmem:[%s4253_s2 + $0x68] sm:$0xff]  ;;  %v41_v32 = vld [vmem:[%s4253_s2 + $0x58] sm:$0xff]  ;;  %v3705_v35 = vpack.c.bf16 %v34_v25, %v30_v24  ;;  %v3709_v36 = vpack.c.bf16 %v36_v28, %v32_v26  ;;  %v38_v38 = vld [vmem:[%s4253_s2 + $0x40] sm:$0xff] }
   0xa   :  { %2734 = vmatmul.mubr.msk.f32.vlgmr.msra.gmra.mrb[0].mxu1 %vm95_vm0, %v94_v13  ;;  %2798 = vmatpush1.bf16.msra.mxu0 %v3574_v9  ;;  %v45_v33 = vld [vmem:[%s4253_s2 + $0x78] sm:$0xff]  ;;  %v3711_v37 = vpack.c.bf16 %v43_v30, %v39_v29  ;;  %v42_v39 = vld [vmem:[%s4253_s2 + $0x60] sm:$0xff]  ;;  %v40_v40 = vld [vmem:[%s4253_s2 + $0x50] sm:$0xff] }
   0xb   :  { %2802 = vmatpush1.bf16.msra.mxu1 %v3583_v12  ;;  %314 = vmatprep.mubr.f32.mxu0 %v3524_v3  ;;  %v2753_v34 = vld [vmem:[%s4252_s0 + $0x38] sm:$0xff]  ;;  %v3724_v41 = vpack.c.bf16 %v45_v33, %v41_v32  ;;  %v44_v42 = vld [vmem:[%s4253_s2 + $0x70] sm:$0xff]  ;;  %v47_v43 = vld [vmem:[%s4253_s2 + $0x88] sm:$0xff]  ;;  %v3745_v47 = vpack.c.bf16 %v42_v39, %v38_v38 }
   0xc   :  { %385 = vmatprep.mubr.f32.mxu1 %v3524_v3  ;;  %2804 = vmatprep.subr.bf16.mxu0 %v3561_v4  ;;  %v51_v44 = vld [vmem:[%s4253_s2 + $0xa8] sm:$0xff]  ;;  %v49_v45 = vld [vmem:[%s4253_s2 + $0x98] sm:$0xff]  ;;  %v3749_v48 = vpack.c.bf16 %v44_v42, %v40_v40  ;;  %v46_v50 = vld [vmem:[%s4253_s2 + $0x80] sm:$0xff] }
   0xd   :  { %2808 = vmatprep.subr.bf16.mxu1 %v3572_v8  ;;  %2736 = vmatmul.mubr.msk.f32.vlgmr.msra.gmra.mrb[2].mxu0 %vm95_vm0, %v2735_v14  ;;  %v53_v46 = vld [vmem:[%s4253_s2 + $0xb8] sm:$0xff]  ;;  %v3751_v49 = vpack.c.bf16 %v51_v44, %v47_v43  ;;  %v50_v51 = vld [vmem:[%s4253_s2 + $0xa0] sm:$0xff]  ;;  %v48_v52 = vld [vmem:[%s4253_s2 + $0x90] sm:$0xff] }
   0xe   :  { %2737 = vmatmul.mubr.msk.f32.vlgmr.msra.gmra.mrb[2].mxu1 %vm95_vm0, %v2735_v14  ;;  %2806 = vmatpush1.bf16.msra.mxu0 %v3574_v9  ;;  %v3763_v53 = vpack.c.bf16 %v53_v46, %v49_v45  ;;  %v52_v54 = vld [vmem:[%s4253_s2 + $0xb0] sm:$0xff]  ;;  %v55_v55 = vld [vmem:[%s4253_s2 + $0xc8] sm:$0xff]  ;;  %v57_v57 = vld [vmem:[%s4253_s2 + $0xd8] sm:$0xff]  ;;  %v3783_v59 = vpack.c.bf16 %v50_v51, %v46_v50 }
   0xf   :  { %2810 = vmatpush1.bf16.msra.mxu1 %v3583_v12  ;;  %466 = vmatprep.mubr.f32.mxu0 %v3524_v3  ;;  %v59_v56 = vld [vmem:[%s4253_s2 + $0xe8] sm:$0xff]  ;;  %v61_v58 = vld [vmem:[%s4253_s2 + $0xf8] sm:$0xff]  ;;  %v3787_v60 = vpack.c.bf16 %v52_v54, %v48_v52  ;;  %v54_v62 = vld [vmem:[%s4253_s2 + $0xc0] sm:$0xff] }
  0x10   :  { %537 = vmatprep.mubr.f32.mxu1 %v3524_v3  ;;  %2812 = vmatprep.subr.bf16.mxu0 %v3561_v4  ;;  %v3789_v61 = vpack.c.bf16 %v59_v56, %v55_v55  ;;  %v58_v63 = vld [vmem:[%s4253_s2 + $0xe0] sm:$0xff]  ;;  %v56_v0 = vld [vmem:[%s4253_s2 + $0xd0] sm:$0xff]  ;;  %v3801_v1 = vpack.c.bf16 %v61_v58, %v57_v57  ;;  %v67_v5 = vld [vmem:[%s4253_s2 + $0x128] sm:$0xff] }
  0x11   :  { %2816 = vmatprep.subr.bf16.mxu1 %v3572_v8  ;;  %2739 = vmatmul.mubr.msk.f32.vlgmr.msra.gmra.mrb[4].mxu0 %vm95_vm0, %v2738_v15  ;;  %v60_v2 = vld [vmem:[%s4253_s2 + $0xf0] sm:$0xff]  ;;  %v65_v6 = vld [vmem:[%s4253_s2 + $0x118] sm:$0xff]  ;;  %v62_v11 = vld [vmem:[%s4253_s2 + $0x100] sm:$0xff] }
  0x12   :  { %2740 = vmatmul.mubr.msk.f32.vlgmr.msra.gmra.mrb[4].mxu1 %vm95_vm0, %v2738_v15  ;;  %2814 = vmatpush1.bf16.msra.mxu0 %v3574_v9  ;;  %v69_v7 = vld [vmem:[%s4253_s2 + $0x138] sm:$0xff]  ;;  %v64_v13 = vld [vmem:[%s4253_s2 + $0x110] sm:$0xff]  ;;  %v70_v23 = vld [vmem:[%s4253_s2 + $0x140] sm:$0xff] }
  0x13   :  { %2818 = vmatpush1.bf16.msra.mxu1 %v3583_v12  ;;  %618 = vmatprep.mubr.f32.mxu0 %v3524_v3  ;;  %v3837_v14 = vpack.c.bf16 %v69_v7, %v65_v6  ;;  %v68_v15 = vld [vmem:[%s4253_s2 + $0x130] sm:$0xff]  ;;  %v77_v19 = vld [vmem:[%s4253_s2 + $0x178] sm:$0xff]  ;;  %v74_v24 = vld [vmem:[%s4253_s2 + $0x160] sm:$0xff] }
  0x14   :  { %689 = vmatprep.mubr.f32.mxu1 %v3524_v3  ;;  %2820 = vmatprep.subr.bf16.mxu0 %v3561_v4  ;;  %v72_v25 = vld [vmem:[%s4253_s2 + $0x150] sm:$0xff]  ;;  %v79_v29 = vld [vmem:[%s4253_s2 + $0x188] sm:$0xff]  ;;  %v81_v32 = vld [vmem:[%s4253_s2 + $0x198] sm:$0xff] }
  0x15   :  { %2824 = vmatprep.subr.bf16.mxu1 %v3572_v8  ;;  %2742 = vmatmul.mubr.msk.f32.vlgmr.msra.gmra.mrb[6].mxu0 %vm95_vm0, %v2741_v16  ;;  %v76_v28 = vld [vmem:[%s4253_s2 + $0x170] sm:$0xff]  ;;  %v83_v30 = vld [vmem:[%s4253_s2 + $0x1a8] sm:$0xff]  ;;  %v85_v33 = vld [vmem:[%s4253_s2 + $0x1b8] sm:$0xff] }
  0x16   :  { %2743 = vmatmul.mubr.msk.f32.vlgmr.msra.gmra.mrb[6].mxu1 %vm95_vm0, %v2741_v16  ;;  %2822 = vmatpush1.bf16.msra.mxu0 %v3574_v9  ;;  %v71_v16 = vld [vmem:[%s4253_s2 + $0x148] sm:$0xff]  ;;  %v3895_v38 = vpack.c.bf16 %v76_v28, %v72_v25  ;;  %v3897_v39 = vpack.c.bf16 %v83_v30, %v79_v29  ;;  %v78_v40 = vld [vmem:[%s4253_s2 + $0x180] sm:$0xff]  ;;  %v80_v43 = vld [vmem:[%s4253_s2 + $0x190] sm:$0xff]  ;;  %v3909_v44 = vpack.c.bf16 %v85_v33, %v81_v32 }
  0x17   :  { %2826 = vmatpush1.bf16.msra.mxu1 %v3583_v12  ;;  %770 = vmatprep.mubr.f32.mxu0 %v3524_v3  ;;  %v82_v42 = vld [vmem:[%s4253_s2 + $0x1a0] sm:$0xff]  ;;  %v84_v45 = vld [vmem:[%s4253_s2 + $0x1b0] sm:$0xff]  ;;  %v87_v46 = vld [vmem:[%s4253_s2 + $0x1c8] sm:$0xff] }
  0x18   :  { %841 = vmatprep.mubr.f32.mxu1 %v3524_v3  ;;  %2828 = vmatprep.subr.bf16.mxu0 %v3561_v4  ;;  %v91_v50 = vld [vmem:[%s4253_s2 + $0x1e8] sm:$0xff]  ;;  %v89_v51 = vld [vmem:[%s4253_s2 + $0x1d8] sm:$0xff]  ;;  %v3927_v54 = vpack.c.bf16 %v82_v42, %v78_v40  ;;  %v3931_v55 = vpack.c.bf16 %v84_v45, %v80_v43  ;;  %v86_v57 = vld [vmem:[%s4253_s2 + $0x1c0] sm:$0xff] }
  0x19   :  { %2832 = vmatprep.subr.bf16.mxu1 %v3572_v8  ;;  %2745 = vmatmul.mubr.msk.f32.vlgmr.msra.gmra.mrb[8].mxu0 %vm95_vm0, %v2744_v17  ;;  %v93_v52 = vld [vmem:[%s4253_s2 + $0x1f8] sm:$0xff]  ;;  %v3933_v56 = vpack.c.bf16 %v91_v50, %v87_v46  ;;  %v90_v58 = vld [vmem:[%s4253_s2 + $0x1e0] sm:$0xff] }
  0x1a   :  { %2746 = vmatmul.mubr.msk.f32.vlgmr.msra.gmra.mrb[8].mxu1 %vm95_vm0, %v2744_v17  ;;  %2830 = vmatpush1.bf16.msra.mxu0 %v3574_v9  ;;  %v75_v17 = vld [vmem:[%s4253_s2 + $0x168] sm:$0xff] }
  0x1b   :  { %2834 = vmatpush1.bf16.msra.mxu1 %v3583_v12  ;;  %922 = vmatprep.mubr.f32.mxu0 %v3524_v3  ;;  %v3861_v22 = vpack.c.bf16 %v75_v17, %v71_v16 }
  0x1c   :  { %993 = vmatprep.mubr.f32.mxu1 %v3524_v3  ;;  %2836 = vmatprep.subr.bf16.mxu0 %v3561_v4 }
  0x1d   :  { %2840 = vmatprep.subr.bf16.mxu1 %v3572_v8  ;;  %2748 = vmatmul.mubr.msk.f32.vlgmr.msra.gmra.mrb[10].mxu0 %vm95_vm0, %v2747_v18 }
  0x1e   :  { %2749 = vmatmul.mubr.msk.f32.vlgmr.msra.gmra.mrb[10].mxu1 %vm95_vm0, %v2747_v18  ;;  %2838 = vmatpush1.bf16.msra.mxu0 %v3574_v9  ;;  %v73_v18 = vld [vmem:[%s4253_s2 + $0x158] sm:$0xff] }
  0x1f   :  { %2842 = vmatpush1.bf16.msra.mxu1 %v3583_v12  ;;  %1074 = vmatprep.mubr.f32.mxu0 %v3524_v3  ;;  %v3873_v26 = vpack.c.bf16 %v77_v19, %v73_v18 }
  0x20   :  { %1145 = vmatprep.mubr.f32.mxu1 %v3524_v3  ;;  %2844 = vmatprep.subr.bf16.mxu0 %v3561_v4  ;;  %v63_v4 = vld [vmem:[%s4253_s2 + $0x108] sm:$0xff] }
  0x21   :  { %2848 = vmatprep.subr.bf16.mxu1 %v3572_v8  ;;  %2751 = vmatmul.mubr.msk.f32.vlgmr.msra.gmra.mrb[12].mxu0 %vm95_vm0, %v2750_v21  ;;  %v3819_v8 = vpack.c.bf16 %v58_v63, %v54_v62  ;;  %v3825_v10 = vpack.c.bf16 %v67_v5, %v63_v4  ;;  %v3942_v62 = vpack.c.bf16 %v93_v52, %v89_v51  ;;  %v88_v63 = vld [vmem:[%s4253_s2 + $0x1d0] sm:$0xff] }
  0x22   :  { %2752 = vmatmul.mubr.msk.f32.vlgmr.msra.gmra.mrb[12].mxu1 %vm95_vm0, %v2750_v21  ;;  %2846 = vmatpush1.bf16.msra.mxu0 %v3574_v9  ;;  %v3823_v9 = vpack.c.bf16 %v60_v2, %v56_v0  ;;  %v3859_v21 = vpack.c.bf16 %v68_v15, %v64_v13  ;;  %v92_v0 = vld [vmem:[%s4253_s2 + $0x1f0] sm:$0xff]  ;;  %v3951_v2 = vpack.c.bf16 %v90_v58, %v86_v57 }
  0x23   :  { %2850 = vmatpush1.bf16.msra.mxu1 %v3583_v12  ;;  %1226 = vmatprep.mubr.f32.mxu0 %v3524_v3  ;;  %v66_v12 = vld [vmem:[%s4253_s2 + $0x120] sm:$0xff]  ;;  %v3955_v4 = vpack.c.bf16 %v92_v0, %v88_v63 }
  0x24   :  { %1297 = vmatprep.mubr.f32.mxu1 %v3524_v3  ;;  %2852 = vmatprep.subr.bf16.mxu0 %v3679_v27  ;;  %v3855_v20 = vpack.c.bf16 %v66_v12, %v62_v11 }
  0x25   :  { %2884 = vmatprep.subr.bf16.mxu1 %v3692_v31  ;;  %2754 = vmatmul.mubr.msk.f32.vlgmr.msra.gmra.mrb[14].mxu0 %vm95_vm0, %v2753_v34 }
  0x26   :  { %2755 = vmatmul.mubr.msk.f32.vlgmr.msra.gmra.mrb[14].mxu1 %vm95_vm0, %v2753_v34  ;;  %2854 = vmatpush1.bf16.msra.mxu0 %v3705_v35  ;;  %v3891_v34 = vpack.c.bf16 %v74_v24, %v70_v23 }
  0x27   :  { %2886 = vmatpush1.bf16.msra.mxu1 %v3709_v36  ;;  %2856 = vmatprep.subr.bf16.mxu0 %v3711_v37 }
  0x28   :  { %2888 = vmatprep.subr.bf16.mxu1 %v3724_v41  ;;  %1379 = vmatprep.mubr.f32.mxu0 %v3524_v3 }
  0x29   :  { %1450 = vmatprep.mubr.f32.mxu1 %v3524_v3 }
  0x2a   :  { %2858 = vmatpush1.bf16.msra.mxu0 %v3745_v47 }
  0x2b   :  { %2890 = vmatpush1.bf16.msra.mxu1 %v3749_v48  ;;  %2860 = vmatprep.subr.bf16.mxu0 %v3751_v49 }
  0x2c   :  { %2892 = vmatprep.subr.bf16.mxu1 %v3763_v53 }
  0x2e   :  { %2862 = vmatpush1.bf16.msra.mxu0 %v3783_v59 }
  0x2f   :  { %2894 = vmatpush1.bf16.msra.mxu1 %v3787_v60  ;;  %2864 = vmatprep.subr.bf16.mxu0 %v3789_v61 }
  0x30   :  { %2896 = vmatprep.subr.bf16.mxu1 %v3801_v1 }
  0x32   :  { %2866 = vmatpush1.bf16.msra.mxu0 %v3819_v8 }
  0x33   :  { %2898 = vmatpush1.bf16.msra.mxu1 %v3823_v9  ;;  %2868 = vmatprep.subr.bf16.mxu0 %v3825_v10 }
  0x34   :  { %2900 = vmatprep.subr.bf16.mxu1 %v3837_v14 }
  0x36   :  { %2870 = vmatpush1.bf16.msra.mxu0 %v3855_v20 }
  0x37   :  { %2902 = vmatpush1.bf16.msra.mxu1 %v3859_v21  ;;  %2872 = vmatprep.subr.bf16.mxu0 %v3861_v22 }
  0x38   :  { %2904 = vmatprep.subr.bf16.mxu1 %v3873_v26 }
  0x3a   :  { %2874 = vmatpush1.bf16.msra.mxu0 %v3891_v34 }
  0x3b   :  { %2906 = vmatpush1.bf16.msra.mxu1 %v3895_v38  ;;  %2876 = vmatprep.subr.bf16.mxu0 %v3897_v39 }
  0x3c   :  { %2908 = vmatprep.subr.bf16.mxu1 %v3909_v44 }
  0x3e   :  { %2878 = vmatpush1.bf16.msra.mxu0 %v3927_v54 }
  0x3f   :  { %2910 = vmatpush1.bf16.msra.mxu1 %v3931_v55  ;;  %2880 = vmatprep.subr.bf16.mxu0 %v3933_v56 }
  0x40   :  { %2912 = vmatprep.subr.bf16.mxu1 %v3942_v62 }
  0x42   :  { %2882 = vmatpush1.bf16.msra.mxu0 %v3951_v2 }
  0x43   :  { %2914 = vmatpush1.bf16.msra.mxu1 %v3955_v4  ;;  %2916 = vmatprep.subr.bf16.mxu0 %v3679_v27 }
  0x44   :  { %2948 = vmatprep.subr.bf16.mxu1 %v3692_v31 }
  0x45   :  { %1380 = vmatmul.mubr.f32.vlgmr.msra.gmra.mrb[0].mxu0 %v3524_v3 }
  0x46   :  { %1451 = vmatmul.mubr.f32.vlgmr.msra.gmra.mrb[0].mxu1 %v3524_v3  ;;  %2918 = vmatpush1.bf16.msra.mxu0 %v3705_v35 }
  0x47   :  { %2950 = vmatpush1.bf16.msra.mxu1 %v3709_v36  ;;  %2920 = vmatprep.subr.bf16.mxu0 %v3711_v37 }
  0x48   :  { %2952 = vmatprep.subr.bf16.mxu1 %v3724_v41  ;;  %1554 = vmatprep.mubr.f32.mxu0 %v3524_v3 }
  0x49   :  { %1625 = vmatprep.mubr.f32.mxu1 %v3524_v3 }
  0x4a   :  { %2922 = vmatpush1.bf16.msra.mxu0 %v3745_v47 }
  0x4b   :  { %2954 = vmatpush1.bf16.msra.mxu1 %v3749_v48  ;;  %2924 = vmatprep.subr.bf16.mxu0 %v3751_v49 }
  0x4c   :  { %2956 = vmatprep.subr.bf16.mxu1 %v3763_v53 }
  0x4e   :  { %2926 = vmatpush1.bf16.msra.mxu0 %v3783_v59 }
  0x4f   :  { %2958 = vmatpush1.bf16.msra.mxu1 %v3787_v60  ;;  %2928 = vmatprep.subr.bf16.mxu0 %v3789_v61 }
  0x50   :  { %2960 = vmatprep.subr.bf16.mxu1 %v3801_v1 }
  0x52   :  { %2930 = vmatpush1.bf16.msra.mxu0 %v3819_v8 }
  0x53   :  { %2962 = vmatpush1.bf16.msra.mxu1 %v3823_v9  ;;  %2932 = vmatprep.subr.bf16.mxu0 %v3825_v10 }
  0x54   :  { %2964 = vmatprep.subr.bf16.mxu1 %v3837_v14 }
  0x56   :  { %2934 = vmatpush1.bf16.msra.mxu0 %v3855_v20 }
  0x57   :  { %2966 = vmatpush1.bf16.msra.mxu1 %v3859_v21  ;;  %2936 = vmatprep.subr.bf16.mxu0 %v3861_v22 }
  0x58   :  { %2968 = vmatprep.subr.bf16.mxu1 %v3873_v26 }
  0x5a   :  { %2938 = vmatpush1.bf16.msra.mxu0 %v3891_v34 }
  0x5b   :  { %2970 = vmatpush1.bf16.msra.mxu1 %v3895_v38  ;;  %2940 = vmatprep.subr.bf16.mxu0 %v3897_v39 }
  0x5c   :  { %2972 = vmatprep.subr.bf16.mxu1 %v3909_v44 }
  0x5e   :  { %2942 = vmatpush1.bf16.msra.mxu0 %v3927_v54 }
  0x5f   :  { %2974 = vmatpush1.bf16.msra.mxu1 %v3931_v55  ;;  %2944 = vmatprep.subr.bf16.mxu0 %v3933_v56 }
  0x60   :  { %2976 = vmatprep.subr.bf16.mxu1 %v3942_v62 }
  0x62   :  { %2946 = vmatpush1.bf16.msra.mxu0 %v3951_v2 }
  0x63   :  { %2978 = vmatpush1.bf16.msra.mxu1 %v3955_v4  ;;  %2980 = vmatprep.subr.bf16.mxu0 %v3679_v27 }
  0x64   :  { %3012 = vmatprep.subr.bf16.mxu1 %v3692_v31 }
 0x118   :  { %v1381_v5 = vpop.f32.mrb[0].mxu0 }
 0x119   :  { %v2756_v6 = vmul.f32 -1.442695, %v1381_v5  ;;  %v1452_v7 = vpop.f32.mrb[0].mxu1  ;;  %v1383_v11 = vpop.f32.mrb[1].mxu0 }
 0x11a   :  { %v2757_v12 = vmul.f32 -1.442695, %v1383_v11  ;;  %v1454_v13 = vpop.f32.mrb[1].mxu1 }
 0x11b   :  { %3396 = vpow2.f32 %v2756_v6  ;;  %v2758_v15 = vmul.f32 -1.442695, %v1454_v13 }
 0x11c   :  { %3398 = vpow2.f32 %v2757_v12 }
 0x11d   :  { %3400 = vpow2.f32 %v2758_v15 }
 0x11e   :  { %3402 = vtanh.f32 %v1452_v7 }
 0x125   :  { %v3397_v16 = vpop.eup %3396 }
 0x126   :  { %v3399_v17 = vpop.eup %3398  ;;  %v1464_v18 = vadd.f32 1.0, %v3397_v16 }
 0x127   :  { %v1470_v19 = vadd.f32 1.0, %v3399_v17  ;;  %v3401_v23 = vpop.eup %3400 }
 0x128   :  { %3404 = vrcp.f32 %v1464_v18  ;;  %v3403_v24 = vpop.eup %3402  ;;  %v1477_v30 = vadd.f32 1.0, %v3401_v23 }
 0x129   :  { %3406 = vrcp.f32 %v1470_v19 }
 0x12a   :  { %3408 = vrcp.f32 %v1477_v30 }
 0x132   :  { %v3405_v25 = vpop.eup %3404 }
 0x133   :  { %v3407_v28 = vpop.eup %3406  ;;  %v1481_v29 = vmul.f32 %v3405_v25, %v3403_v24 }
 0x134   :  { %v1480_v32 = vmul.f32 0.0, %v3407_v28  ;;  %v3409_v40 = vpop.eup %3408 }
 0x136   :  { %v3998_v33 = vadd.f32 %v1481_v29, %v1480_v32 }
 0x138   :  { %3410 = vtanh.f32 %v3998_v33 }
 0x142   :  { %v3411_v42 = vpop.eup %3410 }
 0x143   :  { %v1484_v43 = vmul.f32 %v3411_v42, %v3409_v40 }
 0x145   :  { %1485 = vst [vmem:[%s4254_s3] sm:$0xff] %v1484_v43  ;;  %1555 = vmatmul.mubr.f32.vlgmr.msra.gmra.mrb[2].mxu0 %v1484_v43  ;;  %1626 = vmatmul.mubr.f32.vlgmr.msra.gmra.mrb[2].mxu1 %v1484_v43 }
 0x146   :  { %2982 = vmatpush1.bf16.msra.mxu0 %v3705_v35  ;;  %3014 = vmatpush1.bf16.msra.mxu1 %v3709_v36 }
 0x147   :  { %2984 = vmatprep.subr.bf16.mxu0 %v3711_v37  ;;  %3016 = vmatprep.subr.bf16.mxu1 %v3724_v41 }
 0x148   :  { %1730 = vmatprep.mubr.f32.mxu0 %v3524_v3  ;;  %1801 = vmatprep.mubr.f32.mxu1 %v3524_v3 }
 0x14a   :  { %2986 = vmatpush1.bf16.msra.mxu0 %v3745_v47  ;;  %3018 = vmatpush1.bf16.msra.mxu1 %v3749_v48 }
 0x14b   :  { %2988 = vmatprep.subr.bf16.mxu0 %v3751_v49  ;;  %3020 = vmatprep.subr.bf16.mxu1 %v3763_v53 }
 0x14e   :  { %2990 = vmatpush1.bf16.msra.mxu0 %v3783_v59  ;;  %3022 = vmatpush1.bf16.msra.mxu1 %v3787_v60 }
 0x14f   :  { %2992 = vmatprep.subr.bf16.mxu0 %v3789_v61  ;;  %3024 = vmatprep.subr.bf16.mxu1 %v3801_v1 }
 0x152   :  { %2994 = vmatpush1.bf16.msra.mxu0 %v3819_v8  ;;  %3026 = vmatpush1.bf16.msra.mxu1 %v3823_v9 }
 0x153   :  { %2996 = vmatprep.subr.bf16.mxu0 %v3825_v10  ;;  %3028 = vmatprep.subr.bf16.mxu1 %v3837_v14 }
 0x156   :  { %2998 = vmatpush1.bf16.msra.mxu0 %v3855_v20  ;;  %3030 = vmatpush1.bf16.msra.mxu1 %v3859_v21 }
 0x157   :  { %3000 = vmatprep.subr.bf16.mxu0 %v3861_v22  ;;  %3032 = vmatprep.subr.bf16.mxu1 %v3873_v26 }
 0x15a   :  { %3002 = vmatpush1.bf16.msra.mxu0 %v3891_v34  ;;  %3034 = vmatpush1.bf16.msra.mxu1 %v3895_v38 }
 0x15b   :  { %3004 = vmatprep.subr.bf16.mxu0 %v3897_v39  ;;  %3036 = vmatprep.subr.bf16.mxu1 %v3909_v44 }
 0x15e   :  { %3006 = vmatpush1.bf16.msra.mxu0 %v3927_v54  ;;  %3038 = vmatpush1.bf16.msra.mxu1 %v3931_v55 }
 0x15f   :  { %3008 = vmatprep.subr.bf16.mxu0 %v3933_v56  ;;  %3040 = vmatprep.subr.bf16.mxu1 %v3942_v62 }
 0x162   :  { %3010 = vmatpush1.bf16.msra.mxu0 %v3951_v2  ;;  %3042 = vmatpush1.bf16.msra.mxu1 %v3955_v4 }
 0x163   :  { %3044 = vmatprep.subr.bf16.mxu0 %v3679_v27  ;;  %3076 = vmatprep.subr.bf16.mxu1 %v3692_v31 }
 0x218   :  { %v1556_v45 = vpop.f32.mrb[2].mxu0  ;;  %v1627_v46 = vpop.f32.mrb[2].mxu1 }
 0x219   :  { %v2759_v50 = vmul.f32 -1.442695, %v1556_v45  ;;  %v1558_v51 = vpop.f32.mrb[3].mxu0  ;;  %v1629_v52 = vpop.f32.mrb[3].mxu1 }
 0x21a   :  { %v2760_v57 = vmul.f32 -1.442695, %v1558_v51  ;;  %v2761_v58 = vmul.f32 -1.442695, %v1629_v52 }
 0x21b   :  { %3412 = vpow2.f32 %v2759_v50 }
 0x21c   :  { %3414 = vpow2.f32 %v2760_v57 }
 0x21d   :  { %3416 = vpow2.f32 %v2761_v58 }
 0x21e   :  { %3418 = vtanh.f32 %v1627_v46 }
 0x225   :  { %v3413_v63 = vpop.eup %3412 }
 0x226   :  { %v3415_v0 = vpop.eup %3414  ;;  %v1639_v5 = vadd.f32 1.0, %v3413_v63 }
 0x227   :  { %v1645_v6 = vadd.f32 1.0, %v3415_v0  ;;  %v3417_v7 = vpop.eup %3416 }
 0x228   :  { %3420 = vrcp.f32 %v1639_v5  ;;  %v3419_v11 = vpop.eup %3418  ;;  %v1652_v16 = vadd.f32 1.0, %v3417_v7 }
 0x229   :  { %3422 = vrcp.f32 %v1645_v6 }
 0x22a   :  { %3424 = vrcp.f32 %v1652_v16 }
 0x232   :  { %v3421_v12 = vpop.eup %3420 }
 0x233   :  { %v3423_v13 = vpop.eup %3422  ;;  %v1656_v15 = vmul.f32 %v3421_v12, %v3419_v11 }
 0x234   :  { %v1655_v17 = vmul.f32 %v3423_v13, %v3998_v33  ;;  %v3425_v19 = vpop.eup %3424 }
 0x236   :  { %v4039_v18 = vadd.f32 %v1656_v15, %v1655_v17 }
 0x238   :  { %3426 = vtanh.f32 %v4039_v18 }
 0x242   :  { %v3427_v23 = vpop.eup %3426 }
 0x243   :  { %v1659_v24 = vmul.f32 %v3427_v23, %v3425_v19 }
 0x245   :  { %2762 = vst [vmem:[%s4254_s3 + $0x8] sm:$0xff] %v1659_v24  ;;  %1731 = vmatmul.mubr.f32.vlgmr.msra.gmra.mrb[4].mxu0 %v1659_v24  ;;  %1802 = vmatmul.mubr.f32.vlgmr.msra.gmra.mrb[4].mxu1 %v1659_v24 }
 0x246   :  { %3046 = vmatpush1.bf16.msra.mxu0 %v3705_v35  ;;  %3078 = vmatpush1.bf16.msra.mxu1 %v3709_v36 }
 0x247   :  { %3048 = vmatprep.subr.bf16.mxu0 %v3711_v37  ;;  %3080 = vmatprep.subr.bf16.mxu1 %v3724_v41 }
 0x248   :  { %1906 = vmatprep.mubr.f32.mxu0 %v3524_v3  ;;  %1977 = vmatprep.mubr.f32.mxu1 %v3524_v3 }
 0x24a   :  { %3050 = vmatpush1.bf16.msra.mxu0 %v3745_v47  ;;  %3082 = vmatpush1.bf16.msra.mxu1 %v3749_v48 }
 0x24b   :  { %3052 = vmatprep.subr.bf16.mxu0 %v3751_v49  ;;  %3084 = vmatprep.subr.bf16.mxu1 %v3763_v53 }
 0x24e   :  { %3054 = vmatpush1.bf16.msra.mxu0 %v3783_v59  ;;  %3086 = vmatpush1.bf16.msra.mxu1 %v3787_v60 }
 0x24f   :  { %3056 = vmatprep.subr.bf16.mxu0 %v3789_v61  ;;  %3088 = vmatprep.subr.bf16.mxu1 %v3801_v1 }
 0x252   :  { %3058 = vmatpush1.bf16.msra.mxu0 %v3819_v8  ;;  %3090 = vmatpush1.bf16.msra.mxu1 %v3823_v9 }
 0x253   :  { %3060 = vmatprep.subr.bf16.mxu0 %v3825_v10  ;;  %3092 = vmatprep.subr.bf16.mxu1 %v3837_v14 }
 0x256   :  { %3062 = vmatpush1.bf16.msra.mxu0 %v3855_v20  ;;  %3094 = vmatpush1.bf16.msra.mxu1 %v3859_v21 }
 0x257   :  { %3064 = vmatprep.subr.bf16.mxu0 %v3861_v22  ;;  %3096 = vmatprep.subr.bf16.mxu1 %v3873_v26 }
 0x25a   :  { %3066 = vmatpush1.bf16.msra.mxu0 %v3891_v34  ;;  %3098 = vmatpush1.bf16.msra.mxu1 %v3895_v38 }
 0x25b   :  { %3068 = vmatprep.subr.bf16.mxu0 %v3897_v39  ;;  %3100 = vmatprep.subr.bf16.mxu1 %v3909_v44 }
 0x25e   :  { %3070 = vmatpush1.bf16.msra.mxu0 %v3927_v54  ;;  %3102 = vmatpush1.bf16.msra.mxu1 %v3931_v55 }
 0x25f   :  { %3072 = vmatprep.subr.bf16.mxu0 %v3933_v56  ;;  %3104 = vmatprep.subr.bf16.mxu1 %v3942_v62 }
 0x262   :  { %3074 = vmatpush1.bf16.msra.mxu0 %v3951_v2  ;;  %3106 = vmatpush1.bf16.msra.mxu1 %v3955_v4 }
 0x263   :  { %3108 = vmatprep.subr.bf16.mxu0 %v3679_v27  ;;  %3140 = vmatprep.subr.bf16.mxu1 %v3692_v31 }
 0x318   :  { %v1732_v25 = vpop.f32.mrb[4].mxu0  ;;  %v1803_v28 = vpop.f32.mrb[4].mxu1 }
 0x319   :  { %v2763_v29 = vmul.f32 -1.442695, %v1732_v25  ;;  %v1734_v30 = vpop.f32.mrb[5].mxu0  ;;  %v1805_v32 = vpop.f32.mrb[5].mxu1 }
 0x31a   :  { %v2764_v33 = vmul.f32 -1.442695, %v1734_v30  ;;  %v2765_v40 = vmul.f32 -1.442695, %v1805_v32 }
 0x31b   :  { %3428 = vpow2.f32 %v2763_v29 }
 0x31c   :  { %3430 = vpow2.f32 %v2764_v33 }
 0x31d   :  { %3432 = vpow2.f32 %v2765_v40 }
 0x31e   :  { %3434 = vtanh.f32 %v1803_v28 }
 0x325   :  { %v3429_v42 = vpop.eup %3428 }
 0x326   :  { %v3431_v43 = vpop.eup %3430  ;;  %v1815_v45 = vadd.f32 1.0, %v3429_v42 }
 0x327   :  { %v1821_v46 = vadd.f32 1.0, %v3431_v43  ;;  %v3433_v50 = vpop.eup %3432 }
 0x328   :  { %3436 = vrcp.f32 %v1815_v45  ;;  %v3435_v51 = vpop.eup %3434  ;;  %v1828_v63 = vadd.f32 1.0, %v3433_v50 }
 0x329   :  { %3438 = vrcp.f32 %v1821_v46 }
 0x32a   :  { %3440 = vrcp.f32 %v1828_v63 }
 0x332   :  { %v3437_v52 = vpop.eup %3436 }
 0x333   :  { %v3439_v57 = vpop.eup %3438  ;;  %v1832_v58 = vmul.f32 %v3437_v52, %v3435_v51 }
 0x334   :  { %v1831_v0 = vmul.f32 %v3439_v57, %v4039_v18  ;;  %v3441_v6 = vpop.eup %3440 }
 0x336   :  { %v4080_v5 = vadd.f32 %v1832_v58, %v1831_v0 }
 0x338   :  { %3442 = vtanh.f32 %v4080_v5 }
 0x342   :  { %v3443_v7 = vpop.eup %3442 }
 0x343   :  { %v1835_v11 = vmul.f32 %v3443_v7, %v3441_v6 }
 0x345   :  { %2766 = vst [vmem:[%s4254_s3 + $0x10] sm:$0xff] %v1835_v11  ;;  %1907 = vmatmul.mubr.f32.vlgmr.msra.gmra.mrb[6].mxu0 %v1835_v11  ;;  %1978 = vmatmul.mubr.f32.vlgmr.msra.gmra.mrb[6].mxu1 %v1835_v11 }
 0x346   :  { %3110 = vmatpush1.bf16.msra.mxu0 %v3705_v35  ;;  %3142 = vmatpush1.bf16.msra.mxu1 %v3709_v36 }
 0x347   :  { %3112 = vmatprep.subr.bf16.mxu0 %v3711_v37  ;;  %3144 = vmatprep.subr.bf16.mxu1 %v3724_v41 }
 0x348   :  { %2082 = vmatprep.mubr.f32.mxu0 %v3524_v3  ;;  %2153 = vmatprep.mubr.f32.mxu1 %v3524_v3 }
 0x34a   :  { %3114 = vmatpush1.bf16.msra.mxu0 %v3745_v47  ;;  %3146 = vmatpush1.bf16.msra.mxu1 %v3749_v48 }
 0x34b   :  { %3116 = vmatprep.subr.bf16.mxu0 %v3751_v49  ;;  %3148 = vmatprep.subr.bf16.mxu1 %v3763_v53 }
 0x34e   :  { %3118 = vmatpush1.bf16.msra.mxu0 %v3783_v59  ;;  %3150 = vmatpush1.bf16.msra.mxu1 %v3787_v60 }
 0x34f   :  { %3120 = vmatprep.subr.bf16.mxu0 %v3789_v61  ;;  %3152 = vmatprep.subr.bf16.mxu1 %v3801_v1 }
 0x352   :  { %3122 = vmatpush1.bf16.msra.mxu0 %v3819_v8  ;;  %3154 = vmatpush1.bf16.msra.mxu1 %v3823_v9 }
 0x353   :  { %3124 = vmatprep.subr.bf16.mxu0 %v3825_v10  ;;  %3156 = vmatprep.subr.bf16.mxu1 %v3837_v14 }
 0x356   :  { %3126 = vmatpush1.bf16.msra.mxu0 %v3855_v20  ;;  %3158 = vmatpush1.bf16.msra.mxu1 %v3859_v21 }
 0x357   :  { %3128 = vmatprep.subr.bf16.mxu0 %v3861_v22  ;;  %3160 = vmatprep.subr.bf16.mxu1 %v3873_v26 }
 0x35a   :  { %3130 = vmatpush1.bf16.msra.mxu0 %v3891_v34  ;;  %3162 = vmatpush1.bf16.msra.mxu1 %v3895_v38 }
 0x35b   :  { %3132 = vmatprep.subr.bf16.mxu0 %v3897_v39  ;;  %3164 = vmatprep.subr.bf16.mxu1 %v3909_v44 }
 0x35e   :  { %3134 = vmatpush1.bf16.msra.mxu0 %v3927_v54  ;;  %3166 = vmatpush1.bf16.msra.mxu1 %v3931_v55 }
 0x35f   :  { %3136 = vmatprep.subr.bf16.mxu0 %v3933_v56  ;;  %3168 = vmatprep.subr.bf16.mxu1 %v3942_v62 }
 0x362   :  { %3138 = vmatpush1.bf16.msra.mxu0 %v3951_v2  ;;  %3170 = vmatpush1.bf16.msra.mxu1 %v3955_v4 }
 0x363   :  { %3172 = vmatprep.subr.bf16.mxu0 %v3679_v27  ;;  %3204 = vmatprep.subr.bf16.mxu1 %v3692_v31 }
 0x418   :  { %v1908_v12 = vpop.f32.mrb[6].mxu0  ;;  %v1979_v13 = vpop.f32.mrb[6].mxu1 }
 0x419   :  { %v2767_v15 = vmul.f32 -1.442695, %v1908_v12  ;;  %v1910_v16 = vpop.f32.mrb[7].mxu0  ;;  %v1981_v17 = vpop.f32.mrb[7].mxu1 }
 0x41a   :  { %v2768_v18 = vmul.f32 -1.442695, %v1910_v16  ;;  %v2769_v19 = vmul.f32 -1.442695, %v1981_v17 }
 0x41b   :  { %3444 = vpow2.f32 %v2767_v15 }
 0x41c   :  { %3446 = vpow2.f32 %v2768_v18 }
 0x41d   :  { %3448 = vpow2.f32 %v2769_v19 }
 0x41e   :  { %3450 = vtanh.f32 %v1979_v13 }
 0x425   :  { %v3445_v23 = vpop.eup %3444 }
 0x426   :  { %v3447_v24 = vpop.eup %3446  ;;  %v1991_v25 = vadd.f32 1.0, %v3445_v23 }
 0x427   :  { %v1997_v28 = vadd.f32 1.0, %v3447_v24  ;;  %v3449_v29 = vpop.eup %3448 }
 0x428   :  { %3452 = vrcp.f32 %v1991_v25  ;;  %v3451_v30 = vpop.eup %3450  ;;  %v2004_v42 = vadd.f32 1.0, %v3449_v29 }
 0x429   :  { %3454 = vrcp.f32 %v1997_v28 }
 0x42a   :  { %3456 = vrcp.f32 %v2004_v42 }
 0x432   :  { %v3453_v32 = vpop.eup %3452 }
 0x433   :  { %v3455_v33 = vpop.eup %3454  ;;  %v2008_v40 = vmul.f32 %v3453_v32, %v3451_v30 }
 0x434   :  { %v2007_v43 = vmul.f32 %v3455_v33, %v4080_v5  ;;  %v3457_v46 = vpop.eup %3456 }
 0x436   :  { %v4121_v45 = vadd.f32 %v2008_v40, %v2007_v43 }
 0x438   :  { %3458 = vtanh.f32 %v4121_v45 }
 0x442   :  { %v3459_v50 = vpop.eup %3458 }
 0x443   :  { %v2011_v51 = vmul.f32 %v3459_v50, %v3457_v46 }
 0x445   :  { %2770 = vst [vmem:[%s4254_s3 + $0x18] sm:$0xff] %v2011_v51  ;;  %2083 = vmatmul.mubr.f32.vlgmr.msra.gmra.mrb[8].mxu0 %v2011_v51  ;;  %2154 = vmatmul.mubr.f32.vlgmr.msra.gmra.mrb[8].mxu1 %v2011_v51 }
 0x446   :  { %3174 = vmatpush1.bf16.msra.mxu0 %v3705_v35  ;;  %3206 = vmatpush1.bf16.msra.mxu1 %v3709_v36 }
 0x447   :  { %3176 = vmatprep.subr.bf16.mxu0 %v3711_v37  ;;  %3208 = vmatprep.subr.bf16.mxu1 %v3724_v41 }
 0x448   :  { %2258 = vmatprep.mubr.f32.mxu0 %v3524_v3  ;;  %2329 = vmatprep.mubr.f32.mxu1 %v3524_v3 }
 0x44a   :  { %3178 = vmatpush1.bf16.msra.mxu0 %v3745_v47  ;;  %3210 = vmatpush1.bf16.msra.mxu1 %v3749_v48 }
 0x44b   :  { %3180 = vmatprep.subr.bf16.mxu0 %v3751_v49  ;;  %3212 = vmatprep.subr.bf16.mxu1 %v3763_v53 }
 0x44e   :  { %3182 = vmatpush1.bf16.msra.mxu0 %v3783_v59  ;;  %3214 = vmatpush1.bf16.msra.mxu1 %v3787_v60 }
 0x44f   :  { %3184 = vmatprep.subr.bf16.mxu0 %v3789_v61  ;;  %3216 = vmatprep.subr.bf16.mxu1 %v3801_v1 }
 0x452   :  { %3186 = vmatpush1.bf16.msra.mxu0 %v3819_v8  ;;  %3218 = vmatpush1.bf16.msra.mxu1 %v3823_v9 }
 0x453   :  { %3188 = vmatprep.subr.bf16.mxu0 %v3825_v10  ;;  %3220 = vmatprep.subr.bf16.mxu1 %v3837_v14 }
 0x456   :  { %3190 = vmatpush1.bf16.msra.mxu0 %v3855_v20  ;;  %3222 = vmatpush1.bf16.msra.mxu1 %v3859_v21 }
 0x457   :  { %3192 = vmatprep.subr.bf16.mxu0 %v3861_v22  ;;  %3224 = vmatprep.subr.bf16.mxu1 %v3873_v26 }
 0x45a   :  { %3194 = vmatpush1.bf16.msra.mxu0 %v3891_v34  ;;  %3226 = vmatpush1.bf16.msra.mxu1 %v3895_v38 }
 0x45b   :  { %3196 = vmatprep.subr.bf16.mxu0 %v3897_v39  ;;  %3228 = vmatprep.subr.bf16.mxu1 %v3909_v44 }
 0x45e   :  { %3198 = vmatpush1.bf16.msra.mxu0 %v3927_v54  ;;  %3230 = vmatpush1.bf16.msra.mxu1 %v3931_v55 }
 0x45f   :  { %3200 = vmatprep.subr.bf16.mxu0 %v3933_v56  ;;  %3232 = vmatprep.subr.bf16.mxu1 %v3942_v62 }
 0x462   :  { %3202 = vmatpush1.bf16.msra.mxu0 %v3951_v2  ;;  %3234 = vmatpush1.bf16.msra.mxu1 %v3955_v4 }
 0x463   :  { %3236 = vmatprep.subr.bf16.mxu0 %v3679_v27  ;;  %3268 = vmatprep.subr.bf16.mxu1 %v3692_v31 }
 0x518   :  { %v2084_v52 = vpop.f32.mrb[8].mxu0  ;;  %v2155_v57 = vpop.f32.mrb[8].mxu1 }
 0x519   :  { %v2771_v58 = vmul.f32 -1.442695, %v2084_v52  ;;  %v2086_v63 = vpop.f32.mrb[9].mxu0  ;;  %v2157_v0 = vpop.f32.mrb[9].mxu1 }
 0x51a   :  { %v2772_v5 = vmul.f32 -1.442695, %v2086_v63  ;;  %v2773_v6 = vmul.f32 -1.442695, %v2157_v0 }
 0x51b   :  { %3460 = vpow2.f32 %v2771_v58 }
 0x51c   :  { %3462 = vpow2.f32 %v2772_v5 }
 0x51d   :  { %3464 = vpow2.f32 %v2773_v6 }
 0x51e   :  { %3466 = vtanh.f32 %v2155_v57 }
 0x525   :  { %v3461_v7 = vpop.eup %3460 }
 0x526   :  { %v3463_v11 = vpop.eup %3462  ;;  %v2167_v12 = vadd.f32 1.0, %v3461_v7 }
 0x527   :  { %v2173_v13 = vadd.f32 1.0, %v3463_v11  ;;  %v3465_v15 = vpop.eup %3464 }
 0x528   :  { %3468 = vrcp.f32 %v2167_v12  ;;  %v3467_v16 = vpop.eup %3466  ;;  %v2180_v23 = vadd.f32 1.0, %v3465_v15 }
 0x529   :  { %3470 = vrcp.f32 %v2173_v13 }
 0x52a   :  { %3472 = vrcp.f32 %v2180_v23 }
 0x532   :  { %v3469_v17 = vpop.eup %3468 }
 0x533   :  { %v3471_v18 = vpop.eup %3470  ;;  %v2184_v19 = vmul.f32 %v3469_v17, %v3467_v16 }
 0x534   :  { %v2183_v24 = vmul.f32 %v3471_v18, %v4121_v45  ;;  %v3473_v28 = vpop.eup %3472 }
 0x536   :  { %v4162_v25 = vadd.f32 %v2184_v19, %v2183_v24 }
 0x538   :  { %3474 = vtanh.f32 %v4162_v25 }
 0x542   :  { %v3475_v29 = vpop.eup %3474 }
 0x543   :  { %v2187_v30 = vmul.f32 %v3475_v29, %v3473_v28 }
 0x545   :  { %2774 = vst [vmem:[%s4254_s3 + $0x20] sm:$0xff] %v2187_v30  ;;  %2259 = vmatmul.mubr.f32.vlgmr.msra.gmra.mrb[10].mxu0 %v2187_v30  ;;  %2330 = vmatmul.mubr.f32.vlgmr.msra.gmra.mrb[10].mxu1 %v2187_v30 }
 0x546   :  { %3238 = vmatpush1.bf16.msra.mxu0 %v3705_v35  ;;  %3270 = vmatpush1.bf16.msra.mxu1 %v3709_v36 }
 0x547   :  { %3240 = vmatprep.subr.bf16.mxu0 %v3711_v37  ;;  %3272 = vmatprep.subr.bf16.mxu1 %v3724_v41 }
 0x548   :  { %2434 = vmatprep.mubr.f32.mxu0 %v3524_v3  ;;  %2505 = vmatprep.mubr.f32.mxu1 %v3524_v3 }
 0x54a   :  { %3242 = vmatpush1.bf16.msra.mxu0 %v3745_v47  ;;  %3274 = vmatpush1.bf16.msra.mxu1 %v3749_v48 }
 0x54b   :  { %3244 = vmatprep.subr.bf16.mxu0 %v3751_v49  ;;  %3276 = vmatprep.subr.bf16.mxu1 %v3763_v53 }
 0x54e   :  { %3246 = vmatpush1.bf16.msra.mxu0 %v3783_v59  ;;  %3278 = vmatpush1.bf16.msra.mxu1 %v3787_v60 }
 0x54f   :  { %3248 = vmatprep.subr.bf16.mxu0 %v3789_v61  ;;  %3280 = vmatprep.subr.bf16.mxu1 %v3801_v1 }
 0x552   :  { %3250 = vmatpush1.bf16.msra.mxu0 %v3819_v8  ;;  %3282 = vmatpush1.bf16.msra.mxu1 %v3823_v9 }
 0x553   :  { %3252 = vmatprep.subr.bf16.mxu0 %v3825_v10  ;;  %3284 = vmatprep.subr.bf16.mxu1 %v3837_v14 }
 0x556   :  { %3254 = vmatpush1.bf16.msra.mxu0 %v3855_v20  ;;  %3286 = vmatpush1.bf16.msra.mxu1 %v3859_v21 }
 0x557   :  { %3256 = vmatprep.subr.bf16.mxu0 %v3861_v22  ;;  %3288 = vmatprep.subr.bf16.mxu1 %v3873_v26 }
 0x55a   :  { %3258 = vmatpush1.bf16.msra.mxu0 %v3891_v34  ;;  %3290 = vmatpush1.bf16.msra.mxu1 %v3895_v38 }
 0x55b   :  { %3260 = vmatprep.subr.bf16.mxu0 %v3897_v39  ;;  %3292 = vmatprep.subr.bf16.mxu1 %v3909_v44 }
 0x55e   :  { %3262 = vmatpush1.bf16.msra.mxu0 %v3927_v54  ;;  %3294 = vmatpush1.bf16.msra.mxu1 %v3931_v55 }
 0x55f   :  { %3264 = vmatprep.subr.bf16.mxu0 %v3933_v56  ;;  %3296 = vmatprep.subr.bf16.mxu1 %v3942_v62 }
 0x562   :  { %3266 = vmatpush1.bf16.msra.mxu0 %v3951_v2  ;;  %3298 = vmatpush1.bf16.msra.mxu1 %v3955_v4 }
 0x563   :  { %3300 = vmatprep.subr.bf16.mxu0 %v3679_v27  ;;  %3332 = vmatprep.subr.bf16.mxu1 %v3692_v31 }
 0x618   :  { %v2260_v32 = vpop.f32.mrb[10].mxu0  ;;  %v2331_v33 = vpop.f32.mrb[10].mxu1 }
 0x619   :  { %v2775_v40 = vmul.f32 -1.442695, %v2260_v32  ;;  %v2262_v42 = vpop.f32.mrb[11].mxu0  ;;  %v2333_v43 = vpop.f32.mrb[11].mxu1 }
 0x61a   :  { %v2776_v45 = vmul.f32 -1.442695, %v2262_v42  ;;  %v2777_v46 = vmul.f32 -1.442695, %v2333_v43 }
 0x61b   :  { %3476 = vpow2.f32 %v2775_v40 }
 0x61c   :  { %3478 = vpow2.f32 %v2776_v45 }
 0x61d   :  { %3480 = vpow2.f32 %v2777_v46 }
 0x61e   :  { %3482 = vtanh.f32 %v2331_v33 }
 0x625   :  { %v3477_v50 = vpop.eup %3476 }
 0x626   :  { %v3479_v51 = vpop.eup %3478  ;;  %v2343_v52 = vadd.f32 1.0, %v3477_v50 }
 0x627   :  { %v2349_v57 = vadd.f32 1.0, %v3479_v51  ;;  %v3481_v27 = vpop.eup %3480 }
 0x628   :  { %3484 = vrcp.f32 %v2343_v52  ;;  %v3483_v58 = vpop.eup %3482  ;;  %v2356_v5 = vadd.f32 1.0, %v3481_v27 }
 0x629   :  { %3486 = vrcp.f32 %v2349_v57 }
 0x62a   :  { %3488 = vrcp.f32 %v2356_v5 }
 0x632   :  { %v3485_v31 = vpop.eup %3484 }
 0x633   :  { %v3487_v63 = vpop.eup %3486  ;;  %v2360_v0 = vmul.f32 %v3485_v31, %v3483_v58 }
 0x634   :  { %v2359_v6 = vmul.f32 %v3487_v63, %v4162_v25  ;;  %v3489_v11 = vpop.eup %3488 }
 0x636   :  { %v4203_v7 = vadd.f32 %v2360_v0, %v2359_v6 }
 0x638   :  { %3490 = vtanh.f32 %v4203_v7 }
 0x642   :  { %v3491_v12 = vpop.eup %3490 }
 0x643   :  { %v2363_v13 = vmul.f32 %v3491_v12, %v3489_v11 }
 0x645   :  { %2778 = vst [vmem:[%s4254_s3 + $0x28] sm:$0xff] %v2363_v13  ;;  %2435 = vmatmul.mubr.f32.vlgmr.msra.gmra.mrb[12].mxu0 %v2363_v13  ;;  %2506 = vmatmul.mubr.f32.vlgmr.msra.gmra.mrb[12].mxu1 %v2363_v13 }
 0x646   :  { %3302 = vmatpush1.bf16.msra.mxu0 %v3705_v35  ;;  %3334 = vmatpush1.bf16.msra.mxu1 %v3709_v36 }
 0x647   :  { %3304 = vmatprep.subr.bf16.mxu0 %v3711_v37  ;;  %3336 = vmatprep.subr.bf16.mxu1 %v3724_v41 }
 0x648   :  { %2610 = vmatprep.mubr.f32.mxu0 %v3524_v3  ;;  %2681 = vmatprep.mubr.f32.mxu1 %v3524_v3 }
 0x64a   :  { %3306 = vmatpush1.bf16.msra.mxu0 %v3745_v47  ;;  %3338 = vmatpush1.bf16.msra.mxu1 %v3749_v48 }
 0x64b   :  { %3308 = vmatprep.subr.bf16.mxu0 %v3751_v49  ;;  %3340 = vmatprep.subr.bf16.mxu1 %v3763_v53 }
 0x64e   :  { %3310 = vmatpush1.bf16.msra.mxu0 %v3783_v59  ;;  %3342 = vmatpush1.bf16.msra.mxu1 %v3787_v60 }
 0x64f   :  { %3312 = vmatprep.subr.bf16.mxu0 %v3789_v61  ;;  %3344 = vmatprep.subr.bf16.mxu1 %v3801_v1 }
 0x652   :  { %3314 = vmatpush1.bf16.msra.mxu0 %v3819_v8  ;;  %3346 = vmatpush1.bf16.msra.mxu1 %v3823_v9 }
 0x653   :  { %3316 = vmatprep.subr.bf16.mxu0 %v3825_v10  ;;  %3348 = vmatprep.subr.bf16.mxu1 %v3837_v14 }
 0x656   :  { %3318 = vmatpush1.bf16.msra.mxu0 %v3855_v20  ;;  %3350 = vmatpush1.bf16.msra.mxu1 %v3859_v21 }
 0x657   :  { %3320 = vmatprep.subr.bf16.mxu0 %v3861_v22  ;;  %3352 = vmatprep.subr.bf16.mxu1 %v3873_v26 }
 0x65a   :  { %3322 = vmatpush1.bf16.msra.mxu0 %v3891_v34  ;;  %3354 = vmatpush1.bf16.msra.mxu1 %v3895_v38 }
 0x65b   :  { %3324 = vmatprep.subr.bf16.mxu0 %v3897_v39  ;;  %3356 = vmatprep.subr.bf16.mxu1 %v3909_v44 }
 0x65e   :  { %3326 = vmatpush1.bf16.msra.mxu0 %v3927_v54  ;;  %3358 = vmatpush1.bf16.msra.mxu1 %v3931_v55 }
 0x65f   :  { %3328 = vmatprep.subr.bf16.mxu0 %v3933_v56  ;;  %3360 = vmatprep.subr.bf16.mxu1 %v3942_v62 }
 0x662   :  { %3330 = vmatpush1.bf16.msra.mxu0 %v3951_v2  ;;  %3362 = vmatpush1.bf16.msra.mxu1 %v3955_v4 }
 0x718   :  { %v2436_v3 = vpop.f32.mrb[12].mxu0  ;;  %v2507_v35 = vpop.f32.mrb[12].mxu1 }
 0x719   :  { %v2779_v36 = vmul.f32 -1.442695, %v2436_v3  ;;  %v2438_v37 = vpop.f32.mrb[13].mxu0  ;;  %v2509_v41 = vpop.f32.mrb[13].mxu1 }
 0x71a   :  { %v2780_v47 = vmul.f32 -1.442695, %v2438_v37  ;;  %v2781_v48 = vmul.f32 -1.442695, %v2509_v41 }
 0x71b   :  { %3492 = vpow2.f32 %v2779_v36 }
 0x71c   :  { %3494 = vpow2.f32 %v2780_v47 }
 0x71d   :  { %3496 = vpow2.f32 %v2781_v48 }
 0x71e   :  { %3498 = vtanh.f32 %v2507_v35 }
 0x725   :  { %v3493_v49 = vpop.eup %3492 }
 0x726   :  { %v3495_v53 = vpop.eup %3494  ;;  %v2519_v59 = vadd.f32 1.0, %v3493_v49 }
 0x727   :  { %v2525_v60 = vadd.f32 1.0, %v3495_v53  ;;  %v3497_v61 = vpop.eup %3496 }
 0x728   :  { %3500 = vrcp.f32 %v2519_v59  ;;  %v3499_v1 = vpop.eup %3498  ;;  %v2532_v14 = vadd.f32 1.0, %v3497_v61 }
 0x729   :  { %3502 = vrcp.f32 %v2525_v60 }
 0x72a   :  { %3504 = vrcp.f32 %v2532_v14 }
 0x732   :  { %v3501_v8 = vpop.eup %3500 }
 0x733   :  { %v3503_v9 = vpop.eup %3502  ;;  %v2536_v10 = vmul.f32 %v3501_v8, %v3499_v1 }
 0x734   :  { %v2535_v20 = vmul.f32 %v3503_v9, %v4203_v7  ;;  %v3505_v22 = vpop.eup %3504 }
 0x736   :  { %v2537_v21 = vadd.f32 %v2536_v10, %v2535_v20 }
 0x738   :  { %3506 = vtanh.f32 %v2537_v21 }
 0x742   :  { %v3507_v26 = vpop.eup %3506 }
 0x743   :  { %v2539_v34 = vmul.f32 %v3507_v26, %v3505_v22 }
 0x745   :  { %2782 = vst [vmem:[%s4254_s3 + $0x30] sm:$0xff] %v2539_v34  ;;  %2611 = vmatmul.mubr.f32.vlgmr.msra.gmra.mrb[14].mxu0 %v2539_v34  ;;  %2682 = vmatmul.mubr.f32.vlgmr.msra.gmra.mrb[14].mxu1 %v2539_v34 }
 0x818   :  { %v2612_v38 = vpop.f32.mrb[14].mxu0  ;;  %v2683_v39 = vpop.f32.mrb[14].mxu1 }
 0x819   :  { %v2783_v44 = vmul.f32 -1.442695, %v2612_v38  ;;  %v2614_v54 = vpop.f32.mrb[15].mxu0  ;;  %v2685_v55 = vpop.f32.mrb[15].mxu1 }
 0x81a   :  { %v2784_v56 = vmul.f32 -1.442695, %v2614_v54  ;;  %v2785_v62 = vmul.f32 -1.442695, %v2685_v55 }
 0x81b   :  { %3508 = vpow2.f32 %v2783_v44 }
 0x81c   :  { %3510 = vpow2.f32 %v2784_v56 }
 0x81d   :  { %3512 = vpow2.f32 %v2785_v62 }
 0x81e   :  { %3514 = vtanh.f32 %v2683_v39 }
 0x825   :  { %v3509_v2 = vpop.eup %3508 }
 0x826   :  { %v3511_v4 = vpop.eup %3510  ;;  %v2695_v15 = vadd.f32 1.0, %v3509_v2 }
 0x827   :  { %v2701_v16 = vadd.f32 1.0, %v3511_v4  ;;  %v3513_v17 = vpop.eup %3512 }
 0x828   :  { %3516 = vrcp.f32 %v2695_v15  ;;  %v3515_v18 = vpop.eup %3514  ;;  %v2708_v25 = vadd.f32 1.0, %v3513_v17 }
 0x829   :  { %3518 = vrcp.f32 %v2701_v16 }
 0x82a   :  { %3520 = vrcp.f32 %v2708_v25 }
 0x832   :  { %v3517_v19 = vpop.eup %3516 }
 0x833   :  { %v3519_v23 = vpop.eup %3518  ;;  %v2712_v24 = vmul.f32 %v3517_v19, %v3515_v18 }
 0x834   :  { %v2711_v28 = vmul.f32 %v3519_v23, %v2537_v21  ;;  %v3521_v30 = vpop.eup %3520 }
 0x836   :  { %v2713_v29 = vadd.f32 %v2712_v24, %v2711_v28 }
 0x838   :  { %3522 = vtanh.f32 %v2713_v29  ;;  %2724 = vst [vmem:[%s4255_s4] sm:$0xff] %v2713_v29 }
 0x842   :  { %v3523_v32 = vpop.eup %3522 }
 0x843   :  { %v2715_v33 = vmul.f32 %v3523_v32, %v3521_v30 }
 0x845   :  { %2786 = vst [vmem:[%s4254_s3 + $0x38] sm:$0xff] %v2715_v33 }

// kernel: stacked_rnn_forward.3
= control target key start
LH: loop header
LB: loop body
LE: loop exit
PB: predicated region body
PF: predicated region fallthrough
CT: control target
= control target key end

     0   :  { %v3596_v3 = vmov 0.0   ;;  %vm103_vm0 = vcmask 261120   ;;  %s4387_s1 = inlined_call_operand.vmem [shape: f32[32,512], index: 1, kind: input, shape index: {}]   ;;  %s4388_s0 = inlined_call_operand.vmem [shape: f32[8,8,32], index: 0, kind: input, shape index: {}]   ;;  %s4389_s2 = inlined_call_operand.vmem [shape: f32[128,512], index: 2, kind: input, shape index: {}]   ;;  %s4390_s3 = inlined_call_operand.vmem [shape: f32[8,8,128], index: 3, kind: output, shape index: {0}]   ;;  %s4391_s4 = inlined_call_operand.vmem [shape: f32[8,128], index: 4, kind: output, shape index: {1}]  }
   0x1   :  { %v23_v0 = vld [vmem:[%s4387_s1 + $0x8] sm:$0xff]  ;;  %v25_v2 = vld [vmem:[%s4387_s1 + $0x18] sm:$0xff]  ;;  %171 = vmatprep.mubr.f32.mxu0 %v3596_v3  ;;  %242 = vmatprep.mubr.f32.mxu1 %v3596_v3  ;;  %v22_v6 = vld [vmem:[%s4387_s1] sm:$0xff] }
   0x2   :  { %v27_v1 = vld [vmem:[%s4387_s1 + $0x28] sm:$0xff]  ;;  %v29_v5 = vld [vmem:[%s4387_s1 + $0x38] sm:$0xff]  ;;  %v26_v7 = vld [vmem:[%s4387_s1 + $0x20] sm:$0xff] }
   0x3   :  { %v3633_v4 = vpack.c.bf16 %v27_v1, %v23_v0  ;;  %v3644_v8 = vpack.c.bf16 %v29_v5, %v25_v2  ;;  %v3646_v9 = vpack.c.bf16 %v26_v7, %v22_v6  ;;  %v24_v10 = vld [vmem:[%s4387_s1 + $0x10] sm:$0xff]  ;;  %v31_v12 = vld [vmem:[%s4387_s1 + $0x48] sm:$0xff]  ;;  %v33_v15 = vld [vmem:[%s4387_s1 + $0x58] sm:$0xff] }
   0x4   :  { %v28_v11 = vld [vmem:[%s4387_s1 + $0x30] sm:$0xff]  ;;  %v35_v14 = vld [vmem:[%s4387_s1 + $0x68] sm:$0xff]  ;;  %v37_v16 = vld [vmem:[%s4387_s1 + $0x78] sm:$0xff] }
   0x5   :  { %2796 = vmatprep.subr.bf16.mxu0 %v3633_v4  ;;  %v3658_v13 = vpack.c.bf16 %v28_v11, %v24_v10  ;;  %2804 = vmatprep.subr.bf16.mxu1 %v3644_v8  ;;  %v3671_v17 = vpack.c.bf16 %v35_v14, %v31_v12  ;;  %v3673_v18 = vpack.c.bf16 %v37_v16, %v33_v15  ;;  %v30_v19 = vld [vmem:[%s4387_s1 + $0x40] sm:$0xff]  ;;  %v32_v21 = vld [vmem:[%s4387_s1 + $0x50] sm:$0xff]  ;;  %v2743_v26 = vld [vmem:[%s4388_s0 + $0x8] sm:$0xff] }
   0x6   :  { %2798 = vmatpush1.bf16.msra.mxu0 %v3646_v9  ;;  %v34_v20 = vld [vmem:[%s4387_s1 + $0x60] sm:$0xff]  ;;  %v36_v23 = vld [vmem:[%s4387_s1 + $0x70] sm:$0xff]  ;;  %v2749_v28 = vld [vmem:[%s4388_s0 + $0x18] sm:$0xff] }
   0x7   :  { %2806 = vmatpush1.bf16.msra.mxu1 %v3658_v13  ;;  %v3685_v22 = vpack.c.bf16 %v34_v20, %v30_v19  ;;  %2800 = vmatprep.subr.bf16.mxu0 %v3671_v17  ;;  %v3692_v24 = vpack.c.bf16 %v36_v23, %v32_v21  ;;  %v102_v25 = vld [vmem:[%s4388_s0] sm:$0xff]  ;;  %v2746_v27 = vld [vmem:[%s4388_s0 + $0x10] sm:$0xff]  ;;  %v2755_v30 = vld [vmem:[%s4388_s0 + $0x28] sm:$0xff] }
   0x8   :  { %2808 = vmatprep.subr.bf16.mxu1 %v3673_v18  ;;  %v2752_v29 = vld [vmem:[%s4388_s0 + $0x20] sm:$0xff]  ;;  %v2758_v31 = vld [vmem:[%s4388_s0 + $0x30] sm:$0xff]  ;;  %v39_v32 = vld [vmem:[%s4389_s2 + $0x8] sm:$0xff] }
   0x9   :  { %v43_v33 = vld [vmem:[%s4389_s2 + $0x28] sm:$0xff]  ;;  %v41_v34 = vld [vmem:[%s4389_s2 + $0x18] sm:$0xff]  ;;  %v38_v37 = vld [vmem:[%s4389_s2] sm:$0xff] }
   0xa   :  { %2802 = vmatpush1.bf16.msra.mxu0 %v3685_v22  ;;  %v45_v35 = vld [vmem:[%s4389_s2 + $0x38] sm:$0xff]  ;;  %v3808_v36 = vpack.c.bf16 %v43_v33, %v39_v32  ;;  %v42_v38 = vld [vmem:[%s4389_s2 + $0x20] sm:$0xff]  ;;  %v40_v39 = vld [vmem:[%s4389_s2 + $0x10] sm:$0xff] }
   0xb   :  { %2810 = vmatpush1.bf16.msra.mxu1 %v3692_v24  ;;  %2812 = vmatprep.subr.bf16.mxu0 %v3633_v4  ;;  %v3821_v40 = vpack.c.bf16 %v45_v35, %v41_v34  ;;  %v44_v41 = vld [vmem:[%s4389_s2 + $0x30] sm:$0xff]  ;;  %v47_v42 = vld [vmem:[%s4389_s2 + $0x48] sm:$0xff]  ;;  %v49_v44 = vld [vmem:[%s4389_s2 + $0x58] sm:$0xff]  ;;  %v3843_v47 = vpack.c.bf16 %v42_v38, %v38_v37 }
   0xc   :  { %2820 = vmatprep.subr.bf16.mxu1 %v3644_v8  ;;  %v51_v43 = vld [vmem:[%s4389_s2 + $0x68] sm:$0xff]  ;;  %v53_v45 = vld [vmem:[%s4389_s2 + $0x78] sm:$0xff]  ;;  %v3847_v48 = vpack.c.bf16 %v44_v41, %v40_v39  ;;  %v46_v50 = vld [vmem:[%s4389_s2 + $0x40] sm:$0xff] }
   0xd   :  { %2741 = vmatmul.mubr.msk.f32.vlgmr.msra.gmra.mrb[0].mxu0 %vm103_vm0, %v102_v25  ;;  %v2761_v46 = vld [vmem:[%s4388_s0 + $0x38] sm:$0xff]  ;;  %v3849_v49 = vpack.c.bf16 %v51_v43, %v47_v42  ;;  %v50_v51 = vld [vmem:[%s4389_s2 + $0x60] sm:$0xff]  ;;  %v48_v52 = vld [vmem:[%s4389_s2 + $0x50] sm:$0xff]  ;;  %v3861_v53 = vpack.c.bf16 %v53_v45, %v49_v44 }
   0xe   :  { %2742 = vmatmul.mubr.msk.f32.vlgmr.msra.gmra.mrb[0].mxu1 %vm103_vm0, %v102_v25  ;;  %2814 = vmatpush1.bf16.msra.mxu0 %v3646_v9  ;;  %v52_v54 = vld [vmem:[%s4389_s2 + $0x70] sm:$0xff]  ;;  %v55_v55 = vld [vmem:[%s4389_s2 + $0x88] sm:$0xff]  ;;  %v57_v57 = vld [vmem:[%s4389_s2 + $0x98] sm:$0xff]  ;;  %v3881_v59 = vpack.c.bf16 %v50_v51, %v46_v50 }
   0xf   :  { %2822 = vmatpush1.bf16.msra.mxu1 %v3658_v13  ;;  %2816 = vmatprep.subr.bf16.mxu0 %v3671_v17  ;;  %v59_v56 = vld [vmem:[%s4389_s2 + $0xa8] sm:$0xff]  ;;  %v61_v58 = vld [vmem:[%s4389_s2 + $0xb8] sm:$0xff]  ;;  %v3885_v60 = vpack.c.bf16 %v52_v54, %v48_v52  ;;  %v54_v62 = vld [vmem:[%s4389_s2 + $0x80] sm:$0xff] }
  0x10   :  { %2824 = vmatprep.subr.bf16.mxu1 %v3673_v18  ;;  %322 = vmatprep.mubr.f32.mxu0 %v3596_v3  ;;  %v3887_v61 = vpack.c.bf16 %v59_v56, %v55_v55  ;;  %v58_v63 = vld [vmem:[%s4389_s2 + $0xa0] sm:$0xff]  ;;  %v56_v0 = vld [vmem:[%s4389_s2 + $0x90] sm:$0xff]  ;;  %v3899_v1 = vpack.c.bf16 %v61_v58, %v57_v57  ;;  %v67_v5 = vld [vmem:[%s4389_s2 + $0xe8] sm:$0xff] }
  0x11   :  { %393 = vmatprep.mubr.f32.mxu1 %v3596_v3  ;;  %v60_v2 = vld [vmem:[%s4389_s2 + $0xb0] sm:$0xff]  ;;  %v65_v6 = vld [vmem:[%s4389_s2 + $0xd8] sm:$0xff]  ;;  %v62_v11 = vld [vmem:[%s4389_s2 + $0xc0] sm:$0xff] }
  0x12   :  { %2818 = vmatpush1.bf16.msra.mxu0 %v3685_v22  ;;  %v69_v7 = vld [vmem:[%s4389_s2 + $0xf8] sm:$0xff]  ;;  %v66_v12 = vld [vmem:[%s4389_s2 + $0xe0] sm:$0xff]  ;;  %v68_v15 = vld [vmem:[%s4389_s2 + $0xf0] sm:$0xff] }
  0x13   :  { %2826 = vmatpush1.bf16.msra.mxu1 %v3692_v24  ;;  %2828 = vmatprep.subr.bf16.mxu0 %v3633_v4  ;;  %v3937_v14 = vpack.c.bf16 %v69_v7, %v65_v6  ;;  %v71_v16 = vld [vmem:[%s4389_s2 + $0x108] sm:$0xff]  ;;  %v77_v19 = vld [vmem:[%s4389_s2 + $0x138] sm:$0xff]  ;;  %v3955_v20 = vpack.c.bf16 %v66_v12, %v62_v11  ;;  %v70_v23 = vld [vmem:[%s4389_s2 + $0x100] sm:$0xff] }
  0x14   :  { %2836 = vmatprep.subr.bf16.mxu1 %v3644_v8  ;;  %v72_v25 = vld [vmem:[%s4389_s2 + $0x110] sm:$0xff]  ;;  %v78_v35 = vld [vmem:[%s4389_s2 + $0x140] sm:$0xff]  ;;  %v87_v42 = vld [vmem:[%s4389_s2 + $0x188] sm:$0xff] }
  0x15   :  { %2744 = vmatmul.mubr.msk.f32.vlgmr.msra.gmra.mrb[2].mxu0 %vm103_vm0, %v2743_v26  ;;  %v82_v37 = vld [vmem:[%s4389_s2 + $0x160] sm:$0xff]  ;;  %v80_v38 = vld [vmem:[%s4389_s2 + $0x150] sm:$0xff]  ;;  %v91_v43 = vld [vmem:[%s4389_s2 + $0x1a8] sm:$0xff] }
  0x16   :  { %2745 = vmatmul.mubr.msk.f32.vlgmr.msra.gmra.mrb[2].mxu1 %vm103_vm0, %v2743_v26  ;;  %2830 = vmatpush1.bf16.msra.mxu0 %v3646_v9  ;;  %v84_v41 = vld [vmem:[%s4389_s2 + $0x170] sm:$0xff]  ;;  %v89_v44 = vld [vmem:[%s4389_s2 + $0x198] sm:$0xff]  ;;  %v4033_v51 = vpack.c.bf16 %v91_v43, %v87_v42  ;;  %v86_v52 = vld [vmem:[%s4389_s2 + $0x180] sm:$0xff] }
  0x17   :  { %2838 = vmatpush1.bf16.msra.mxu1 %v3658_v13  ;;  %2832 = vmatprep.subr.bf16.mxu0 %v3671_v17  ;;  %v93_v45 = vld [vmem:[%s4389_s2 + $0x1b8] sm:$0xff]  ;;  %v4031_v50 = vpack.c.bf16 %v84_v41, %v80_v38  ;;  %v90_v54 = vld [vmem:[%s4389_s2 + $0x1a0] sm:$0xff]  ;;  %v88_v55 = vld [vmem:[%s4389_s2 + $0x190] sm:$0xff] }
  0x18   :  { %2840 = vmatprep.subr.bf16.mxu1 %v3673_v18  ;;  %474 = vmatprep.mubr.f32.mxu0 %v3596_v3  ;;  %v4045_v56 = vpack.c.bf16 %v93_v45, %v89_v44  ;;  %v92_v57 = vld [vmem:[%s4389_s2 + $0x1b0] sm:$0xff]  ;;  %v95_v58 = vld [vmem:[%s4389_s2 + $0x1c8] sm:$0xff]  ;;  %v94_v6 = vld [vmem:[%s4389_s2 + $0x1c0] sm:$0xff] }
  0x19   :  { %545 = vmatprep.mubr.f32.mxu1 %v3596_v3  ;;  %v98_v7 = vld [vmem:[%s4389_s2 + $0x1e0] sm:$0xff]  ;;  %v96_v12 = vld [vmem:[%s4389_s2 + $0x1d0] sm:$0xff] }
  0x1a   :  { %2834 = vmatpush1.bf16.msra.mxu0 %v3685_v22 }
  0x1b   :  { %2842 = vmatpush1.bf16.msra.mxu1 %v3692_v24  ;;  %2844 = vmatprep.subr.bf16.mxu0 %v3633_v4 }
  0x1c   :  { %2852 = vmatprep.subr.bf16.mxu1 %v3644_v8 }
  0x1d   :  { %2747 = vmatmul.mubr.msk.f32.vlgmr.msra.gmra.mrb[4].mxu0 %vm103_vm0, %v2746_v27 }
  0x1e   :  { %2748 = vmatmul.mubr.msk.f32.vlgmr.msra.gmra.mrb[4].mxu1 %vm103_vm0, %v2746_v27  ;;  %2846 = vmatpush1.bf16.msra.mxu0 %v3646_v9  ;;  %v76_v27 = vld [vmem:[%s4389_s2 + $0x130] sm:$0xff] }
  0x1f   :  { %2854 = vmatpush1.bf16.msra.mxu1 %v3658_v13  ;;  %2848 = vmatprep.subr.bf16.mxu0 %v3671_v17  ;;  %v3995_v33 = vpack.c.bf16 %v76_v27, %v72_v25 }
  0x20   :  { %2856 = vmatprep.subr.bf16.mxu1 %v3673_v18  ;;  %626 = vmatprep.mubr.f32.mxu0 %v3596_v3 }
  0x21   :  { %697 = vmatprep.mubr.f32.mxu1 %v3596_v3 }
  0x22   :  { %2850 = vmatpush1.bf16.msra.mxu0 %v3685_v22 }
  0x23   :  { %2858 = vmatpush1.bf16.msra.mxu1 %v3692_v24  ;;  %2860 = vmatprep.subr.bf16.mxu0 %v3633_v4 }
  0x24   :  { %2868 = vmatprep.subr.bf16.mxu1 %v3644_v8 }
  0x25   :  { %2750 = vmatmul.mubr.msk.f32.vlgmr.msra.gmra.mrb[6].mxu0 %vm103_vm0, %v2749_v28 }
  0x26   :  { %2751 = vmatmul.mubr.msk.f32.vlgmr.msra.gmra.mrb[6].mxu1 %vm103_vm0, %v2749_v28  ;;  %2862 = vmatpush1.bf16.msra.mxu0 %v3646_v9  ;;  %v79_v28 = vld [vmem:[%s4389_s2 + $0x148] sm:$0xff] }
  0x27   :  { %2870 = vmatpush1.bf16.msra.mxu1 %v3658_v13  ;;  %2864 = vmatprep.subr.bf16.mxu0 %v3671_v17 }
  0x28   :  { %2872 = vmatprep.subr.bf16.mxu1 %v3673_v18  ;;  %778 = vmatprep.mubr.f32.mxu0 %v3596_v3 }
  0x29   :  { %849 = vmatprep.mubr.f32.mxu1 %v3596_v3 }
  0x2a   :  { %2866 = vmatpush1.bf16.msra.mxu0 %v3685_v22 }
  0x2b   :  { %2874 = vmatpush1.bf16.msra.mxu1 %v3692_v24  ;;  %2876 = vmatprep.subr.bf16.mxu0 %v3633_v4 }
  0x2c   :  { %2884 = vmatprep.subr.bf16.mxu1 %v3644_v8 }
  0x2d   :  { %2753 = vmatmul.mubr.msk.f32.vlgmr.msra.gmra.mrb[8].mxu0 %vm103_vm0, %v2752_v29 }
  0x2e   :  { %2754 = vmatmul.mubr.msk.f32.vlgmr.msra.gmra.mrb[8].mxu1 %vm103_vm0, %v2752_v29  ;;  %2878 = vmatpush1.bf16.msra.mxu0 %v3646_v9  ;;  %v83_v29 = vld [vmem:[%s4389_s2 + $0x168] sm:$0xff] }
  0x2f   :  { %2886 = vmatpush1.bf16.msra.mxu1 %v3658_v13  ;;  %2880 = vmatprep.subr.bf16.mxu0 %v3671_v17  ;;  %v3997_v34 = vpack.c.bf16 %v83_v29, %v79_v28 }
  0x30   :  { %2888 = vmatprep.subr.bf16.mxu1 %v3673_v18  ;;  %930 = vmatprep.mubr.f32.mxu0 %v3596_v3 }
  0x31   :  { %1001 = vmatprep.mubr.f32.mxu1 %v3596_v3 }
  0x32   :  { %2882 = vmatpush1.bf16.msra.mxu0 %v3685_v22 }
  0x33   :  { %2890 = vmatpush1.bf16.msra.mxu1 %v3692_v24  ;;  %2892 = vmatprep.subr.bf16.mxu0 %v3633_v4 }
  0x34   :  { %2900 = vmatprep.subr.bf16.mxu1 %v3644_v8 }
  0x35   :  { %2756 = vmatmul.mubr.msk.f32.vlgmr.msra.gmra.mrb[10].mxu0 %vm103_vm0, %v2755_v30 }
  0x36   :  { %2757 = vmatmul.mubr.msk.f32.vlgmr.msra.gmra.mrb[10].mxu1 %vm103_vm0, %v2755_v30  ;;  %2894 = vmatpush1.bf16.msra.mxu0 %v3646_v9  ;;  %v81_v30 = vld [vmem:[%s4389_s2 + $0x158] sm:$0xff] }
  0x37   :  { %2902 = vmatpush1.bf16.msra.mxu1 %v3658_v13  ;;  %2896 = vmatprep.subr.bf16.mxu0 %v3671_v17 }
  0x38   :  { %2904 = vmatprep.subr.bf16.mxu1 %v3673_v18  ;;  %1082 = vmatprep.mubr.f32.mxu0 %v3596_v3 }
  0x39   :  { %1153 = vmatprep.mubr.f32.mxu1 %v3596_v3 }
  0x3a   :  { %2898 = vmatpush1.bf16.msra.mxu0 %v3685_v22 }
  0x3b   :  { %2906 = vmatpush1.bf16.msra.mxu1 %v3692_v24  ;;  %2908 = vmatprep.subr.bf16.mxu0 %v3633_v4  ;;  %v63_v4 = vld [vmem:[%s4389_s2 + $0xc8] sm:$0xff] }
  0x3c   :  { %2916 = vmatprep.subr.bf16.mxu1 %v3644_v8  ;;  %v3919_v8 = vpack.c.bf16 %v58_v63, %v54_v62  ;;  %v3925_v10 = vpack.c.bf16 %v67_v5, %v63_v4  ;;  %v99_v62 = vld [vmem:[%s4389_s2 + $0x1e8] sm:$0xff]  ;;  %v97_v63 = vld [vmem:[%s4389_s2 + $0x1d8] sm:$0xff]  ;;  %v4067_v4 = vpack.c.bf16 %v92_v57, %v88_v55 }
  0x3d   :  { %2759 = vmatmul.mubr.msk.f32.vlgmr.msra.gmra.mrb[12].mxu0 %vm103_vm0, %v2758_v31  ;;  %v4069_v5 = vpack.c.bf16 %v99_v62, %v95_v58 }
  0x3e   :  { %2760 = vmatmul.mubr.msk.f32.vlgmr.msra.gmra.mrb[12].mxu1 %vm103_vm0, %v2758_v31  ;;  %2910 = vmatpush1.bf16.msra.mxu0 %v3646_v9  ;;  %v3923_v9 = vpack.c.bf16 %v60_v2, %v56_v0  ;;  %v85_v31 = vld [vmem:[%s4389_s2 + $0x178] sm:$0xff]  ;;  %v4063_v2 = vpack.c.bf16 %v90_v54, %v86_v52 }
  0x3f   :  { %2918 = vmatpush1.bf16.msra.mxu1 %v3658_v13  ;;  %2912 = vmatprep.subr.bf16.mxu0 %v3671_v17  ;;  %v64_v13 = vld [vmem:[%s4389_s2 + $0xd0] sm:$0xff]  ;;  %v75_v17 = vld [vmem:[%s4389_s2 + $0x128] sm:$0xff]  ;;  %v4009_v39 = vpack.c.bf16 %v85_v31, %v81_v30  ;;  %v101_v0 = vld [vmem:[%s4389_s2 + $0x1f8] sm:$0xff] }
  0x40   :  { %2920 = vmatprep.subr.bf16.mxu1 %v3673_v18  ;;  %1234 = vmatprep.mubr.f32.mxu0 %v3596_v3  ;;  %v73_v18 = vld [vmem:[%s4389_s2 + $0x118] sm:$0xff]  ;;  %v3959_v21 = vpack.c.bf16 %v68_v15, %v64_v13  ;;  %v4078_v11 = vpack.c.bf16 %v101_v0, %v97_v63  ;;  %v100_v13 = vld [vmem:[%s4389_s2 + $0x1f0] sm:$0xff]  ;;  %v4087_v15 = vpack.c.bf16 %v98_v7, %v94_v6 }
  0x41   :  { %1305 = vmatprep.mubr.f32.mxu1 %v3596_v3  ;;  %v3973_v26 = vpack.c.bf16 %v77_v19, %v73_v18 }
  0x42   :  { %2914 = vmatpush1.bf16.msra.mxu0 %v3685_v22  ;;  %v3961_v22 = vpack.c.bf16 %v75_v17, %v71_v16  ;;  %v4091_v16 = vpack.c.bf16 %v100_v13, %v96_v12 }
  0x43   :  { %2922 = vmatpush1.bf16.msra.mxu1 %v3692_v24  ;;  %2924 = vmatprep.subr.bf16.mxu0 %v3808_v36  ;;  %v74_v24 = vld [vmem:[%s4389_s2 + $0x120] sm:$0xff] }
  0x44   :  { %2956 = vmatprep.subr.bf16.mxu1 %v3821_v40  ;;  %v3991_v32 = vpack.c.bf16 %v74_v24, %v70_v23 }
  0x45   :  { %2762 = vmatmul.mubr.msk.f32.vlgmr.msra.gmra.mrb[14].mxu0 %vm103_vm0, %v2761_v46 }
  0x46   :  { %2763 = vmatmul.mubr.msk.f32.vlgmr.msra.gmra.mrb[14].mxu1 %vm103_vm0, %v2761_v46  ;;  %2926 = vmatpush1.bf16.msra.mxu0 %v3843_v47  ;;  %v4027_v46 = vpack.c.bf16 %v82_v37, %v78_v35 }
  0x47   :  { %2958 = vmatpush1.bf16.msra.mxu1 %v3847_v48  ;;  %2928 = vmatprep.subr.bf16.mxu0 %v3849_v49 }
  0x48   :  { %2960 = vmatprep.subr.bf16.mxu1 %v3861_v53  ;;  %1387 = vmatprep.mubr.f32.mxu0 %v3596_v3 }
  0x49   :  { %1458 = vmatprep.mubr.f32.mxu1 %v3596_v3 }
  0x4a   :  { %2930 = vmatpush1.bf16.msra.mxu0 %v3881_v59 }
  0x4b   :  { %2962 = vmatpush1.bf16.msra.mxu1 %v3885_v60  ;;  %2932 = vmatprep.subr.bf16.mxu0 %v3887_v61 }
  0x4c   :  { %2964 = vmatprep.subr.bf16.mxu1 %v3899_v1 }
  0x4e   :  { %2934 = vmatpush1.bf16.msra.mxu0 %v3919_v8 }
  0x4f   :  { %2966 = vmatpush1.bf16.msra.mxu1 %v3923_v9  ;;  %2936 = vmatprep.subr.bf16.mxu0 %v3925_v10 }
  0x50   :  { %2968 = vmatprep.subr.bf16.mxu1 %v3937_v14 }
  0x52   :  { %2938 = vmatpush1.bf16.msra.mxu0 %v3955_v20 }
  0x53   :  { %2970 = vmatpush1.bf16.msra.mxu1 %v3959_v21  ;;  %2940 = vmatprep.subr.bf16.mxu0 %v3961_v22 }
  0x54   :  { %2972 = vmatprep.subr.bf16.mxu1 %v3973_v26 }
  0x56   :  { %2942 = vmatpush1.bf16.msra.mxu0 %v3991_v32 }
  0x57   :  { %2974 = vmatpush1.bf16.msra.mxu1 %v3995_v33  ;;  %2944 = vmatprep.subr.bf16.mxu0 %v3997_v34 }
  0x58   :  { %2976 = vmatprep.subr.bf16.mxu1 %v4009_v39 }
  0x5a   :  { %2946 = vmatpush1.bf16.msra.mxu0 %v4027_v46 }
  0x5b   :  { %2978 = vmatpush1.bf16.msra.mxu1 %v4031_v50  ;;  %2948 = vmatprep.subr.bf16.mxu0 %v4033_v51 }
  0x5c   :  { %2980 = vmatprep.subr.bf16.mxu1 %v4045_v56 }
  0x5e   :  { %2950 = vmatpush1.bf16.msra.mxu0 %v4063_v2 }
  0x5f   :  { %2982 = vmatpush1.bf16.msra.mxu1 %v4067_v4  ;;  %2952 = vmatprep.subr.bf16.mxu0 %v4069_v5 }
  0x60   :  { %2984 = vmatprep.subr.bf16.mxu1 %v4078_v11 }
  0x62   :  { %2954 = vmatpush1.bf16.msra.mxu0 %v4087_v15 }
  0x63   :  { %2986 = vmatpush1.bf16.msra.mxu1 %v4091_v16  ;;  %2988 = vmatprep.subr.bf16.mxu0 %v3808_v36 }
  0x64   :  { %3020 = vmatprep.subr.bf16.mxu1 %v3821_v40 }
  0x65   :  { %1388 = vmatmul.mubr.f32.vlgmr.msra.gmra.mrb[0].mxu0 %v3596_v3 }
  0x66   :  { %1459 = vmatmul.mubr.f32.vlgmr.msra.gmra.mrb[0].mxu1 %v3596_v3  ;;  %2990 = vmatpush1.bf16.msra.mxu0 %v3843_v47 }
  0x67   :  { %3022 = vmatpush1.bf16.msra.mxu1 %v3847_v48  ;;  %2992 = vmatprep.subr.bf16.mxu0 %v3849_v49 }
  0x68   :  { %3024 = vmatprep.subr.bf16.mxu1 %v3861_v53  ;;  %1562 = vmatprep.mubr.f32.mxu0 %v3596_v3 }
  0x69   :  { %1633 = vmatprep.mubr.f32.mxu1 %v3596_v3 }
  0x6a   :  { %2994 = vmatpush1.bf16.msra.mxu0 %v3881_v59 }
  0x6b   :  { %3026 = vmatpush1.bf16.msra.mxu1 %v3885_v60  ;;  %2996 = vmatprep.subr.bf16.mxu0 %v3887_v61 }
  0x6c   :  { %3028 = vmatprep.subr.bf16.mxu1 %v3899_v1 }
  0x6e   :  { %2998 = vmatpush1.bf16.msra.mxu0 %v3919_v8 }
  0x6f   :  { %3030 = vmatpush1.bf16.msra.mxu1 %v3923_v9  ;;  %3000 = vmatprep.subr.bf16.mxu0 %v3925_v10 }
  0x70   :  { %3032 = vmatprep.subr.bf16.mxu1 %v3937_v14 }
  0x72   :  { %3002 = vmatpush1.bf16.msra.mxu0 %v3955_v20 }
  0x73   :  { %3034 = vmatpush1.bf16.msra.mxu1 %v3959_v21  ;;  %3004 = vmatprep.subr.bf16.mxu0 %v3961_v22 }
  0x74   :  { %3036 = vmatprep.subr.bf16.mxu1 %v3973_v26 }
  0x76   :  { %3006 = vmatpush1.bf16.msra.mxu0 %v3991_v32 }
  0x77   :  { %3038 = vmatpush1.bf16.msra.mxu1 %v3995_v33  ;;  %3008 = vmatprep.subr.bf16.mxu0 %v3997_v34 }
  0x78   :  { %3040 = vmatprep.subr.bf16.mxu1 %v4009_v39 }
  0x7a   :  { %3010 = vmatpush1.bf16.msra.mxu0 %v4027_v46 }
  0x7b   :  { %3042 = vmatpush1.bf16.msra.mxu1 %v4031_v50  ;;  %3012 = vmatprep.subr.bf16.mxu0 %v4033_v51 }
  0x7c   :  { %3044 = vmatprep.subr.bf16.mxu1 %v4045_v56 }
  0x7e   :  { %3014 = vmatpush1.bf16.msra.mxu0 %v4063_v2 }
  0x7f   :  { %3046 = vmatpush1.bf16.msra.mxu1 %v4067_v4  ;;  %3016 = vmatprep.subr.bf16.mxu0 %v4069_v5 }
  0x80   :  { %3048 = vmatprep.subr.bf16.mxu1 %v4078_v11 }
  0x82   :  { %3018 = vmatpush1.bf16.msra.mxu0 %v4087_v15 }
  0x83   :  { %3050 = vmatpush1.bf16.msra.mxu1 %v4091_v16  ;;  %3052 = vmatprep.subr.bf16.mxu0 %v3808_v36 }
  0x84   :  { %3084 = vmatprep.subr.bf16.mxu1 %v3821_v40 }
 0x138   :  { %v1389_v17 = vpop.f32.mrb[0].mxu0 }
 0x139   :  { %v2764_v18 = vmul.f32 -1.442695, %v1389_v17  ;;  %v1460_v19 = vpop.f32.mrb[0].mxu1  ;;  %v1391_v23 = vpop.f32.mrb[1].mxu0 }
 0x13a   :  { %v2765_v24 = vmul.f32 -1.442695, %v1391_v23  ;;  %v1462_v25 = vpop.f32.mrb[1].mxu1 }
 0x13b   :  { %3468 = vpow2.f32 %v2764_v18  ;;  %v2766_v27 = vmul.f32 -1.442695, %v1462_v25 }
 0x13c   :  { %3470 = vpow2.f32 %v2765_v24 }
 0x13d   :  { %3472 = vpow2.f32 %v2766_v27 }
 0x13e   :  { %3474 = vtanh.f32 %v1460_v19 }
 0x145   :  { %v3469_v28 = vpop.eup %3468 }
 0x146   :  { %v3471_v29 = vpop.eup %3470  ;;  %v1472_v30 = vadd.f32 1.0, %v3469_v28 }
 0x147   :  { %v1478_v31 = vadd.f32 1.0, %v3471_v29  ;;  %v3473_v35 = vpop.eup %3472 }
 0x148   :  { %3476 = vrcp.f32 %v1472_v30  ;;  %v3475_v37 = vpop.eup %3474  ;;  %v1485_v43 = vadd.f32 1.0, %v3473_v35 }
 0x149   :  { %3478 = vrcp.f32 %v1478_v31 }
 0x14a   :  { %3480 = vrcp.f32 %v1485_v43 }
 0x152   :  { %v3477_v38 = vpop.eup %3476 }
 0x153   :  { %v3479_v41 = vpop.eup %3478  ;;  %v1489_v42 = vmul.f32 %v3477_v38, %v3475_v37 }
 0x154   :  { %v1488_v44 = vmul.f32 0.0, %v3479_v41  ;;  %v3481_v52 = vpop.eup %3480 }
 0x156   :  { %v4134_v45 = vadd.f32 %v1489_v42, %v1488_v44 }
 0x158   :  { %3482 = vtanh.f32 %v4134_v45 }
 0x162   :  { %v3483_v54 = vpop.eup %3482 }
 0x163   :  { %v1492_v55 = vmul.f32 %v3483_v54, %v3481_v52 }
 0x165   :  { %1493 = vst [vmem:[%s4390_s3] sm:$0xff] %v1492_v55  ;;  %1563 = vmatmul.mubr.f32.vlgmr.msra.gmra.mrb[2].mxu0 %v1492_v55  ;;  %1634 = vmatmul.mubr.f32.vlgmr.msra.gmra.mrb[2].mxu1 %v1492_v55 }
 0x166   :  { %3054 = vmatpush1.bf16.msra.mxu0 %v3843_v47  ;;  %3086 = vmatpush1.bf16.msra.mxu1 %v3847_v48 }
 0x167   :  { %3056 = vmatprep.subr.bf16.mxu0 %v3849_v49  ;;  %3088 = vmatprep.subr.bf16.mxu1 %v3861_v53 }
 0x168   :  { %1738 = vmatprep.mubr.f32.mxu0 %v3596_v3  ;;  %1809 = vmatprep.mubr.f32.mxu1 %v3596_v3 }
 0x16a   :  { %3058 = vmatpush1.bf16.msra.mxu0 %v3881_v59  ;;  %3090 = vmatpush1.bf16.msra.mxu1 %v3885_v60 }
 0x16b   :  { %3060 = vmatprep.subr.bf16.mxu0 %v3887_v61  ;;  %3092 = vmatprep.subr.bf16.mxu1 %v3899_v1 }
 0x16e   :  { %3062 = vmatpush1.bf16.msra.mxu0 %v3919_v8  ;;  %3094 = vmatpush1.bf16.msra.mxu1 %v3923_v9 }
 0x16f   :  { %3064 = vmatprep.subr.bf16.mxu0 %v3925_v10  ;;  %3096 = vmatprep.subr.bf16.mxu1 %v3937_v14 }
 0x172   :  { %3066 = vmatpush1.bf16.msra.mxu0 %v3955_v20  ;;  %3098 = vmatpush1.bf16.msra.mxu1 %v3959_v21 }
 0x173   :  { %3068 = vmatprep.subr.bf16.mxu0 %v3961_v22  ;;  %3100 = vmatprep.subr.bf16.mxu1 %v3973_v26 }
 0x176   :  { %3070 = vmatpush1.bf16.msra.mxu0 %v3991_v32  ;;  %3102 = vmatpush1.bf16.msra.mxu1 %v3995_v33 }
 0x177   :  { %3072 = vmatprep.subr.bf16.mxu0 %v3997_v34  ;;  %3104 = vmatprep.subr.bf16.mxu1 %v4009_v39 }
 0x17a   :  { %3074 = vmatpush1.bf16.msra.mxu0 %v4027_v46  ;;  %3106 = vmatpush1.bf16.msra.mxu1 %v4031_v50 }
 0x17b   :  { %3076 = vmatprep.subr.bf16.mxu0 %v4033_v51  ;;  %3108 = vmatprep.subr.bf16.mxu1 %v4045_v56 }
 0x17e   :  { %3078 = vmatpush1.bf16.msra.mxu0 %v4063_v2  ;;  %3110 = vmatpush1.bf16.msra.mxu1 %v4067_v4 }
 0x17f   :  { %3080 = vmatprep.subr.bf16.mxu0 %v4069_v5  ;;  %3112 = vmatprep.subr.bf16.mxu1 %v4078_v11 }
 0x182   :  { %3082 = vmatpush1.bf16.msra.mxu0 %v4087_v15  ;;  %3114 = vmatpush1.bf16.msra.mxu1 %v4091_v16 }
 0x183   :  { %3116 = vmatprep.subr.bf16.mxu0 %v3808_v36  ;;  %3148 = vmatprep.subr.bf16.mxu1 %v3821_v40 }
 0x238   :  { %v1564_v57 = vpop.f32.mrb[2].mxu0  ;;  %v1635_v58 = vpop.f32.mrb[2].mxu1 }
 0x239   :  { %v2767_v62 = vmul.f32 -1.442695, %v1564_v57  ;;  %v1566_v63 = vpop.f32.mrb[3].mxu0  ;;  %v1637_v0 = vpop.f32.mrb[3].mxu1 }
 0x23a   :  { %v2768_v6 = vmul.f32 -1.442695, %v1566_v63  ;;  %v2769_v7 = vmul.f32 -1.442695, %v1637_v0 }
 0x23b   :  { %3484 = vpow2.f32 %v2767_v62 }
 0x23c   :  { %3486 = vpow2.f32 %v2768_v6 }
 0x23d   :  { %3488 = vpow2.f32 %v2769_v7 }
 0x23e   :  { %3490 = vtanh.f32 %v1635_v58 }
 0x245   :  { %v3485_v12 = vpop.eup %3484 }
 0x246   :  { %v3487_v13 = vpop.eup %3486  ;;  %v1647_v17 = vadd.f32 1.0, %v3485_v12 }
 0x247   :  { %v1653_v18 = vadd.f32 1.0, %v3487_v13  ;;  %v3489_v19 = vpop.eup %3488 }
 0x248   :  { %3492 = vrcp.f32 %v1647_v17  ;;  %v3491_v23 = vpop.eup %3490  ;;  %v1660_v28 = vadd.f32 1.0, %v3489_v19 }
 0x249   :  { %3494 = vrcp.f32 %v1653_v18 }
 0x24a   :  { %3496 = vrcp.f32 %v1660_v28 }
 0x252   :  { %v3493_v24 = vpop.eup %3492 }
 0x253   :  { %v3495_v25 = vpop.eup %3494  ;;  %v1664_v27 = vmul.f32 %v3493_v24, %v3491_v23 }
 0x254   :  { %v1663_v29 = vmul.f32 %v3495_v25, %v4134_v45  ;;  %v3497_v31 = vpop.eup %3496 }
 0x256   :  { %v4175_v30 = vadd.f32 %v1664_v27, %v1663_v29 }
 0x258   :  { %3498 = vtanh.f32 %v4175_v30 }
 0x262   :  { %v3499_v35 = vpop.eup %3498 }
 0x263   :  { %v1667_v37 = vmul.f32 %v3499_v35, %v3497_v31 }
 0x265   :  { %2770 = vst [vmem:[%s4390_s3 + $0x8] sm:$0xff] %v1667_v37  ;;  %1739 = vmatmul.mubr.f32.vlgmr.msra.gmra.mrb[4].mxu0 %v1667_v37  ;;  %1810 = vmatmul.mubr.f32.vlgmr.msra.gmra.mrb[4].mxu1 %v1667_v37 }
 0x266   :  { %3118 = vmatpush1.bf16.msra.mxu0 %v3843_v47  ;;  %3150 = vmatpush1.bf16.msra.mxu1 %v3847_v48 }
 0x267   :  { %3120 = vmatprep.subr.bf16.mxu0 %v3849_v49  ;;  %3152 = vmatprep.subr.bf16.mxu1 %v3861_v53 }
 0x268   :  { %1914 = vmatprep.mubr.f32.mxu0 %v3596_v3  ;;  %1985 = vmatprep.mubr.f32.mxu1 %v3596_v3 }
 0x26a   :  { %3122 = vmatpush1.bf16.msra.mxu0 %v3881_v59  ;;  %3154 = vmatpush1.bf16.msra.mxu1 %v3885_v60 }
 0x26b   :  { %3124 = vmatprep.subr.bf16.mxu0 %v3887_v61  ;;  %3156 = vmatprep.subr.bf16.mxu1 %v3899_v1 }
 0x26e   :  { %3126 = vmatpush1.bf16.msra.mxu0 %v3919_v8  ;;  %3158 = vmatpush1.bf16.msra.mxu1 %v3923_v9 }
 0x26f   :  { %3128 = vmatprep.subr.bf16.mxu0 %v3925_v10  ;;  %3160 = vmatprep.subr.bf16.mxu1 %v3937_v14 }
 0x272   :  { %3130 = vmatpush1.bf16.msra.mxu0 %v3955_v20  ;;  %3162 = vmatpush1.bf16.msra.mxu1 %v3959_v21 }
 0x273   :  { %3132 = vmatprep.subr.bf16.mxu0 %v3961_v22  ;;  %3164 = vmatprep.subr.bf16.mxu1 %v3973_v26 }
 0x276   :  { %3134 = vmatpush1.bf16.msra.mxu0 %v3991_v32  ;;  %3166 = vmatpush1.bf16.msra.mxu1 %v3995_v33 }
 0x277   :  { %3136 = vmatprep.subr.bf16.mxu0 %v3997_v34  ;;  %3168 = vmatprep.subr.bf16.mxu1 %v4009_v39 }
 0x27a   :  { %3138 = vmatpush1.bf16.msra.mxu0 %v4027_v46  ;;  %3170 = vmatpush1.bf16.msra.mxu1 %v4031_v50 }
 0x27b   :  { %3140 = vmatprep.subr.bf16.mxu0 %v4033_v51  ;;  %3172 = vmatprep.subr.bf16.mxu1 %v4045_v56 }
 0x27e   :  { %3142 = vmatpush1.bf16.msra.mxu0 %v4063_v2  ;;  %3174 = vmatpush1.bf16.msra.mxu1 %v4067_v4 }
 0x27f   :  { %3144 = vmatprep.subr.bf16.mxu0 %v4069_v5  ;;  %3176 = vmatprep.subr.bf16.mxu1 %v4078_v11 }
 0x282   :  { %3146 = vmatpush1.bf16.msra.mxu0 %v4087_v15  ;;  %3178 = vmatpush1.bf16.msra.mxu1 %v4091_v16 }
 0x283   :  { %3180 = vmatprep.subr.bf16.mxu0 %v3808_v36  ;;  %3212 = vmatprep.subr.bf16.mxu1 %v3821_v40 }
 0x338   :  { %v1740_v38 = vpop.f32.mrb[4].mxu0  ;;  %v1811_v41 = vpop.f32.mrb[4].mxu1 }
 0x339   :  { %v2771_v42 = vmul.f32 -1.442695, %v1740_v38  ;;  %v1742_v43 = vpop.f32.mrb[5].mxu0  ;;  %v1813_v44 = vpop.f32.mrb[5].mxu1 }
 0x33a   :  { %v2772_v45 = vmul.f32 -1.442695, %v1742_v43  ;;  %v2773_v52 = vmul.f32 -1.442695, %v1813_v44 }
 0x33b   :  { %3500 = vpow2.f32 %v2771_v42 }
 0x33c   :  { %3502 = vpow2.f32 %v2772_v45 }
 0x33d   :  { %3504 = vpow2.f32 %v2773_v52 }
 0x33e   :  { %3506 = vtanh.f32 %v1811_v41 }
 0x345   :  { %v3501_v54 = vpop.eup %3500 }
 0x346   :  { %v3503_v55 = vpop.eup %3502  ;;  %v1823_v57 = vadd.f32 1.0, %v3501_v54 }
 0x347   :  { %v1829_v58 = vadd.f32 1.0, %v3503_v55  ;;  %v3505_v62 = vpop.eup %3504 }
 0x348   :  { %3508 = vrcp.f32 %v1823_v57  ;;  %v3507_v63 = vpop.eup %3506  ;;  %v1836_v12 = vadd.f32 1.0, %v3505_v62 }
 0x349   :  { %3510 = vrcp.f32 %v1829_v58 }
 0x34a   :  { %3512 = vrcp.f32 %v1836_v12 }
 0x352   :  { %v3509_v0 = vpop.eup %3508 }
 0x353   :  { %v3511_v6 = vpop.eup %3510  ;;  %v1840_v7 = vmul.f32 %v3509_v0, %v3507_v63 }
 0x354   :  { %v1839_v13 = vmul.f32 %v3511_v6, %v4175_v30  ;;  %v3513_v18 = vpop.eup %3512 }
 0x356   :  { %v4216_v17 = vadd.f32 %v1840_v7, %v1839_v13 }
 0x358   :  { %3514 = vtanh.f32 %v4216_v17 }
 0x362   :  { %v3515_v19 = vpop.eup %3514 }
 0x363   :  { %v1843_v23 = vmul.f32 %v3515_v19, %v3513_v18 }
 0x365   :  { %2774 = vst [vmem:[%s4390_s3 + $0x10] sm:$0xff] %v1843_v23  ;;  %1915 = vmatmul.mubr.f32.vlgmr.msra.gmra.mrb[6].mxu0 %v1843_v23  ;;  %1986 = vmatmul.mubr.f32.vlgmr.msra.gmra.mrb[6].mxu1 %v1843_v23 }
 0x366   :  { %3182 = vmatpush1.bf16.msra.mxu0 %v3843_v47  ;;  %3214 = vmatpush1.bf16.msra.mxu1 %v3847_v48 }
 0x367   :  { %3184 = vmatprep.subr.bf16.mxu0 %v3849_v49  ;;  %3216 = vmatprep.subr.bf16.mxu1 %v3861_v53 }
 0x368   :  { %2090 = vmatprep.mubr.f32.mxu0 %v3596_v3  ;;  %2161 = vmatprep.mubr.f32.mxu1 %v3596_v3 }
 0x36a   :  { %3186 = vmatpush1.bf16.msra.mxu0 %v3881_v59  ;;  %3218 = vmatpush1.bf16.msra.mxu1 %v3885_v60 }
 0x36b   :  { %3188 = vmatprep.subr.bf16.mxu0 %v3887_v61  ;;  %3220 = vmatprep.subr.bf16.mxu1 %v3899_v1 }
 0x36e   :  { %3190 = vmatpush1.bf16.msra.mxu0 %v3919_v8  ;;  %3222 = vmatpush1.bf16.msra.mxu1 %v3923_v9 }
 0x36f   :  { %3192 = vmatprep.subr.bf16.mxu0 %v3925_v10  ;;  %3224 = vmatprep.subr.bf16.mxu1 %v3937_v14 }
 0x372   :  { %3194 = vmatpush1.bf16.msra.mxu0 %v3955_v20  ;;  %3226 = vmatpush1.bf16.msra.mxu1 %v3959_v21 }
 0x373   :  { %3196 = vmatprep.subr.bf16.mxu0 %v3961_v22  ;;  %3228 = vmatprep.subr.bf16.mxu1 %v3973_v26 }
 0x376   :  { %3198 = vmatpush1.bf16.msra.mxu0 %v3991_v32  ;;  %3230 = vmatpush1.bf16.msra.mxu1 %v3995_v33 }
 0x377   :  { %3200 = vmatprep.subr.bf16.mxu0 %v3997_v34  ;;  %3232 = vmatprep.subr.bf16.mxu1 %v4009_v39 }
 0x37a   :  { %3202 = vmatpush1.bf16.msra.mxu0 %v4027_v46  ;;  %3234 = vmatpush1.bf16.msra.mxu1 %v4031_v50 }
 0x37b   :  { %3204 = vmatprep.subr.bf16.mxu0 %v4033_v51  ;;  %3236 = vmatprep.subr.bf16.mxu1 %v4045_v56 }
 0x37e   :  { %3206 = vmatpush1.bf16.msra.mxu0 %v4063_v2  ;;  %3238 = vmatpush1.bf16.msra.mxu1 %v4067_v4 }
 0x37f   :  { %3208 = vmatprep.subr.bf16.mxu0 %v4069_v5  ;;  %3240 = vmatprep.subr.bf16.mxu1 %v4078_v11 }
 0x382   :  { %3210 = vmatpush1.bf16.msra.mxu0 %v4087_v15  ;;  %3242 = vmatpush1.bf16.msra.mxu1 %v4091_v16 }
 0x383   :  { %3244 = vmatprep.subr.bf16.mxu0 %v3808_v36  ;;  %3276 = vmatprep.subr.bf16.mxu1 %v3821_v40 }
 0x438   :  { %v1916_v24 = vpop.f32.mrb[6].mxu0  ;;  %v1987_v25 = vpop.f32.mrb[6].mxu1 }
 0x439   :  { %v2775_v27 = vmul.f32 -1.442695, %v1916_v24  ;;  %v1918_v28 = vpop.f32.mrb[7].mxu0  ;;  %v1989_v29 = vpop.f32.mrb[7].mxu1 }
 0x43a   :  { %v2776_v30 = vmul.f32 -1.442695, %v1918_v28  ;;  %v2777_v31 = vmul.f32 -1.442695, %v1989_v29 }
 0x43b   :  { %3516 = vpow2.f32 %v2775_v27 }
 0x43c   :  { %3518 = vpow2.f32 %v2776_v30 }
 0x43d   :  { %3520 = vpow2.f32 %v2777_v31 }
 0x43e   :  { %3522 = vtanh.f32 %v1987_v25 }
 0x445   :  { %v3517_v35 = vpop.eup %3516 }
 0x446   :  { %v3519_v37 = vpop.eup %3518  ;;  %v1999_v38 = vadd.f32 1.0, %v3517_v35 }
 0x447   :  { %v2005_v41 = vadd.f32 1.0, %v3519_v37  ;;  %v3521_v42 = vpop.eup %3520 }
 0x448   :  { %3524 = vrcp.f32 %v1999_v38  ;;  %v3523_v43 = vpop.eup %3522  ;;  %v2012_v54 = vadd.f32 1.0, %v3521_v42 }
 0x449   :  { %3526 = vrcp.f32 %v2005_v41 }
 0x44a   :  { %3528 = vrcp.f32 %v2012_v54 }
 0x452   :  { %v3525_v44 = vpop.eup %3524 }
 0x453   :  { %v3527_v45 = vpop.eup %3526  ;;  %v2016_v52 = vmul.f32 %v3525_v44, %v3523_v43 }
 0x454   :  { %v2015_v55 = vmul.f32 %v3527_v45, %v4216_v17  ;;  %v3529_v58 = vpop.eup %3528 }
 0x456   :  { %v4257_v57 = vadd.f32 %v2016_v52, %v2015_v55 }
 0x458   :  { %3530 = vtanh.f32 %v4257_v57 }
 0x462   :  { %v3531_v62 = vpop.eup %3530 }
 0x463   :  { %v2019_v63 = vmul.f32 %v3531_v62, %v3529_v58 }
 0x465   :  { %2778 = vst [vmem:[%s4390_s3 + $0x18] sm:$0xff] %v2019_v63  ;;  %2091 = vmatmul.mubr.f32.vlgmr.msra.gmra.mrb[8].mxu0 %v2019_v63  ;;  %2162 = vmatmul.mubr.f32.vlgmr.msra.gmra.mrb[8].mxu1 %v2019_v63 }
 0x466   :  { %3246 = vmatpush1.bf16.msra.mxu0 %v3843_v47  ;;  %3278 = vmatpush1.bf16.msra.mxu1 %v3847_v48 }
 0x467   :  { %3248 = vmatprep.subr.bf16.mxu0 %v3849_v49  ;;  %3280 = vmatprep.subr.bf16.mxu1 %v3861_v53 }
 0x468   :  { %2266 = vmatprep.mubr.f32.mxu0 %v3596_v3  ;;  %2337 = vmatprep.mubr.f32.mxu1 %v3596_v3 }
 0x46a   :  { %3250 = vmatpush1.bf16.msra.mxu0 %v3881_v59  ;;  %3282 = vmatpush1.bf16.msra.mxu1 %v3885_v60 }
 0x46b   :  { %3252 = vmatprep.subr.bf16.mxu0 %v3887_v61  ;;  %3284 = vmatprep.subr.bf16.mxu1 %v3899_v1 }
 0x46e   :  { %3254 = vmatpush1.bf16.msra.mxu0 %v3919_v8  ;;  %3286 = vmatpush1.bf16.msra.mxu1 %v3923_v9 }
 0x46f   :  { %3256 = vmatprep.subr.bf16.mxu0 %v3925_v10  ;;  %3288 = vmatprep.subr.bf16.mxu1 %v3937_v14 }
 0x472   :  { %3258 = vmatpush1.bf16.msra.mxu0 %v3955_v20  ;;  %3290 = vmatpush1.bf16.msra.mxu1 %v3959_v21 }
 0x473   :  { %3260 = vmatprep.subr.bf16.mxu0 %v3961_v22  ;;  %3292 = vmatprep.subr.bf16.mxu1 %v3973_v26 }
 0x476   :  { %3262 = vmatpush1.bf16.msra.mxu0 %v3991_v32  ;;  %3294 = vmatpush1.bf16.msra.mxu1 %v3995_v33 }
 0x477   :  { %3264 = vmatprep.subr.bf16.mxu0 %v3997_v34  ;;  %3296 = vmatprep.subr.bf16.mxu1 %v4009_v39 }
 0x47a   :  { %3266 = vmatpush1.bf16.msra.mxu0 %v4027_v46  ;;  %3298 = vmatpush1.bf16.msra.mxu1 %v4031_v50 }
 0x47b   :  { %3268 = vmatprep.subr.bf16.mxu0 %v4033_v51  ;;  %3300 = vmatprep.subr.bf16.mxu1 %v4045_v56 }
 0x47e   :  { %3270 = vmatpush1.bf16.msra.mxu0 %v4063_v2  ;;  %3302 = vmatpush1.bf16.msra.mxu1 %v4067_v4 }
 0x47f   :  { %3272 = vmatprep.subr.bf16.mxu0 %v4069_v5  ;;  %3304 = vmatprep.subr.bf16.mxu1 %v4078_v11 }
 0x482   :  { %3274 = vmatpush1.bf16.msra.mxu0 %v4087_v15  ;;  %3306 = vmatpush1.bf16.msra.mxu1 %v4091_v16 }
 0x483   :  { %3308 = vmatprep.subr.bf16.mxu0 %v3808_v36  ;;  %3340 = vmatprep.subr.bf16.mxu1 %v3821_v40 }
 0x538   :  { %v2092_v0 = vpop.f32.mrb[8].mxu0  ;;  %v2163_v6 = vpop.f32.mrb[8].mxu1 }
 0x539   :  { %v2779_v7 = vmul.f32 -1.442695, %v2092_v0  ;;  %v2094_v12 = vpop.f32.mrb[9].mxu0  ;;  %v2165_v13 = vpop.f32.mrb[9].mxu1 }
 0x53a   :  { %v2780_v17 = vmul.f32 -1.442695, %v2094_v12  ;;  %v2781_v18 = vmul.f32 -1.442695, %v2165_v13 }
 0x53b   :  { %3532 = vpow2.f32 %v2779_v7 }
 0x53c   :  { %3534 = vpow2.f32 %v2780_v17 }
 0x53d   :  { %3536 = vpow2.f32 %v2781_v18 }
 0x53e   :  { %3538 = vtanh.f32 %v2163_v6 }
 0x545   :  { %v3533_v19 = vpop.eup %3532 }
 0x546   :  { %v3535_v23 = vpop.eup %3534  ;;  %v2175_v24 = vadd.f32 1.0, %v3533_v19 }
 0x547   :  { %v2181_v25 = vadd.f32 1.0, %v3535_v23  ;;  %v3537_v27 = vpop.eup %3536 }
 0x548   :  { %3540 = vrcp.f32 %v2175_v24  ;;  %v3539_v28 = vpop.eup %3538  ;;  %v2188_v35 = vadd.f32 1.0, %v3537_v27 }
 0x549   :  { %3542 = vrcp.f32 %v2181_v25 }
 0x54a   :  { %3544 = vrcp.f32 %v2188_v35 }
 0x552   :  { %v3541_v29 = vpop.eup %3540 }
 0x553   :  { %v3543_v30 = vpop.eup %3542  ;;  %v2192_v31 = vmul.f32 %v3541_v29, %v3539_v28 }
 0x554   :  { %v2191_v37 = vmul.f32 %v3543_v30, %v4257_v57  ;;  %v3545_v41 = vpop.eup %3544 }
 0x556   :  { %v4298_v38 = vadd.f32 %v2192_v31, %v2191_v37 }
 0x558   :  { %3546 = vtanh.f32 %v4298_v38 }
 0x562   :  { %v3547_v42 = vpop.eup %3546 }
 0x563   :  { %v2195_v43 = vmul.f32 %v3547_v42, %v3545_v41 }
 0x565   :  { %2782 = vst [vmem:[%s4390_s3 + $0x20] sm:$0xff] %v2195_v43  ;;  %2267 = vmatmul.mubr.f32.vlgmr.msra.gmra.mrb[10].mxu0 %v2195_v43  ;;  %2338 = vmatmul.mubr.f32.vlgmr.msra.gmra.mrb[10].mxu1 %v2195_v43 }
 0x566   :  { %3310 = vmatpush1.bf16.msra.mxu0 %v3843_v47  ;;  %3342 = vmatpush1.bf16.msra.mxu1 %v3847_v48 }
 0x567   :  { %3312 = vmatprep.subr.bf16.mxu0 %v3849_v49  ;;  %3344 = vmatprep.subr.bf16.mxu1 %v3861_v53 }
 0x568   :  { %2442 = vmatprep.mubr.f32.mxu0 %v3596_v3  ;;  %2513 = vmatprep.mubr.f32.mxu1 %v3596_v3 }
 0x56a   :  { %3314 = vmatpush1.bf16.msra.mxu0 %v3881_v59  ;;  %3346 = vmatpush1.bf16.msra.mxu1 %v3885_v60 }
 0x56b   :  { %3316 = vmatprep.subr.bf16.mxu0 %v3887_v61  ;;  %3348 = vmatprep.subr.bf16.mxu1 %v3899_v1 }
 0x56e   :  { %3318 = vmatpush1.bf16.msra.mxu0 %v3919_v8  ;;  %3350 = vmatpush1.bf16.msra.mxu1 %v3923_v9 }
 0x56f   :  { %3320 = vmatprep.subr.bf16.mxu0 %v3925_v10  ;;  %3352 = vmatprep.subr.bf16.mxu1 %v3937_v14 }
 0x572   :  { %3322 = vmatpush1.bf16.msra.mxu0 %v3955_v20  ;;  %3354 = vmatpush1.bf16.msra.mxu1 %v3959_v21 }
 0x573   :  { %3324 = vmatprep.subr.bf16.mxu0 %v3961_v22  ;;  %3356 = vmatprep.subr.bf16.mxu1 %v3973_v26 }
 0x576   :  { %3326 = vmatpush1.bf16.msra.mxu0 %v3991_v32  ;;  %3358 = vmatpush1.bf16.msra.mxu1 %v3995_v33 }
 0x577   :  { %3328 = vmatprep.subr.bf16.mxu0 %v3997_v34  ;;  %3360 = vmatprep.subr.bf16.mxu1 %v4009_v39 }
 0x57a   :  { %3330 = vmatpush1.bf16.msra.mxu0 %v4027_v46  ;;  %3362 = vmatpush1.bf16.msra.mxu1 %v4031_v50 }
 0x57b   :  { %3332 = vmatprep.subr.bf16.mxu0 %v4033_v51  ;;  %3364 = vmatprep.subr.bf16.mxu1 %v4045_v56 }
 0x57e   :  { %3334 = vmatpush1.bf16.msra.mxu0 %v4063_v2  ;;  %3366 = vmatpush1.bf16.msra.mxu1 %v4067_v4 }
 0x57f   :  { %3336 = vmatprep.subr.bf16.mxu0 %v4069_v5  ;;  %3368 = vmatprep.subr.bf16.mxu1 %v4078_v11 }
 0x582   :  { %3338 = vmatpush1.bf16.msra.mxu0 %v4087_v15  ;;  %3370 = vmatpush1.bf16.msra.mxu1 %v4091_v16 }
 0x583   :  { %3372 = vmatprep.subr.bf16.mxu0 %v3808_v36  ;;  %3404 = vmatprep.subr.bf16.mxu1 %v3821_v40 }
 0x638   :  { %v2268_v44 = vpop.f32.mrb[10].mxu0  ;;  %v2339_v45 = vpop.f32.mrb[10].mxu1 }
 0x639   :  { %v2783_v52 = vmul.f32 -1.442695, %v2268_v44  ;;  %v2270_v54 = vpop.f32.mrb[11].mxu0  ;;  %v2341_v55 = vpop.f32.mrb[11].mxu1 }
 0x63a   :  { %v2784_v57 = vmul.f32 -1.442695, %v2270_v54  ;;  %v2785_v58 = vmul.f32 -1.442695, %v2341_v55 }
 0x63b   :  { %3548 = vpow2.f32 %v2783_v52 }
 0x63c   :  { %3550 = vpow2.f32 %v2784_v57 }
 0x63d   :  { %3552 = vpow2.f32 %v2785_v58 }
 0x63e   :  { %3554 = vtanh.f32 %v2339_v45 }
 0x645   :  { %v3549_v62 = vpop.eup %3548 }
 0x646   :  { %v3551_v63 = vpop.eup %3550  ;;  %v2351_v0 = vadd.f32 1.0, %v3549_v62 }
 0x647   :  { %v2357_v6 = vadd.f32 1.0, %v3551_v63  ;;  %v3553_v36 = vpop.eup %3552 }
 0x648   :  { %3556 = vrcp.f32 %v2351_v0  ;;  %v3555_v7 = vpop.eup %3554  ;;  %v2364_v17 = vadd.f32 1.0, %v3553_v36 }
 0x649   :  { %3558 = vrcp.f32 %v2357_v6 }
 0x64a   :  { %3560 = vrcp.f32 %v2364_v17 }
 0x652   :  { %v3557_v40 = vpop.eup %3556 }
 0x653   :  { %v3559_v12 = vpop.eup %3558  ;;  %v2368_v13 = vmul.f32 %v3557_v40, %v3555_v7 }
 0x654   :  { %v2367_v18 = vmul.f32 %v3559_v12, %v4298_v38  ;;  %v3561_v23 = vpop.eup %3560 }
 0x656   :  { %v4339_v19 = vadd.f32 %v2368_v13, %v2367_v18 }
 0x658   :  { %3562 = vtanh.f32 %v4339_v19 }
 0x662   :  { %v3563_v24 = vpop.eup %3562 }
 0x663   :  { %v2371_v25 = vmul.f32 %v3563_v24, %v3561_v23 }
 0x665   :  { %2786 = vst [vmem:[%s4390_s3 + $0x28] sm:$0xff] %v2371_v25  ;;  %2443 = vmatmul.mubr.f32.vlgmr.msra.gmra.mrb[12].mxu0 %v2371_v25  ;;  %2514 = vmatmul.mubr.f32.vlgmr.msra.gmra.mrb[12].mxu1 %v2371_v25 }
 0x666   :  { %3374 = vmatpush1.bf16.msra.mxu0 %v3843_v47  ;;  %3406 = vmatpush1.bf16.msra.mxu1 %v3847_v48 }
 0x667   :  { %3376 = vmatprep.subr.bf16.mxu0 %v3849_v49  ;;  %3408 = vmatprep.subr.bf16.mxu1 %v3861_v53 }
 0x668   :  { %2618 = vmatprep.mubr.f32.mxu0 %v3596_v3  ;;  %2689 = vmatprep.mubr.f32.mxu1 %v3596_v3 }
 0x66a   :  { %3378 = vmatpush1.bf16.msra.mxu0 %v3881_v59  ;;  %3410 = vmatpush1.bf16.msra.mxu1 %v3885_v60 }
 0x66b   :  { %3380 = vmatprep.subr.bf16.mxu0 %v3887_v61  ;;  %3412 = vmatprep.subr.bf16.mxu1 %v3899_v1 }
 0x66e   :  { %3382 = vmatpush1.bf16.msra.mxu0 %v3919_v8  ;;  %3414 = vmatpush1.bf16.msra.mxu1 %v3923_v9 }
 0x66f   :  { %3384 = vmatprep.subr.bf16.mxu0 %v3925_v10  ;;  %3416 = vmatprep.subr.bf16.mxu1 %v3937_v14 }
 0x672   :  { %3386 = vmatpush1.bf16.msra.mxu0 %v3955_v20  ;;  %3418 = vmatpush1.bf16.msra.mxu1 %v3959_v21 }
 0x673   :  { %3388 = vmatprep.subr.bf16.mxu0 %v3961_v22  ;;  %3420 = vmatprep.subr.bf16.mxu1 %v3973_v26 }
 0x676   :  { %3390 = vmatpush1.bf16.msra.mxu0 %v3991_v32  ;;  %3422 = vmatpush1.bf16.msra.mxu1 %v3995_v33 }
 0x677   :  { %3392 = vmatprep.subr.bf16.mxu0 %v3997_v34  ;;  %3424 = vmatprep.subr.bf16.mxu1 %v4009_v39 }
 0x67a   :  { %3394 = vmatpush1.bf16.msra.mxu0 %v4027_v46  ;;  %3426 = vmatpush1.bf16.msra.mxu1 %v4031_v50 }
 0x67b   :  { %3396 = vmatprep.subr.bf16.mxu0 %v4033_v51  ;;  %3428 = vmatprep.subr.bf16.mxu1 %v4045_v56 }
 0x67e   :  { %3398 = vmatpush1.bf16.msra.mxu0 %v4063_v2  ;;  %3430 = vmatpush1.bf16.msra.mxu1 %v4067_v4 }
 0x67f   :  { %3400 = vmatprep.subr.bf16.mxu0 %v4069_v5  ;;  %3432 = vmatprep.subr.bf16.mxu1 %v4078_v11 }
 0x682   :  { %3402 = vmatpush1.bf16.msra.mxu0 %v4087_v15  ;;  %3434 = vmatpush1.bf16.msra.mxu1 %v4091_v16 }
 0x738   :  { %v2444_v3 = vpop.f32.mrb[12].mxu0  ;;  %v2515_v47 = vpop.f32.mrb[12].mxu1 }
 0x739   :  { %v2787_v48 = vmul.f32 -1.442695, %v2444_v3  ;;  %v2446_v49 = vpop.f32.mrb[13].mxu0  ;;  %v2517_v53 = vpop.f32.mrb[13].mxu1 }
 0x73a   :  { %v2788_v59 = vmul.f32 -1.442695, %v2446_v49  ;;  %v2789_v60 = vmul.f32 -1.442695, %v2517_v53 }
 0x73b   :  { %3564 = vpow2.f32 %v2787_v48 }
 0x73c   :  { %3566 = vpow2.f32 %v2788_v59 }
 0x73d   :  { %3568 = vpow2.f32 %v2789_v60 }
 0x73e   :  { %3570 = vtanh.f32 %v2515_v47 }
 0x745   :  { %v3565_v61 = vpop.eup %3564 }
 0x746   :  { %v3567_v1 = vpop.eup %3566  ;;  %v2527_v8 = vadd.f32 1.0, %v3565_v61 }
 0x747   :  { %v2533_v9 = vadd.f32 1.0, %v3567_v1  ;;  %v3569_v10 = vpop.eup %3568 }
 0x748   :  { %3572 = vrcp.f32 %v2527_v8  ;;  %v3571_v14 = vpop.eup %3570  ;;  %v2540_v26 = vadd.f32 1.0, %v3569_v10 }
 0x749   :  { %3574 = vrcp.f32 %v2533_v9 }
 0x74a   :  { %3576 = vrcp.f32 %v2540_v26 }
 0x752   :  { %v3573_v20 = vpop.eup %3572 }
 0x753   :  { %v3575_v21 = vpop.eup %3574  ;;  %v2544_v22 = vmul.f32 %v3573_v20, %v3571_v14 }
 0x754   :  { %v2543_v32 = vmul.f32 %v3575_v21, %v4339_v19  ;;  %v3577_v34 = vpop.eup %3576 }
 0x756   :  { %v2545_v33 = vadd.f32 %v2544_v22, %v2543_v32 }
 0x758   :  { %3578 = vtanh.f32 %v2545_v33 }
 0x762   :  { %v3579_v39 = vpop.eup %3578 }
 0x763   :  { %v2547_v46 = vmul.f32 %v3579_v39, %v3577_v34 }
 0x765   :  { %2790 = vst [vmem:[%s4390_s3 + $0x30] sm:$0xff] %v2547_v46  ;;  %2619 = vmatmul.mubr.f32.vlgmr.msra.gmra.mrb[14].mxu0 %v2547_v46  ;;  %2690 = vmatmul.mubr.f32.vlgmr.msra.gmra.mrb[14].mxu1 %v2547_v46 }
 0x838   :  { %v2620_v50 = vpop.f32.mrb[14].mxu0  ;;  %v2691_v51 = vpop.f32.mrb[14].mxu1 }
 0x839   :  { %v2791_v56 = vmul.f32 -1.442695, %v2620_v50  ;;  %v2622_v2 = vpop.f32.mrb[15].mxu0  ;;  %v2693_v4 = vpop.f32.mrb[15].mxu1 }
 0x83a   :  { %v2792_v5 = vmul.f32 -1.442695, %v2622_v2  ;;  %v2793_v11 = vmul.f32 -1.442695, %v2693_v4 }
 0x83b   :  { %3580 = vpow2.f32 %v2791_v56 }
 0x83c   :  { %3582 = vpow2.f32 %v2792_v5 }
 0x83d   :  { %3584 = vpow2.f32 %v2793_v11 }
 0x83e   :  { %3586 = vtanh.f32 %v2691_v51 }
 0x845   :  { %v3581_v15 = vpop.eup %3580 }
 0x846   :  { %v3583_v16 = vpop.eup %3582  ;;  %v2703_v27 = vadd.f32 1.0, %v3581_v15 }
 0x847   :  { %v2709_v28 = vadd.f32 1.0, %v3583_v16  ;;  %v3585_v29 = vpop.eup %3584 }
 0x848   :  { %3588 = vrcp.f32 %v2703_v27  ;;  %v3587_v30 = vpop.eup %3586  ;;  %v2716_v38 = vadd.f32 1.0, %v3585_v29 }
 0x849   :  { %3590 = vrcp.f32 %v2709_v28 }
 0x84a   :  { %3592 = vrcp.f32 %v2716_v38 }
 0x852   :  { %v3589_v31 = vpop.eup %3588 }
 0x853   :  { %v3591_v35 = vpop.eup %3590  ;;  %v2720_v37 = vmul.f32 %v3589_v31, %v3587_v30 }
 0x854   :  { %v2719_v41 = vmul.f32 %v3591_v35, %v2545_v33  ;;  %v3593_v43 = vpop.eup %3592 }
 0x856   :  { %v2721_v42 = vadd.f32 %v2720_v37, %v2719_v41 }
 0x858   :  { %3594 = vtanh.f32 %v2721_v42  ;;  %2732 = vst [vmem:[%s4391_s4] sm:$0xff] %v2721_v42 }
 0x862   :  { %v3595_v44 = vpop.eup %3594 }
 0x863   :  { %v2723_v45 = vmul.f32 %v3595_v44, %v3593_v43 }
 0x865   :  { %2794 = vst [vmem:[%s4390_s3 + $0x38] sm:$0xff] %v2723_v45 }

</bundles_post_ra>
